<compile_context>
chip_gen: v5e
topology: v5e:2x2
jax: 0.10.0
libtpu: 0.0.40
codegen_flags: <defaults>
</compile_context>

<pallas_src>
import functools

import jax
import jax.numpy as jnp
from jax import lax
from jax.experimental import pallas as pl
from jax.experimental.pallas import tpu as pltpu


def _round_up(x, m):
    return (x + m - 1) // m * m


@functools.lru_cache(maxsize=None)
def _vmem_budget_bytes():
    """~75% of physical VMEM: ~96 MiB on v5e/v6e (128 MiB), ~48 MiB on v7x (64 MiB)."""
    try:
        cap = int(pltpu.get_tpu_info().vmem_capacity_bytes)
    except Exception:                       # interpret mode / API drift -> v7x-safe fallback
        cap = 64 * 1024 * 1024
    return max(32 * 1024 * 1024, min(cap * 3 // 4, 96 * 1024 * 1024))


def _pick_tm(m8, k, cout_p, out_bytes):
    """Largest M tile whose double-buffered A/out tiles plus weight tile fit the budget."""
    budget = int(_vmem_budget_bytes() * 0.8)        # headroom for bias/stats/semaphores
    w_bytes = 2 * k * cout_p * 2                    # double-buffered bf16 weight tile
    per_row = 2 * (k * 2 + cout_p * out_bytes)      # double-buffered A row + output row
    tm_cap = max(8, (budget - w_bytes) // per_row)
    tm_cap = (tm_cap // 256) * 256 if tm_cap >= 256 else max(8, (tm_cap // 8) * 8)
    # NOTE: for large problems on v7x keep grid_m >= 2 so both TensorCores get work; at the
    # benchmark shapes every layer is a single tile regardless.
    return min(tm_cap, m8)


# ---------------------------------------------------------------------------
# Pallas kernel: one M tile of im2col conv (+bias) (+LeakyReLU) (+BN partial stats)
# ---------------------------------------------------------------------------

def _conv_kernel(*refs, has_bias, leaky, with_stats, tm, m_valid):
    it = iter(refs)
    a_ref = next(it)                            # (tm, K)       bf16
    w_ref = next(it)                            # (K, Cout_p)   bf16
    b_ref = next(it) if has_bias else None      # (1, Cout_p)   f32
    o_ref = next(it)                            # (tm, Cout_p)  bf16 / f32, lane-dense
    st_ref = next(it) if with_stats else None   # (8, Cout_p)   f32: row0=sum, row1=centered sq

    acc = jnp.dot(a_ref[...], w_ref[...], preferred_element_type=jnp.float32)
    if has_bias:
        acc = acc + b_ref[...]
    if leaky:
        acc = jnp.maximum(acc, 0.2 * acc)       # LeakyReLU(0.2)
    o_ref[...] = acc.astype(o_ref.dtype)

    if with_stats:
        # Per-tile BatchNorm partials on the f32 accumulator; padded rows are masked out.
        base = pl.program_id(0) * tm
        row = lax.broadcasted_iota(jnp.int32, (tm, 1), 0) + base
        valid = row < m_valid
        cnt = jnp.minimum(m_valid - base, tm).astype(jnp.float32)   # >= 1 by construction
        s = jnp.sum(jnp.where(valid, acc, 0.0), axis=0, keepdims=True)
        mean_t = s / cnt
        d = jnp.where(valid, acc - mean_t, 0.0)
        q = jnp.sum(d * d, axis=0, keepdims=True)
        st_ref[0:1, :] = s                      # rows 2..7 of the stats block are don't-care
        st_ref[1:2, :] = q


# ---------------------------------------------------------------------------
# Wrappers: im2col / padding glue in XLA, all FLOPs in Pallas
# ---------------------------------------------------------------------------

def _im2col(x_nhwc, kh, kw, stride, pad):
    """x: [N,H,W,C] -> bf16 patches [N*Ho*Wo, kh*kw*C], tap-major (kh, kw, cin) ordering."""
    x = jnp.pad(x_nhwc, ((0, 0), (pad, pad), (pad, pad), (0, 0))).astype(jnp.bfloat16)
    n, hp, wp, _ = x.shape
    ho = (hp - kh) // stride + 1
    wo = (wp - kw) // stride + 1
    cols = [x[:, i:i + stride * ho:stride, j:j + stride * wo:stride, :]
            for i in range(kh) for j in range(kw)]
    patches = jnp.concatenate(cols, axis=-1)                 # [N, Ho, Wo, kh*kw*C]
    return patches.reshape(n * ho * wo, patches.shape[-1]), (n, ho, wo)


def _conv_pallas(x_nhwc, w_oihw, bias, *, stride, pad, leaky, with_stats, out_dtype):
    """Conv2d (PyTorch OIHW weights) as an M-tiled, lane-dense Pallas MXU matmul."""
    cout, cin, kh, kw = w_oihw.shape

    # Pad cin to a multiple of 8 so K = kh*kw*cin_p is a multiple of 128 (lane-dense A).
    cin_p = _round_up(cin, 8)
    if cin_p != cin:
        x_nhwc = jnp.pad(x_nhwc, ((0, 0), (0, 0), (0, 0), (0, cin_p - cin)))
        w_oihw = jnp.pad(w_oihw, ((0, 0), (0, cin_p - cin), (0, 0), (0, 0)))

    # TODO(synk): patch slab is still materialized in XLA (bf16); true elimination needs
    # in-kernel strided / manual-DMA loads of the padded NHWC activation.
    a, (n, ho, wo) = _im2col(x_nhwc, kh, kw, stride, pad)
    m, k = a.shape

    cout_p = _round_up(cout, 128)                # lane-dense output blocks (unmasked vst)
    out_bytes = jnp.finfo(out_dtype).bits // 8
    m8 = _round_up(m, 8)
    tm = _pick_tm(m8, k, cout_p, out_bytes)
    m_pad = _round_up(m, tm)
    grid_m = m_pad // tm
    if m_pad != m:
        a = jnp.pad(a, ((0, m_pad - m), (0, 0)))

    w2 = jnp.transpose(w_oihw, (2, 3, 1, 0)).reshape(kh * kw * cin_p, cout).astype(jnp.bfloat16)
    if cout_p != cout:
        w2 = jnp.pad(w2, ((0, 0), (0, cout_p - cout)))

    inputs = [a, w2]
    in_specs = [pl.BlockSpec((tm, k), lambda i: (i, 0)),
                pl.BlockSpec((k, cout_p), lambda i: (0, 0))]
    if bias is not None:
        b = bias.astype(jnp.float32).reshape(1, cout)
        if cout_p != cout:
            b = jnp.pad(b, ((0, 0), (0, cout_p - cout)))
        inputs.append(b)
        in_specs.append(pl.BlockSpec((1, cout_p), lambda i: (0, 0)))

    out_shape = [jax.ShapeDtypeStruct((m_pad, cout_p), out_dtype)]
    out_specs = [pl.BlockSpec((tm, cout_p), lambda i: (i, 0))]
    if with_stats:
        out_shape.append(jax.ShapeDtypeStruct((grid_m * 8, cout_p), jnp.float32))
        out_specs.append(pl.BlockSpec((8, cout_p), lambda i: (i, 0)))

    kernel = functools.partial(_conv_kernel, has_bias=bias is not None, leaky=leaky,
                               with_stats=with_stats, tm=tm, m_valid=m)

    results = pl.pallas_call(
        kernel,
        out_shape=tuple(out_shape),
        grid=(grid_m,),
        in_specs=in_specs,
        out_specs=tuple(out_specs),
        compiler_params=pltpu.CompilerParams(
            dimension_semantics=("parallel",),
            vmem_limit_bytes=_vmem_budget_bytes()),
    )(*inputs)

    y_pad = results[0]
    stats = None
    if with_stats:
        st = results[1].reshape(grid_m, 8, cout_p)
        sums = st[:, 0, :cout]                               # (grid_m, cout)
        qs = st[:, 1, :cout]                                 # (grid_m, cout)
        counts = jnp.array([min(m - i * tm, tm) for i in range(grid_m)], jnp.float32)
        stats = (sums, qs, counts)
    return y_pad, (n, ho, wo, m, cout), stats


# ---------------------------------------------------------------------------
# Layer compositions
# ---------------------------------------------------------------------------

def conv_leaky(x, w, b, *, stride=2, pad=1):
    """Conv + bias + LeakyReLU(0.2) (bn=False block).  bf16 output feeds the next im2col."""
    y, (n, ho, wo, m, cout), _ = _conv_pallas(
        x, w, b, stride=stride, pad=pad, leaky=True, with_stats=False,
        out_dtype=jnp.bfloat16)
    return y[:m, :cout].reshape(n, ho, wo, cout)


def conv_bn_leaky(x, w, gamma, beta, *, eps=1e-5):
    """Conv (bias dropped: BN cancels it exactly) + training-mode BatchNorm + LeakyReLU(0.2).

    Per-tile centered partials from the kernel are merged with Chan's parallel-variance
    formula; the affine + LeakyReLU is plain jnp, so XLA fuses it into the next layer's
    im2col fusion (no separate activation pass over HBM).
    """
    y, (n, ho, wo, m, cout), (sums, qs, counts) = _conv_pallas(
        x, w, None, stride=2, pad=1, leaky=False, with_stats=True,
        out_dtype=jnp.bfloat16)
    counts = counts[:, None]                                  # (grid_m, 1)
    mean_t = sums / counts
    mean = jnp.sum(sums, axis=0) / m
    var = (jnp.sum(qs, axis=0) + jnp.sum(counts * jnp.square(mean_t - mean), axis=0)) / m
    scale = gamma / jnp.sqrt(var + eps)                       # biased batch var (train mode)
    shift = beta - mean * scale
    act = y[:m, :cout].astype(jnp.float32) * scale + shift
    act = jnp.maximum(act, 0.2 * act)
    return act.reshape(n, ho, wo, cout).astype(jnp.bfloat16)


def conv_final(x, w, *, stride=1, pad=1):
    """Final conv(256 -> 1, k4, s1, p1, bias=False); Cout padded to 128 lanes inside."""
    y, (n, ho, wo, m, cout), _ = _conv_pallas(
        x, w, None, stride=stride, pad=pad, leaky=False, with_stats=False,
        out_dtype=jnp.float32)
    return y[:m, :cout].reshape(n, ho, wo, cout)


# ---------------------------------------------------------------------------
# Parameter init (deterministic, PyTorch-like uniform(-1/sqrt(fan_in), ...))
# ---------------------------------------------------------------------------

def init_params(key, in_channels=3):
    chans = [(in_channels * 2, 32), (32, 64), (64, 128), (128, 256)]
    params = {}
    for idx, (cin, cout) in enumerate(chans, start=1):
        key, kw_, kb_ = jax.random.split(key, 3)
        bound = 1.0 / jnp.sqrt(cin * 4 * 4)
        params[f"w{idx}"] = jax.random.uniform(kw_, (cout, cin, 4, 4), jnp.float32, -bound, bound)
        params[f"b{idx}"] = jax.random.uniform(kb_, (cout,), jnp.float32, -bound, bound)
        if idx >= 2:
            params[f"gamma{idx}"] = jnp.ones((cout,), jnp.float32)
            params[f"beta{idx}"] = jnp.zeros((cout,), jnp.float32)
    key, kw_ = jax.random.split(key)
    bound = 1.0 / jnp.sqrt(256 * 4 * 4)
    params["w5"] = jax.random.uniform(kw_, (1, 256, 4, 4), jnp.float32, -bound, bound)  # bias=False
    return params


# ---------------------------------------------------------------------------
# Forward pass
# ---------------------------------------------------------------------------

@jax.jit
def discriminator_forward(params, img_a, img_b):
    """img_a, img_b: NCHW float32 -> NCHW patch logits (matches the PyTorch module)."""
    x = jnp.concatenate([img_a, img_b], axis=1)      # [N, 2*Cin, H, W]
    x = jnp.transpose(x, (0, 2, 3, 1))               # NHWC: channels on the lane dim

    # block 1: conv(2*Cin -> 32, k4, s2, p1) + LeakyReLU (no BN); bias fused in-kernel.
    y = conv_leaky(x, params["w1"], params["b1"])

    # blocks 2-4: conv + BatchNorm + LeakyReLU.  Conv bias (params[f"b{i}"]) is dropped:
    # BatchNorm subtracts the batch mean, which absorbs the bias exactly.
    for idx in (2, 3, 4):
        y = conv_bn_leaky(y, params[f"w{idx}"], params[f"gamma{idx}"], params[f"beta{idx}"])

    # nn.ZeroPad2d((left=1, right=0, top=1, bottom=0))
    y = jnp.pad(y, ((0, 0), (1, 0), (1, 0), (0, 0)))

    # final conv(256 -> 1, k4, s1, p1, bias=False), no activation.
    y = conv_final(y, params["w5"])

    return jnp.transpose(y, (0, 3, 1, 2))            # back to NCHW


# ---------------------------------------------------------------------------
# Main
# ---------------------------------------------------------------------------

if __name__ == "__main__":
    key = jax.random.PRNGKey(0)
    kp, ka, kb = jax.random.split(key, 3)

    params = init_params(kp, in_channels=3)

    N, C, H, W = 2, 3, 16, 16
    img_a = jax.random.normal(ka, (N, C, H, W), jnp.float32)
    img_b = jax.random.normal(kb, (N, C, H, W), jnp.float32)

    out = discriminator_forward(params, img_a, img_b)
    jax.block_until_ready(out)

    # H=16 -> 8 -> 4 -> 2 -> 1 -> (ZeroPad) 2 -> (k4, p1, s1) 1  => [2, 1, 1, 1]
    assert out.shape == (N, 1, H // 16, W // 16), out.shape
    print("KERNEL_OK")
</pallas_src>

<mosaic_0001>
module attributes {stable_mosaic.version = 11 : i64} {
  func.func @_conv_kernel(%arg0: i32, %arg1: memref<128x128xbf16, #tpu.memory_space<vmem>>, %arg2: memref<128x128xbf16, #tpu.memory_space<vmem>>, %arg3: memref<1x128xf32, #tpu.memory_space<vmem>>, %arg4: memref<128x128xbf16, #tpu.memory_space<vmem>>) attributes {dimension_semantics = [#tpu.dimension_semantics<parallel>], iteration_bounds = array<i64: 1>, scalar_prefetch = 0 : i64, scratch_operands = 0 : i64, tpu.core_type = #tpu.core_type<tc>, window_params = [{transform_indices = @transform_0, window_bounds = array<i64: 128, 128>}, {pipeline_mode = #tpu.pipeline_mode<synchronous>, transform_indices = @transform_1, window_bounds = array<i64: 128, 128>}, {pipeline_mode = #tpu.pipeline_mode<synchronous>, transform_indices = @transform_2, window_bounds = array<i64: 1, 128>}, {transform_indices = @transform_3, window_bounds = array<i64: 128, 128>}]} {
    %c0 = arith.constant 0 : index
    %c0_0 = arith.constant 0 : index
    %0 = vector.load %arg1[%c0, %c0_0] : memref<128x128xbf16, #tpu.memory_space<vmem>>, vector<128x128xbf16>
    %c0_1 = arith.constant 0 : index
    %c0_2 = arith.constant 0 : index
    %1 = vector.load %arg2[%c0_1, %c0_2] : memref<128x128xbf16, #tpu.memory_space<vmem>>, vector<128x128xbf16>
    %cst = arith.constant dense<0.000000e+00> : vector<128x128xf32>
    %2 = tpu.matmul %0, %1, %cst {dimension_numbers = #tpu.dot_dimension_numbers<[1], [0], [0], [1], [0, 0, 1, 1], [], []>} : vector<128x128xbf16>, vector<128x128xbf16>, vector<128x128xf32> -> vector<128x128xf32>
    %c0_3 = arith.constant 0 : index
    %c0_4 = arith.constant 0 : index
    %3 = vector.load %arg3[%c0_3, %c0_4] : memref<1x128xf32, #tpu.memory_space<vmem>>, vector<1x128xf32>
    %4 = vector.broadcast %3 : vector<1x128xf32> to vector<128x128xf32>
    %5 = arith.addf %2, %4 : vector<128x128xf32>
    %cst_5 = arith.constant 2.000000e-01 : f32
    %6 = vector.broadcast %cst_5 : f32 to vector<128x128xf32>
    %7 = arith.mulf %6, %5 : vector<128x128xf32>
    %8 = arith.maximumf %5, %7 : vector<128x128xf32>
    %9 = arith.truncf %8 : vector<128x128xf32> to vector<128x128xbf16>
    %c0_6 = arith.constant 0 : index
    %c0_7 = arith.constant 0 : index
    %10 = vector.load %arg4[%c0_6, %c0_7] : memref<128x128xbf16, #tpu.memory_space<vmem>>, vector<128x128xbf16>
    tpu.vector_store %arg4[%c0_6, %c0_7], %9 {strides = array<i32>} : memref<128x128xbf16, #tpu.memory_space<vmem>>, vector<128x128xbf16>,
    return
  }
  func.func @transform_0(%arg0: i32) -> (i32, i32) {
    %c0_i32 = arith.constant 0 : i32
    %c0_i32_0 = arith.constant 0 : i32
    return %arg0, %c0_i32 : i32, i32
  }
  func.func @transform_1(%arg0: i32) -> (i32, i32) {
    %c0_i32 = arith.constant 0 : i32
    %c0_i32_0 = arith.constant 0 : i32
    %c0_i32_1 = arith.constant 0 : i32
    return %c0_i32, %c0_i32_0 : i32, i32
  }
  func.func @transform_2(%arg0: i32) -> (i32, i32) {
    %c0_i32 = arith.constant 0 : i32
    %c0_i32_0 = arith.constant 0 : i32
    %c0_i32_1 = arith.constant 0 : i32
    return %c0_i32, %c0_i32_0 : i32, i32
  }
  func.func @transform_3(%arg0: i32) -> (i32, i32) {
    %c0_i32 = arith.constant 0 : i32
    %c0_i32_0 = arith.constant 0 : i32
    return %arg0, %c0_i32 : i32, i32
  }
}

module attributes {stable_mosaic.version = 11 : i64} {
  func.func @_conv_kernel(%arg0: i32, %arg1: memref<32x512xbf16, #tpu.memory_space<vmem>>, %arg2: memref<512x128xbf16, #tpu.memory_space<vmem>>, %arg3: memref<32x128xbf16, #tpu.memory_space<vmem>>, %arg4: memref<8x128xf32, #tpu.memory_space<vmem>>) attributes {dimension_semantics = [#tpu.dimension_semantics<parallel>], iteration_bounds = array<i64: 1>, scalar_prefetch = 0 : i64, scratch_operands = 0 : i64, tpu.core_type = #tpu.core_type<tc>, window_params = [{transform_indices = @transform_0, window_bounds = array<i64: 32, 512>}, {pipeline_mode = #tpu.pipeline_mode<synchronous>, transform_indices = @transform_1, window_bounds = array<i64: 512, 128>}, {transform_indices = @transform_2, window_bounds = array<i64: 32, 128>}, {transform_indices = @transform_3, window_bounds = array<i64: 8, 128>}]} {
    %c0 = arith.constant 0 : index
    %c0_0 = arith.constant 0 : index
    %0 = vector.load %arg1[%c0, %c0_0] : memref<32x512xbf16, #tpu.memory_space<vmem>>, vector<32x512xbf16>
    %c0_1 = arith.constant 0 : index
    %c0_2 = arith.constant 0 : index
    %1 = vector.load %arg2[%c0_1, %c0_2] : memref<512x128xbf16, #tpu.memory_space<vmem>>, vector<512x128xbf16>
    %cst = arith.constant dense<0.000000e+00> : vector<32x128xf32>
    %2 = tpu.matmul %0, %1, %cst {dimension_numbers = #tpu.dot_dimension_numbers<[1], [0], [0], [1], [0, 0, 1, 1], [], []>} : vector<32x512xbf16>, vector<512x128xbf16>, vector<32x128xf32> -> vector<32x128xf32>
    %3 = arith.truncf %2 : vector<32x128xf32> to vector<32x128xbf16>
    %c0_3 = arith.constant 0 : index
    %c0_4 = arith.constant 0 : index
    %4 = vector.load %arg3[%c0_3, %c0_4] : memref<32x128xbf16, #tpu.memory_space<vmem>>, vector<32x128xbf16>
    tpu.vector_store %arg3[%c0_3, %c0_4], %3 {strides = array<i32>} : memref<32x128xbf16, #tpu.memory_space<vmem>>, vector<32x128xbf16>,
    %c32_i32 = arith.constant 32 : i32
    %5 = arith.muli %arg0, %c32_i32 : i32
    %6 = tpu.iota {dimensions = array<i32: 0>} : vector<32x1xi32>
    %7 = vector.broadcast %5 : i32 to vector<32x1xi32>
    %8 = arith.addi %6, %7 : vector<32x1xi32>
    %c32_i32_5 = arith.constant 32 : i32
    %9 = vector.broadcast %c32_i32_5 : i32 to vector<32x1xi32>
    %10 = arith.cmpi slt, %8, %9 : vector<32x1xi32>
    %c32_i32_6 = arith.constant 32 : i32
    %11 = arith.subi %c32_i32_6, %5 : i32
    %c32_i32_7 = arith.constant 32 : i32
    %12 = arith.minsi %11, %c32_i32_7 : i32
    %13 = arith.sitofp %12 : i32 to f32
    %cst_8 = arith.constant 0.000000e+00 : f32
    %14 = vector.shape_cast %10 : vector<32x1xi1> to vector<32x1xi1>
    %15 = vector.broadcast %14 : vector<32x1xi1> to vector<32x128xi1>
    %16 = vector.broadcast %cst_8 : f32 to vector<32x128xf32>
    %17 = arith.select %15, %2, %16 : vector<32x128xi1>, vector<32x128xf32>
    %cst_9 = arith.constant dense<0.000000e+00> : vector<128xf32>
    %18 = vector.multi_reduction <add>, %17, %cst_9 [0] : vector<32x128xf32> to vector<128xf32>
    %19 = vector.shape_cast %18 : vector<128xf32> to vector<1x128xf32>
    %20 = vector.broadcast %13 : f32 to vector<1x128xf32>
    %21 = arith.divf %19, %20 : vector<1x128xf32>
    %22 = vector.broadcast %21 : vector<1x128xf32> to vector<32x128xf32>
    %23 = arith.subf %2, %22 : vector<32x128xf32>
    %cst_10 = arith.constant 0.000000e+00 : f32
    %24 = vector.shape_cast %10 : vector<32x1xi1> to vector<32x1xi1>
    %25 = vector.broadcast %24 : vector<32x1xi1> to vector<32x128xi1>
    %26 = vector.broadcast %cst_10 : f32 to vector<32x128xf32>
    %27 = arith.select %25, %23, %26 : vector<32x128xi1>, vector<32x128xf32>
    %28 = arith.mulf %27, %27 : vector<32x128xf32>
    %cst_11 = arith.constant dense<0.000000e+00> : vector<128xf32>
    %29 = vector.multi_reduction <add>, %28, %cst_11 [0] : vector<32x128xf32> to vector<128xf32>
    %30 = vector.shape_cast %29 : vector<128xf32> to vector<1x128xf32>
    %c0_12 = arith.constant 0 : index
    %c0_13 = arith.constant 0 : index
    %31 = vector.load %arg4[%c0_12, %c0_13] : memref<8x128xf32, #tpu.memory_space<vmem>>, vector<1x128xf32>
    tpu.vector_store %arg4[%c0_12, %c0_13], %19 {strides = array<i32>} : memref<8x128xf32, #tpu.memory_space<vmem>>, vector<1x128xf32>,
    %c1 = arith.constant 1 : index
    %c0_14 = arith.constant 0 : index
    %32 = vector.load %arg4[%c1, %c0_14] : memref<8x128xf32, #tpu.memory_space<vmem>>, vector<1x128xf32>
    tpu.vector_store %arg4[%c1, %c0_14], %30 {strides = array<i32>} : memref<8x128xf32, #tpu.memory_space<vmem>>, vector<1x128xf32>,
    return
  }
  func.func @transform_0(%arg0: i32) -> (i32, i32) {
    %c0_i32 = arith.constant 0 : i32
    %c0_i32_0 = arith.constant 0 : i32
    return %arg0, %c0_i32 : i32, i32
  }
  func.func @transform_1(%arg0: i32) -> (i32, i32) {
    %c0_i32 = arith.constant 0 : i32
    %c0_i32_0 = arith.constant 0 : i32
    %c0_i32_1 = arith.constant 0 : i32
    return %c0_i32, %c0_i32_0 : i32, i32
  }
  func.func @transform_2(%arg0: i32) -> (i32, i32) {
    %c0_i32 = arith.constant 0 : i32
    %c0_i32_0 = arith.constant 0 : i32
    return %arg0, %c0_i32 : i32, i32
  }
  func.func @transform_3(%arg0: i32) -> (i32, i32) {
    %c0_i32 = arith.constant 0 : i32
    %c0_i32_0 = arith.constant 0 : i32
    return %arg0, %c0_i32 : i32, i32
  }
}

module attributes {stable_mosaic.version = 11 : i64} {
  func.func @_conv_kernel(%arg0: i32, %arg1: memref<8x1024xbf16, #tpu.memory_space<vmem>>, %arg2: memref<1024x128xbf16, #tpu.memory_space<vmem>>, %arg3: memref<8x128xbf16, #tpu.memory_space<vmem>>, %arg4: memref<8x128xf32, #tpu.memory_space<vmem>>) attributes {dimension_semantics = [#tpu.dimension_semantics<parallel>], iteration_bounds = array<i64: 1>, scalar_prefetch = 0 : i64, scratch_operands = 0 : i64, tpu.core_type = #tpu.core_type<tc>, window_params = [{transform_indices = @transform_0, window_bounds = array<i64: 8, 1024>}, {pipeline_mode = #tpu.pipeline_mode<synchronous>, transform_indices = @transform_1, window_bounds = array<i64: 1024, 128>}, {transform_indices = @transform_2, window_bounds = array<i64: 8, 128>}, {transform_indices = @transform_3, window_bounds = array<i64: 8, 128>}]} {
    %c0 = arith.constant 0 : index
    %c0_0 = arith.constant 0 : index
    %0 = vector.load %arg1[%c0, %c0_0] : memref<8x1024xbf16, #tpu.memory_space<vmem>>, vector<8x1024xbf16>
    %c0_1 = arith.constant 0 : index
    %c0_2 = arith.constant 0 : index
    %1 = vector.load %arg2[%c0_1, %c0_2] : memref<1024x128xbf16, #tpu.memory_space<vmem>>, vector<1024x128xbf16>
    %cst = arith.constant dense<0.000000e+00> : vector<8x128xf32>
    %2 = tpu.matmul %0, %1, %cst {dimension_numbers = #tpu.dot_dimension_numbers<[1], [0], [0], [1], [0, 0, 1, 1], [], []>} : vector<8x1024xbf16>, vector<1024x128xbf16>, vector<8x128xf32> -> vector<8x128xf32>
    %3 = arith.truncf %2 : vector<8x128xf32> to vector<8x128xbf16>
    %c0_3 = arith.constant 0 : index
    %c0_4 = arith.constant 0 : index
    %4 = vector.load %arg3[%c0_3, %c0_4] : memref<8x128xbf16, #tpu.memory_space<vmem>>, vector<8x128xbf16>
    tpu.vector_store %arg3[%c0_3, %c0_4], %3 {strides = array<i32>} : memref<8x128xbf16, #tpu.memory_space<vmem>>, vector<8x128xbf16>,
    %c8_i32 = arith.constant 8 : i32
    %5 = arith.muli %arg0, %c8_i32 : i32
    %6 = tpu.iota {dimensions = array<i32: 0>} : vector<8x1xi32>
    %7 = vector.broadcast %5 : i32 to vector<8x1xi32>
    %8 = arith.addi %6, %7 : vector<8x1xi32>
    %c8_i32_5 = arith.constant 8 : i32
    %9 = vector.broadcast %c8_i32_5 : i32 to vector<8x1xi32>
    %10 = arith.cmpi slt, %8, %9 : vector<8x1xi32>
    %c8_i32_6 = arith.constant 8 : i32
    %11 = arith.subi %c8_i32_6, %5 : i32
    %c8_i32_7 = arith.constant 8 : i32
    %12 = arith.minsi %11, %c8_i32_7 : i32
    %13 = arith.sitofp %12 : i32 to f32
    %cst_8 = arith.constant 0.000000e+00 : f32
    %14 = vector.shape_cast %10 : vector<8x1xi1> to vector<8x1xi1>
    %15 = vector.broadcast %14 : vector<8x1xi1> to vector<8x128xi1>
    %16 = vector.broadcast %cst_8 : f32 to vector<8x128xf32>
    %17 = arith.select %15, %2, %16 : vector<8x128xi1>, vector<8x128xf32>
    %cst_9 = arith.constant dense<0.000000e+00> : vector<128xf32>
    %18 = vector.multi_reduction <add>, %17, %cst_9 [0] : vector<8x128xf32> to vector<128xf32>
    %19 = vector.shape_cast %18 : vector<128xf32> to vector<1x128xf32>
    %20 = vector.broadcast %13 : f32 to vector<1x128xf32>
    %21 = arith.divf %19, %20 : vector<1x128xf32>
    %22 = vector.broadcast %21 : vector<1x128xf32> to vector<8x128xf32>
    %23 = arith.subf %2, %22 : vector<8x128xf32>
    %cst_10 = arith.constant 0.000000e+00 : f32
    %24 = vector.shape_cast %10 : vector<8x1xi1> to vector<8x1xi1>
    %25 = vector.broadcast %24 : vector<8x1xi1> to vector<8x128xi1>
    %26 = vector.broadcast %cst_10 : f32 to vector<8x128xf32>
    %27 = arith.select %25, %23, %26 : vector<8x128xi1>, vector<8x128xf32>
    %28 = arith.mulf %27, %27 : vector<8x128xf32>
    %cst_11 = arith.constant dense<0.000000e+00> : vector<128xf32>
    %29 = vector.multi_reduction <add>, %28, %cst_11 [0] : vector<8x128xf32> to vector<128xf32>
    %30 = vector.shape_cast %29 : vector<128xf32> to vector<1x128xf32>
    %c0_12 = arith.constant 0 : index
    %c0_13 = arith.constant 0 : index
    %31 = vector.load %arg4[%c0_12, %c0_13] : memref<8x128xf32, #tpu.memory_space<vmem>>, vector<1x128xf32>
    tpu.vector_store %arg4[%c0_12, %c0_13], %19 {strides = array<i32>} : memref<8x128xf32, #tpu.memory_space<vmem>>, vector<1x128xf32>,
    %c1 = arith.constant 1 : index
    %c0_14 = arith.constant 0 : index
    %32 = vector.load %arg4[%c1, %c0_14] : memref<8x128xf32, #tpu.memory_space<vmem>>, vector<1x128xf32>
    tpu.vector_store %arg4[%c1, %c0_14], %30 {strides = array<i32>} : memref<8x128xf32, #tpu.memory_space<vmem>>, vector<1x128xf32>,
    return
  }
  func.func @transform_0(%arg0: i32) -> (i32, i32) {
    %c0_i32 = arith.constant 0 : i32
    %c0_i32_0 = arith.constant 0 : i32
    return %arg0, %c0_i32 : i32, i32
  }
  func.func @transform_1(%arg0: i32) -> (i32, i32) {
    %c0_i32 = arith.constant 0 : i32
    %c0_i32_0 = arith.constant 0 : i32
    %c0_i32_1 = arith.constant 0 : i32
    return %c0_i32, %c0_i32_0 : i32, i32
  }
  func.func @transform_2(%arg0: i32) -> (i32, i32) {
    %c0_i32 = arith.constant 0 : i32
    %c0_i32_0 = arith.constant 0 : i32
    return %arg0, %c0_i32 : i32, i32
  }
  func.func @transform_3(%arg0: i32) -> (i32, i32) {
    %c0_i32 = arith.constant 0 : i32
    %c0_i32_0 = arith.constant 0 : i32
    return %arg0, %c0_i32 : i32, i32
  }
}

module attributes {stable_mosaic.version = 11 : i64} {
  func.func @_conv_kernel(%arg0: i32, %arg1: memref<8x2048xbf16, #tpu.memory_space<vmem>>, %arg2: memref<2048x256xbf16, #tpu.memory_space<vmem>>, %arg3: memref<8x256xbf16, #tpu.memory_space<vmem>>, %arg4: memref<8x256xf32, #tpu.memory_space<vmem>>) attributes {dimension_semantics = [#tpu.dimension_semantics<parallel>], iteration_bounds = array<i64: 1>, scalar_prefetch = 0 : i64, scratch_operands = 0 : i64, tpu.core_type = #tpu.core_type<tc>, window_params = [{transform_indices = @transform_0, window_bounds = array<i64: 8, 2048>}, {pipeline_mode = #tpu.pipeline_mode<synchronous>, transform_indices = @transform_1, window_bounds = array<i64: 2048, 256>}, {transform_indices = @transform_2, window_bounds = array<i64: 8, 256>}, {transform_indices = @transform_3, window_bounds = array<i64: 8, 256>}]} {
    %c0 = arith.constant 0 : index
    %c0_0 = arith.constant 0 : index
    %0 = vector.load %arg1[%c0, %c0_0] : memref<8x2048xbf16, #tpu.memory_space<vmem>>, vector<8x2048xbf16>
    %c0_1 = arith.constant 0 : index
    %c0_2 = arith.constant 0 : index
    %1 = vector.load %arg2[%c0_1, %c0_2] : memref<2048x256xbf16, #tpu.memory_space<vmem>>, vector<2048x256xbf16>
    %cst = arith.constant dense<0.000000e+00> : vector<8x256xf32>
    %2 = tpu.matmul %0, %1, %cst {dimension_numbers = #tpu.dot_dimension_numbers<[1], [0], [0], [1], [0, 0, 1, 1], [], []>} : vector<8x2048xbf16>, vector<2048x256xbf16>, vector<8x256xf32> -> vector<8x256xf32>
    %3 = arith.truncf %2 : vector<8x256xf32> to vector<8x256xbf16>
    %c0_3 = arith.constant 0 : index
    %c0_4 = arith.constant 0 : index
    %4 = vector.load %arg3[%c0_3, %c0_4] : memref<8x256xbf16, #tpu.memory_space<vmem>>, vector<8x256xbf16>
    tpu.vector_store %arg3[%c0_3, %c0_4], %3 {strides = array<i32>} : memref<8x256xbf16, #tpu.memory_space<vmem>>, vector<8x256xbf16>,
    %c8_i32 = arith.constant 8 : i32
    %5 = arith.muli %arg0, %c8_i32 : i32
    %6 = tpu.iota {dimensions = array<i32: 0>} : vector<8x1xi32>
    %7 = vector.broadcast %5 : i32 to vector<8x1xi32>
    %8 = arith.addi %6, %7 : vector<8x1xi32>
    %c2_i32 = arith.constant 2 : i32
    %9 = vector.broadcast %c2_i32 : i32 to vector<8x1xi32>
    %10 = arith.cmpi slt, %8, %9 : vector<8x1xi32>
    %c2_i32_5 = arith.constant 2 : i32
    %11 = arith.subi %c2_i32_5, %5 : i32
    %c8_i32_6 = arith.constant 8 : i32
    %12 = arith.minsi %11, %c8_i32_6 : i32
    %13 = arith.sitofp %12 : i32 to f32
    %cst_7 = arith.constant 0.000000e+00 : f32
    %14 = vector.shape_cast %10 : vector<8x1xi1> to vector<8x1xi1>
    %15 = vector.broadcast %14 : vector<8x1xi1> to vector<8x256xi1>
    %16 = vector.broadcast %cst_7 : f32 to vector<8x256xf32>
    %17 = arith.select %15, %2, %16 : vector<8x256xi1>, vector<8x256xf32>
    %cst_8 = arith.constant dense<0.000000e+00> : vector<256xf32>
    %18 = vector.multi_reduction <add>, %17, %cst_8 [0] : vector<8x256xf32> to vector<256xf32>
    %19 = vector.shape_cast %18 : vector<256xf32> to vector<1x256xf32>
    %20 = vector.broadcast %13 : f32 to vector<1x256xf32>
    %21 = arith.divf %19, %20 : vector<1x256xf32>
    %22 = vector.broadcast %21 : vector<1x256xf32> to vector<8x256xf32>
    %23 = arith.subf %2, %22 : vector<8x256xf32>
    %cst_9 = arith.constant 0.000000e+00 : f32
    %24 = vector.shape_cast %10 : vector<8x1xi1> to vector<8x1xi1>
    %25 = vector.broadcast %24 : vector<8x1xi1> to vector<8x256xi1>
    %26 = vector.broadcast %cst_9 : f32 to vector<8x256xf32>
    %27 = arith.select %25, %23, %26 : vector<8x256xi1>, vector<8x256xf32>
    %28 = arith.mulf %27, %27 : vector<8x256xf32>
    %cst_10 = arith.constant dense<0.000000e+00> : vector<256xf32>
    %29 = vector.multi_reduction <add>, %28, %cst_10 [0] : vector<8x256xf32> to vector<256xf32>
    %30 = vector.shape_cast %29 : vector<256xf32> to vector<1x256xf32>
    %c0_11 = arith.constant 0 : index
    %c0_12 = arith.constant 0 : index
    %31 = vector.load %arg4[%c0_11, %c0_12] : memref<8x256xf32, #tpu.memory_space<vmem>>, vector<1x256xf32>
    tpu.vector_store %arg4[%c0_11, %c0_12], %19 {strides = array<i32>} : memref<8x256xf32, #tpu.memory_space<vmem>>, vector<1x256xf32>,
    %c1 = arith.constant 1 : index
    %c0_13 = arith.constant 0 : index
    %32 = vector.load %arg4[%c1, %c0_13] : memref<8x256xf32, #tpu.memory_space<vmem>>, vector<1x256xf32>
    tpu.vector_store %arg4[%c1, %c0_13], %30 {strides = array<i32>} : memref<8x256xf32, #tpu.memory_space<vmem>>, vector<1x256xf32>,
    return
  }
  func.func @transform_0(%arg0: i32) -> (i32, i32) {
    %c0_i32 = arith.constant 0 : i32
    %c0_i32_0 = arith.constant 0 : i32
    return %arg0, %c0_i32 : i32, i32
  }
  func.func @transform_1(%arg0: i32) -> (i32, i32) {
    %c0_i32 = arith.constant 0 : i32
    %c0_i32_0 = arith.constant 0 : i32
    %c0_i32_1 = arith.constant 0 : i32
    return %c0_i32, %c0_i32_0 : i32, i32
  }
  func.func @transform_2(%arg0: i32) -> (i32, i32) {
    %c0_i32 = arith.constant 0 : i32
    %c0_i32_0 = arith.constant 0 : i32
    return %arg0, %c0_i32 : i32, i32
  }
  func.func @transform_3(%arg0: i32) -> (i32, i32) {
    %c0_i32 = arith.constant 0 : i32
    %c0_i32_0 = arith.constant 0 : i32
    return %arg0, %c0_i32 : i32, i32
  }
}

module attributes {stable_mosaic.version = 11 : i64} {
  func.func @_conv_kernel(%arg0: i32, %arg1: memref<8x4096xbf16, #tpu.memory_space<vmem>>, %arg2: memref<4096x128xbf16, #tpu.memory_space<vmem>>, %arg3: memref<8x128xf32, #tpu.memory_space<vmem>>) attributes {dimension_semantics = [#tpu.dimension_semantics<parallel>], iteration_bounds = array<i64: 1>, scalar_prefetch = 0 : i64, scratch_operands = 0 : i64, tpu.core_type = #tpu.core_type<tc>, window_params = [{transform_indices = @transform_0, window_bounds = array<i64: 8, 4096>}, {pipeline_mode = #tpu.pipeline_mode<synchronous>, transform_indices = @transform_1, window_bounds = array<i64: 4096, 128>}, {transform_indices = @transform_2, window_bounds = array<i64: 8, 128>}]} {
    %c0 = arith.constant 0 : index
    %c0_0 = arith.constant 0 : index
    %0 = vector.load %arg1[%c0, %c0_0] : memref<8x4096xbf16, #tpu.memory_space<vmem>>, vector<8x4096xbf16>
    %c0_1 = arith.constant 0 : index
    %c0_2 = arith.constant 0 : index
    %1 = vector.load %arg2[%c0_1, %c0_2] : memref<4096x128xbf16, #tpu.memory_space<vmem>>, vector<4096x128xbf16>
    %cst = arith.constant dense<0.000000e+00> : vector<8x128xf32>
    %2 = tpu.matmul %0, %1, %cst {dimension_numbers = #tpu.dot_dimension_numbers<[1], [0], [0], [1], [0, 0, 1, 1], [], []>} : vector<8x4096xbf16>, vector<4096x128xbf16>, vector<8x128xf32> -> vector<8x128xf32>
    %c0_3 = arith.constant 0 : index
    %c0_4 = arith.constant 0 : index
    %3 = vector.load %arg3[%c0_3, %c0_4] : memref<8x128xf32, #tpu.memory_space<vmem>>, vector<8x128xf32>
    tpu.vector_store %arg3[%c0_3, %c0_4], %2 {strides = array<i32>} : memref<8x128xf32, #tpu.memory_space<vmem>>, vector<8x128xf32>,
    return
  }
  func.func @transform_0(%arg0: i32) -> (i32, i32) {
    %c0_i32 = arith.constant 0 : i32
    %c0_i32_0 = arith.constant 0 : i32
    return %arg0, %c0_i32 : i32, i32
  }
  func.func @transform_1(%arg0: i32) -> (i32, i32) {
    %c0_i32 = arith.constant 0 : i32
    %c0_i32_0 = arith.constant 0 : i32
    %c0_i32_1 = arith.constant 0 : i32
    return %c0_i32, %c0_i32_0 : i32, i32
  }
  func.func @transform_2(%arg0: i32) -> (i32, i32) {
    %c0_i32 = arith.constant 0 : i32
    %c0_i32_0 = arith.constant 0 : i32
    return %arg0, %c0_i32 : i32, i32
  }
}

</mosaic_0001>

<bundles_post_ra>
// kernel: discriminator_forward.5
= control target key start
LH: loop header
LB: loop body
LE: loop exit
PB: predicated region body
PF: predicated region fallthrough
CT: control target
= control target key end

     0   :  { %s528_s1 = inlined_call_operand.vmem [shape: bf16[128,128], index: 1, kind: input, shape index: {}]   ;;  %s529_s2 = inlined_call_operand.vmem [shape: f32[1,128], index: 2, kind: input, shape index: {}]   ;;  %s530_s0 = inlined_call_operand.vmem [shape: bf16[128,128], index: 0, kind: input, shape index: {}]   ;;  %s531_s3 = inlined_call_operand.vmem [shape: bf16[128,128], index: 3, kind: output, shape index: {}]  }
   0x1   :  { %v342_v0 = vld [vmem:[%s528_s1 + $0x38] sm:$0xff]  ;;  %v341_v1 = vld [vmem:[%s528_s1 + $0x30] sm:$0xff]  ;;  %v340_v2 = vld [vmem:[%s528_s1 + $0x28] sm:$0xff] }
   0x2   :  { %146 = vmatpush.bf16.msra.mxu0 %v342_v0  ;;  %390 = vmatpush.bf16.msra.mxu1 %v342_v0  ;;  %v339_v3 = vld [vmem:[%s528_s1 + $0x20] sm:$0xff]  ;;  %v338_v4 = vld [vmem:[%s528_s1 + $0x18] sm:$0xff]  ;;  %v337_v5 = vld [vmem:[%s528_s1 + $0x10] sm:$0xff] }
   0x3   :  { %391 = vmatpush.bf16.msra.mxu2 %v342_v0  ;;  %392 = vmatpush.bf16.msra.mxu3 %v342_v0  ;;  %v336_v6 = vld [vmem:[%s528_s1 + $0x8] sm:$0xff]  ;;  %v335_v7 = vld [vmem:[%s528_s1] sm:$0xff]  ;;  %v329_v9 = vld [vmem:[%s530_s0 + $0x10] sm:$0xff] }
   0x4   :  { %v327_v8 = vld [vmem:[%s530_s0] sm:$0xff]  ;;  %v333_v11 = vld [vmem:[%s530_s0 + $0x30] sm:$0xff]  ;;  %v328_v12 = vld [vmem:[%s530_s0 + $0x8] sm:$0xff] }
   0x5   :  { %v331_v10 = vld [vmem:[%s530_s0 + $0x20] sm:$0xff]  ;;  %v330_v13 = vld [vmem:[%s530_s0 + $0x18] sm:$0xff]  ;;  %v332_v14 = vld [vmem:[%s530_s0 + $0x28] sm:$0xff] }
   0x6   :  { %147 = vmatpush.bf16.msra.mxu0 %v341_v1  ;;  %393 = vmatpush.bf16.msra.mxu1 %v341_v1  ;;  %v334_v15 = vld [vmem:[%s530_s0 + $0x38] sm:$0xff]  ;;  %v486_v18 = vld [vmem:[%s529_s2] ss:$0 sm:$0xff] }
   0x7   :  { %394 = vmatpush.bf16.msra.mxu2 %v341_v1  ;;  %395 = vmatpush.bf16.msra.mxu3 %v341_v1 }
   0xa   :  { %148 = vmatpush.bf16.msra.mxu0 %v340_v2  ;;  %396 = vmatpush.bf16.msra.mxu1 %v340_v2 }
   0xb   :  { %397 = vmatpush.bf16.msra.mxu2 %v340_v2  ;;  %398 = vmatpush.bf16.msra.mxu3 %v340_v2 }
   0xe   :  { %149 = vmatpush.bf16.msra.mxu0 %v339_v3  ;;  %399 = vmatpush.bf16.msra.mxu1 %v339_v3 }
   0xf   :  { %400 = vmatpush.bf16.msra.mxu2 %v339_v3  ;;  %401 = vmatpush.bf16.msra.mxu3 %v339_v3 }
  0x12   :  { %150 = vmatpush.bf16.msra.mxu0 %v338_v4  ;;  %402 = vmatpush.bf16.msra.mxu1 %v338_v4 }
  0x13   :  { %403 = vmatpush.bf16.msra.mxu2 %v338_v4  ;;  %404 = vmatpush.bf16.msra.mxu3 %v338_v4 }
  0x16   :  { %151 = vmatpush.bf16.msra.mxu0 %v337_v5  ;;  %405 = vmatpush.bf16.msra.mxu1 %v337_v5 }
  0x17   :  { %406 = vmatpush.bf16.msra.mxu2 %v337_v5  ;;  %407 = vmatpush.bf16.msra.mxu3 %v337_v5 }
  0x1a   :  { %152 = vmatpush.bf16.msra.mxu0 %v336_v6  ;;  %408 = vmatpush.bf16.msra.mxu1 %v336_v6 }
  0x1b   :  { %409 = vmatpush.bf16.msra.mxu2 %v336_v6  ;;  %410 = vmatpush.bf16.msra.mxu3 %v336_v6 }
  0x1e   :  { %153 = vmatpush.bf16.msra.mxu0 %v335_v7  ;;  %411 = vmatpush.bf16.msra.mxu1 %v335_v7 }
  0x1f   :  { %412 = vmatpush.bf16.msra.mxu2 %v335_v7  ;;  %413 = vmatpush.bf16.msra.mxu3 %v335_v7 }
  0x21   :  { %154 = vmatmul.bf16.vlgmr.msra.gmra.mxu0 %v327_v8  ;;  %164 = vmatmul.bf16.vlgmr.msra.gmra.mxu1 %v329_v9 }
  0x22   :  { %174 = vmatmul.bf16.vlgmr.msra.gmra.mxu2 %v331_v10  ;;  %184 = vmatmul.bf16.vlgmr.msra.gmra.mxu3 %v333_v11 }
  0x31   :  { %159 = vmatmul.bf16.gmra.mxu0 %v328_v12  ;;  %169 = vmatmul.bf16.gmra.mxu1 %v330_v13 }
  0x32   :  { %179 = vmatmul.bf16.gmra.mxu2 %v332_v14  ;;  %189 = vmatmul.bf16.gmra.mxu3 %v334_v15 }
  0x9e   :  { %v155_v16 = vpop.f32.mrf.mxu0  ;;  %v165_v17 = vpop.f32.mrf.mxu1 }
  0x9f   :  { %v156_v19 = vadd.f32 %v486_v18, %v155_v16  ;;  %v166_v20 = vadd.f32 %v486_v18, %v165_v17 }
  0xa1   :  { %v195_v25 = vmul.f32 0.2, %v156_v19  ;;  %v199_v26 = vmul.f32 0.2, %v166_v20 }
  0xa3   :  { %v211_v33 = vmax.f32 %v156_v19, %v195_v25  ;;  %v215_v34 = vmax.f32 %v166_v20, %v199_v26 }
  0xa5   :  { %v175_v21 = vpop.f32.mrf.mxu2  ;;  %v185_v22 = vpop.f32.mrf.mxu3 }
  0xa6   :  { %v157_v23 = vpop.f32.mrf.mxu0  ;;  %v167_v24 = vpop.f32.mrf.mxu1  ;;  %v176_v31 = vadd.f32 %v486_v18, %v175_v21  ;;  %v186_v32 = vadd.f32 %v486_v18, %v185_v22 }
  0xa7   :  { %v158_v27 = vadd.f32 %v486_v18, %v157_v23  ;;  %v168_v28 = vadd.f32 %v486_v18, %v167_v24 }
  0xa8   :  { %v203_v41 = vmul.f32 0.2, %v176_v31  ;;  %v207_v42 = vmul.f32 0.2, %v186_v32 }
  0xa9   :  { %v196_v29 = vmul.f32 0.2, %v158_v27  ;;  %v200_v30 = vmul.f32 0.2, %v168_v28 }
  0xaa   :  { %v219_v49 = vmax.f32 %v176_v31, %v203_v41  ;;  %v223_v50 = vmax.f32 %v186_v32, %v207_v42 }
  0xab   :  { %v212_v35 = vmax.f32 %v158_v27, %v196_v29  ;;  %v216_v36 = vmax.f32 %v168_v28, %v200_v30 }
  0xad   :  { %v346_v37 = vpack.c.bf16 %v212_v35, %v211_v33  ;;  %v356_v38 = vpack.c.bf16 %v216_v36, %v215_v34  ;;  %v177_v39 = vpop.f32.mrf.mxu2  ;;  %v187_v40 = vpop.f32.mrf.mxu3 }
  0xae   :  { %v178_v43 = vadd.f32 %v486_v18, %v177_v39  ;;  %v188_v44 = vadd.f32 %v486_v18, %v187_v40  ;;  %v160_v45 = vpop.f32.mrf.mxu0  ;;  %v170_v46 = vpop.f32.mrf.mxu1 }
  0xaf   :  { %347 = vst [vmem:[%s531_s3] sm:$0xff] %v346_v37   ;;  %v161_v53 = vadd.f32 %v486_v18, %v160_v45  ;;  %v171_v54 = vadd.f32 %v486_v18, %v170_v46 }
  0xb0   :  { %384 = vst [vmem:[%s531_s3 + $0x10] sm:$0xff] %v356_v38   ;;  %v204_v47 = vmul.f32 0.2, %v178_v43  ;;  %v208_v48 = vmul.f32 0.2, %v188_v44 }
  0xb1   :  { %v197_v61 = vmul.f32 0.2, %v161_v53  ;;  %v201_v62 = vmul.f32 0.2, %v171_v54 }
  0xb2   :  { %v220_v51 = vmax.f32 %v178_v43, %v204_v47  ;;  %v224_v52 = vmax.f32 %v188_v44, %v208_v48 }
  0xb3   :  { %v213_v5 = vmax.f32 %v161_v53, %v197_v61  ;;  %v217_v6 = vmax.f32 %v171_v54, %v201_v62 }
  0xb4   :  { %v366_v55 = vpack.c.bf16 %v220_v51, %v219_v49  ;;  %v376_v56 = vpack.c.bf16 %v224_v52, %v223_v50 }
  0xb5   :  { %v180_v57 = vpop.f32.mrf.mxu2  ;;  %v190_v58 = vpop.f32.mrf.mxu3 }
  0xb6   :  { %386 = vst [vmem:[%s531_s3 + $0x20] sm:$0xff] %v366_v55   ;;  %v162_v59 = vpop.f32.mrf.mxu0  ;;  %v172_v60 = vpop.f32.mrf.mxu1  ;;  %v181_v3 = vadd.f32 %v486_v18, %v180_v57  ;;  %v191_v4 = vadd.f32 %v486_v18, %v190_v58 }
  0xb7   :  { %388 = vst [vmem:[%s531_s3 + $0x30] sm:$0xff] %v376_v56   ;;  %v163_v63 = vadd.f32 %v486_v18, %v162_v59  ;;  %v173_v0 = vadd.f32 %v486_v18, %v172_v60 }
  0xb8   :  { %v205_v13 = vmul.f32 0.2, %v181_v3  ;;  %v209_v14 = vmul.f32 0.2, %v191_v4 }
  0xb9   :  { %v198_v1 = vmul.f32 0.2, %v163_v63  ;;  %v202_v2 = vmul.f32 0.2, %v173_v0 }
  0xba   :  { %v221_v20 = vmax.f32 %v181_v3, %v205_v13  ;;  %v225_v21 = vmax.f32 %v191_v4, %v209_v14 }
  0xbb   :  { %v214_v7 = vmax.f32 %v163_v63, %v198_v1  ;;  %v218_v8 = vmax.f32 %v173_v0, %v202_v2 }
  0xbd   :  { %v351_v9 = vpack.c.bf16 %v214_v7, %v213_v5  ;;  %v361_v10 = vpack.c.bf16 %v218_v8, %v217_v6  ;;  %v182_v11 = vpop.f32.mrf.mxu2  ;;  %v192_v12 = vpop.f32.mrf.mxu3 }
  0xbe   :  { %v183_v15 = vadd.f32 %v486_v18, %v182_v11  ;;  %v193_v16 = vadd.f32 %v486_v18, %v192_v12 }
  0xbf   :  { %383 = vst [vmem:[%s531_s3 + $0x8] sm:$0xff] %v351_v9  }
  0xc0   :  { %385 = vst [vmem:[%s531_s3 + $0x18] sm:$0xff] %v361_v10   ;;  %v206_v17 = vmul.f32 0.2, %v183_v15  ;;  %v210_v19 = vmul.f32 0.2, %v193_v16 }
  0xc2   :  { %v222_v22 = vmax.f32 %v183_v15, %v206_v17  ;;  %v226_v23 = vmax.f32 %v193_v16, %v210_v19 }
  0xc4   :  { %v371_v24 = vpack.c.bf16 %v222_v22, %v221_v20  ;;  %v381_v25 = vpack.c.bf16 %v226_v23, %v225_v21 }
  0xc6   :  { %387 = vst [vmem:[%s531_s3 + $0x28] sm:$0xff] %v371_v24  }
  0xc7   :  { %389 = vst [vmem:[%s531_s3 + $0x38] sm:$0xff] %v381_v25  }

// kernel: discriminator_forward.6
= control target key start
LH: loop header
LB: loop body
LE: loop exit
PB: predicated region body
PF: predicated region fallthrough
CT: control target
= control target key end

     0   :  { %s879_s1 = inlined_call_operand.vmem [shape: bf16[512,128], index: 1, kind: input, shape index: {}]   ;;  %s880_s0 = inlined_call_operand.vmem [shape: bf16[32,512], index: 0, kind: input, shape index: {}]   ;;  %s881_s2 = inlined_call_operand.vmem [shape: bf16[32,128], index: 2, kind: output, shape index: {0}]   ;;  %s882_s3 = inlined_call_operand.vmem [shape: f32[8,128], index: 3, kind: output, shape index: {1}]  }
   0x1   :  { %v663_v0 = vld [vmem:[%s879_s1 + $0x38] sm:$0xff]  ;;  %v662_v4 = vld [vmem:[%s879_s1 + $0x30] sm:$0xff]  ;;  %v661_v8 = vld [vmem:[%s879_s1 + $0x28] sm:$0xff] }
   0x2   :  { %v671_v1 = vld [vmem:[%s879_s1 + $0x78] sm:$0xff]  ;;  %317 = vmatpush.bf16.msra.mxu0 %v663_v0  ;;  %v670_v5 = vld [vmem:[%s879_s1 + $0x70] sm:$0xff]  ;;  %v669_v9 = vld [vmem:[%s879_s1 + $0x68] sm:$0xff] }
   0x3   :  { %v679_v2 = vld [vmem:[%s879_s1 + $0xb8] sm:$0xff]  ;;  %336 = vmatpush.bf16.msra.mxu1 %v671_v1  ;;  %v678_v6 = vld [vmem:[%s879_s1 + $0xb0] sm:$0xff]  ;;  %v677_v10 = vld [vmem:[%s879_s1 + $0xa8] sm:$0xff] }
   0x4   :  { %v687_v3 = vld [vmem:[%s879_s1 + $0xf8] sm:$0xff]  ;;  %355 = vmatpush.bf16.msra.mxu2 %v679_v2  ;;  %v686_v7 = vld [vmem:[%s879_s1 + $0xf0] sm:$0xff]  ;;  %v685_v11 = vld [vmem:[%s879_s1 + $0xe8] sm:$0xff] }
   0x5   :  { %374 = vmatpush.bf16.msra.mxu3 %v687_v3  ;;  %v660_v12 = vld [vmem:[%s879_s1 + $0x20] sm:$0xff]  ;;  %v659_v16 = vld [vmem:[%s879_s1 + $0x18] sm:$0xff]  ;;  %v658_v20 = vld [vmem:[%s879_s1 + $0x10] sm:$0xff] }
   0x6   :  { %318 = vmatpush.bf16.msra.mxu0 %v662_v4  ;;  %v668_v13 = vld [vmem:[%s879_s1 + $0x60] sm:$0xff]  ;;  %v667_v17 = vld [vmem:[%s879_s1 + $0x58] sm:$0xff]  ;;  %v666_v21 = vld [vmem:[%s879_s1 + $0x50] sm:$0xff] }
   0x7   :  { %337 = vmatpush.bf16.msra.mxu1 %v670_v5  ;;  %v676_v14 = vld [vmem:[%s879_s1 + $0xa0] sm:$0xff]  ;;  %v675_v18 = vld [vmem:[%s879_s1 + $0x98] sm:$0xff]  ;;  %v674_v22 = vld [vmem:[%s879_s1 + $0x90] sm:$0xff] }
   0x8   :  { %356 = vmatpush.bf16.msra.mxu2 %v678_v6  ;;  %v684_v15 = vld [vmem:[%s879_s1 + $0xe0] sm:$0xff]  ;;  %v683_v19 = vld [vmem:[%s879_s1 + $0xd8] sm:$0xff]  ;;  %v682_v23 = vld [vmem:[%s879_s1 + $0xd0] sm:$0xff] }
   0x9   :  { %375 = vmatpush.bf16.msra.mxu3 %v686_v7  ;;  %v657_v24 = vld [vmem:[%s879_s1 + $0x8] sm:$0xff]  ;;  %v656_v28 = vld [vmem:[%s879_s1] sm:$0xff]  ;;  %v650_v33 = vld [vmem:[%s880_s0 + $0xc] sm:$0xf0] }
   0xa   :  { %319 = vmatpush.bf16.msra.mxu0 %v661_v8  ;;  %v665_v25 = vld [vmem:[%s879_s1 + $0x48] sm:$0xff]  ;;  %v664_v29 = vld [vmem:[%s879_s1 + $0x40] sm:$0xff]  ;;  %v492_v35 = vld [vmem:[%s880_s0 + $0x10] sm:$0xf0] }
   0xb   :  { %338 = vmatpush.bf16.msra.mxu1 %v669_v9  ;;  %v673_v26 = vld [vmem:[%s879_s1 + $0x88] sm:$0xff]  ;;  %v672_v30 = vld [vmem:[%s879_s1 + $0x80] sm:$0xff]  ;;  %v651_v37 = vld [vmem:[%s880_s0 + $0x14] sm:$0xf0] }
   0xc   :  { %357 = vmatpush.bf16.msra.mxu2 %v677_v10  ;;  %v681_v27 = vld [vmem:[%s879_s1 + $0xc8] sm:$0xff]  ;;  %v680_v31 = vld [vmem:[%s879_s1 + $0xc0] sm:$0xff]  ;;  %v500_v39 = vld [vmem:[%s880_s0 + $0x18] sm:$0xf0]  ;;  %v702_v10 = vmov 32.0  }
   0xd   :  { %376 = vmatpush.bf16.msra.mxu3 %v685_v11  ;;  %v490_v32 = vld [vmem:[%s880_s0] sm:$0xf]  ;;  %v648_v34 = vld [vmem:[%s880_s0 + $0x4] sm:$0xf]  ;;  %v498_v36 = vld [vmem:[%s880_s0 + $0x8] sm:$0xf]  ;;  %700 = vrcp.f32 %v702_v10 }
   0xe   :  { %320 = vmatpush.bf16.msra.mxu0 %v660_v12  ;;  %v649_v38 = vld [vmem:[%s880_s0 + $0xc] sm:$0xf]  ;;  %v491_v40 = vor.u32 %v650_v33, %v490_v32  ;;  %v495_v41 = vor.u32 %v648_v34, %v492_v35  ;;  %v499_v42 = vor.u32 %v651_v37, %v498_v36  ;;  %v506_v44 = vld [vmem:[%s880_s0 + $0x20] sm:$0xf]  ;;  %v654_v45 = vld [vmem:[%s880_s0 + $0x2c] sm:$0xf0] }
   0xf   :  { %339 = vmatpush.bf16.msra.mxu1 %v668_v13  ;;  %v503_v43 = vor.u32 %v649_v38, %v500_v39  ;;  %v652_v46 = vld [vmem:[%s880_s0 + $0x24] sm:$0xf]  ;;  %v508_v47 = vld [vmem:[%s880_s0 + $0x30] sm:$0xf0]  ;;  %v514_v48 = vld [vmem:[%s880_s0 + $0x28] sm:$0xf]  ;;  %v507_v52 = vor.u32 %v654_v45, %v506_v44 }
  0x10   :  { %358 = vmatpush.bf16.msra.mxu2 %v676_v14  ;;  %v655_v49 = vld [vmem:[%s880_s0 + $0x34] sm:$0xf0]  ;;  %v653_v50 = vld [vmem:[%s880_s0 + $0x2c] sm:$0xf]  ;;  %v516_v51 = vld [vmem:[%s880_s0 + $0x38] sm:$0xf0]  ;;  %v511_v53 = vor.u32 %v652_v46, %v508_v47 }
  0x11   :  { %377 = vmatpush.bf16.msra.mxu3 %v684_v15  ;;  %v515_v54 = vor.u32 %v655_v49, %v514_v48  ;;  %v519_v55 = vor.u32 %v653_v50, %v516_v51 }
  0x12   :  { %321 = vmatpush.bf16.msra.mxu0 %v659_v16 }
  0x13   :  { %340 = vmatpush.bf16.msra.mxu1 %v667_v17  ;;  %v701_v16 = vpop.eup %700 }
  0x14   :  { %359 = vmatpush.bf16.msra.mxu2 %v675_v18  ;;  %vm448_vm0 = vweird.f32 %v701_v16 }
  0x15   :  { %378 = vmatpush.bf16.msra.mxu3 %v683_v19 }
  0x16   :  { %322 = vmatpush.bf16.msra.mxu0 %v658_v20  ;;  %v443_v20 = vmul.f32 32.0, %v701_v16 }
  0x17   :  { %341 = vmatpush.bf16.msra.mxu1 %v666_v21 }
  0x18   :  { %360 = vmatpush.bf16.msra.mxu2 %v674_v22 }
  0x19   :  { %379 = vmatpush.bf16.msra.mxu3 %v682_v23 }
  0x1a   :  { %323 = vmatpush.bf16.msra.mxu0 %v657_v24 }
  0x1b   :  { %342 = vmatpush.bf16.msra.mxu1 %v665_v25 }
  0x1c   :  { %361 = vmatpush.bf16.msra.mxu2 %v673_v26  ;;  %v444_v26 = vsub.f32 1.0, %v443_v20 }
  0x1d   :  { %380 = vmatpush.bf16.msra.mxu3 %v681_v27 }
  0x1e   :  { %324 = vmatpush.bf16.msra.mxu0 %v656_v28 }
  0x1f   :  { %343 = vmatpush.bf16.msra.mxu1 %v664_v29 }
  0x20   :  { %362 = vmatpush.bf16.msra.mxu2 %v672_v30  ;;  %v445_v30 = vmul.f32 %v701_v16, %v444_v26 }
  0x21   :  { %381 = vmatpush.bf16.msra.mxu3 %v680_v31  ;;  %325 = vmatmul.bf16.vlgmr.msra.gmra.mxu0 %v491_v40 }
  0x22   :  { %344 = vmatmul.bf16.vlgmr.msra.gmra.mxu1 %v495_v41  ;;  %v446_v33 = vadd.f32 %v701_v16, %v445_v30 }
  0x23   :  { %363 = vmatmul.bf16.vlgmr.msra.gmra.mxu2 %v499_v42 }
  0x24   :  { %382 = vmatmul.bf16.vlgmr.msra.gmra.mxu3 %v503_v43  ;;  %v450_v36 = vsel %vm448_vm0, %v701_v16, %v446_v33 }
  0x31   :  { %330 = vmatmul.bf16.gmra.mxu0 %v507_v52 }
  0x32   :  { %349 = vmatmul.bf16.gmra.mxu1 %v511_v53 }
  0x33   :  { %368 = vmatmul.bf16.gmra.mxu2 %v515_v54 }
  0x34   :  { %387 = vmatmul.bf16.gmra.mxu3 %v519_v55 }
  0x9e   :  { %v326_v56 = vpop.f32.mrf.mxu0 }
  0x9f   :  { %v345_v57 = vpop.f32.mrf.mxu1 }
  0xa0   :  { %v346_v62 = vadd.f32 %v345_v57, %v326_v56 }
  0xa6   :  { %v364_v58 = vpop.f32.mrf.mxu2  ;;  %v328_v60 = vpop.f32.mrf.mxu0 }
  0xa7   :  { %v383_v59 = vpop.f32.mrf.mxu3  ;;  %v347_v61 = vpop.f32.mrf.mxu1  ;;  %v365_v63 = vadd.f32 %v364_v58, %v346_v62 }
  0xa8   :  { %v348_v0 = vadd.f32 %v347_v61, %v328_v60 }
  0xa9   :  { %v384_v6 = vadd.f32 %v383_v59, %v365_v63 }
  0xae   :  { %v366_v1 = vpop.f32.mrf.mxu2  ;;  %v331_v4 = vpop.f32.mrf.mxu0 }
  0xaf   :  { %v385_v2 = vpop.f32.mrf.mxu3  ;;  %v367_v3 = vadd.f32 %v366_v1, %v348_v0  ;;  %v350_v5 = vpop.f32.mrf.mxu1 }
  0xb0   :  { %v351_v9 = vadd.f32 %v350_v5, %v331_v4 }
  0xb1   :  { %v386_v7 = vadd.f32 %v385_v2, %v367_v3 }
  0xb3   :  { %v691_v8 = vpack.c.bf16 %v386_v7, %v384_v6  ;;  %v432_v21 = vadd.f32 %v386_v7, %v384_v6 }
  0xb5   :  { %692 = vst [vmem:[%s881_s2] sm:$0xff] %v691_v8  }
  0xb6   :  { %v369_v11 = vpop.f32.mrf.mxu2  ;;  %v333_v14 = vpop.f32.mrf.mxu0 }
  0xb7   :  { %v388_v12 = vpop.f32.mrf.mxu3  ;;  %v370_v13 = vadd.f32 %v369_v11, %v351_v9  ;;  %v352_v15 = vpop.f32.mrf.mxu1 }
  0xb8   :  { %v353_v18 = vadd.f32 %v352_v15, %v333_v14 }
  0xb9   :  { %v389_v17 = vadd.f32 %v388_v12, %v370_v13 }
  0xbb   :  { %v433_v24 = vadd.f32 %v432_v21, %v389_v17 }
  0xbe   :  { %v371_v19 = vpop.f32.mrf.mxu2 }
  0xbf   :  { %v372_v22 = vadd.f32 %v371_v19, %v353_v18  ;;  %v390_v23 = vpop.f32.mrf.mxu3 }
  0xc1   :  { %v391_v25 = vadd.f32 %v390_v23, %v372_v22 }
  0xc3   :  { %v696_v27 = vpack.c.bf16 %v391_v25, %v389_v17  ;;  %v434_v28 = vadd.f32 %v433_v24, %v391_v25 }
  0xc5   :  { %698 = vst [vmem:[%s881_s2 + $0x8] sm:$0xff] %v696_v27   ;;  %v435_v29 = vrot.slane %v434_v28, 4 }
  0xc7   :  { %v436_v31 = vadd.f32 %v435_v29, %v434_v28 }
  0xc9   :  { %v437_v32 = vrot.slane %v436_v31, 2 }
  0xcb   :  { %v438_v34 = vadd.f32 %v437_v32, %v436_v31 }
  0xcd   :  { %v439_v35 = vrot.slane %v438_v34, 1 }
  0xcf   :  { %v440_v37 = vadd.f32 %v439_v35, %v438_v34 }
  0xd1   :  { %v456_v38 = vmul.f32 %v450_v36, %v440_v37  ;;  %478 = vst [vmem:[%s882_s3] sm:$0x1] %v440_v37 }
  0xd3   :  { %v457_v39 = vsub.f32 %v384_v6, %v456_v38  ;;  %v458_v40 = vsub.f32 %v386_v7, %v456_v38  ;;  %v459_v41 = vsub.f32 %v389_v17, %v456_v38  ;;  %v460_v42 = vsub.f32 %v391_v25, %v456_v38 }
  0xd5   :  { %v465_v43 = vmul.f32 %v457_v39, %v457_v39  ;;  %v466_v44 = vmul.f32 %v458_v40, %v458_v40  ;;  %v467_v45 = vmul.f32 %v459_v41, %v459_v41  ;;  %v468_v47 = vmul.f32 %v460_v42, %v460_v42 }
  0xd7   :  { %v469_v46 = vadd.f32 %v466_v44, %v465_v43 }
  0xd9   :  { %v470_v48 = vadd.f32 %v469_v46, %v467_v45 }
  0xdb   :  { %v471_v49 = vadd.f32 %v470_v48, %v468_v47 }
  0xdd   :  { %v472_v50 = vrot.slane %v471_v49, 4 }
  0xdf   :  { %v473_v51 = vadd.f32 %v472_v50, %v471_v49 }
  0xe1   :  { %v474_v52 = vrot.slane %v473_v51, 2 }
  0xe3   :  { %v475_v53 = vadd.f32 %v474_v52, %v473_v51 }
  0xe5   :  { %v476_v54 = vrot.slane %v475_v53, 1 }
  0xe7   :  { %v477_v55 = vadd.f32 %v476_v54, %v475_v53 }
  0xe9   :  { %479 = vst [vmem:[%s882_s3 + $0x1] sm:$0x1] %v477_v55 }

// kernel: discriminator_forward.7
= control target key start
LH: loop header
LB: loop body
LE: loop exit
PB: predicated region body
PF: predicated region fallthrough
CT: control target
= control target key end

     0   :  { %s1274_s1 = inlined_call_operand.vmem [shape: bf16[1024,128], index: 1, kind: input, shape index: {}]   ;;  %s1275_s0 = inlined_call_operand.vmem [shape: bf16[8,1024], index: 0, kind: input, shape index: {}]   ;;  %s1276_s2 = inlined_call_operand.vmem [shape: bf16[8,128], index: 2, kind: output, shape index: {0}]   ;;  %s1277_s3 = inlined_call_operand.vmem [shape: f32[8,128], index: 3, kind: output, shape index: {1}]  }
   0x1   :  { %v980_v0 = vld [vmem:[%s1274_s1 + $0x38] sm:$0xff]  ;;  %v979_v4 = vld [vmem:[%s1274_s1 + $0x30] sm:$0xff]  ;;  %v978_v8 = vld [vmem:[%s1274_s1 + $0x28] sm:$0xff] }
   0x2   :  { %v988_v1 = vld [vmem:[%s1274_s1 + $0x78] sm:$0xff]  ;;  %557 = vmatpush.bf16.msra.mxu0 %v980_v0  ;;  %v987_v5 = vld [vmem:[%s1274_s1 + $0x70] sm:$0xff]  ;;  %v986_v9 = vld [vmem:[%s1274_s1 + $0x68] sm:$0xff] }
   0x3   :  { %v996_v2 = vld [vmem:[%s1274_s1 + $0xb8] sm:$0xff]  ;;  %570 = vmatpush.bf16.msra.mxu1 %v988_v1  ;;  %v995_v6 = vld [vmem:[%s1274_s1 + $0xb0] sm:$0xff]  ;;  %v994_v10 = vld [vmem:[%s1274_s1 + $0xa8] sm:$0xff] }
   0x4   :  { %v1004_v3 = vld [vmem:[%s1274_s1 + $0xf8] sm:$0xff]  ;;  %583 = vmatpush.bf16.msra.mxu2 %v996_v2  ;;  %v1003_v7 = vld [vmem:[%s1274_s1 + $0xf0] sm:$0xff]  ;;  %v1002_v11 = vld [vmem:[%s1274_s1 + $0xe8] sm:$0xff] }
   0x5   :  { %596 = vmatpush.bf16.msra.mxu3 %v1004_v3  ;;  %v977_v12 = vld [vmem:[%s1274_s1 + $0x20] sm:$0xff]  ;;  %v976_v16 = vld [vmem:[%s1274_s1 + $0x18] sm:$0xff]  ;;  %v975_v20 = vld [vmem:[%s1274_s1 + $0x10] sm:$0xff] }
   0x6   :  { %558 = vmatpush.bf16.msra.mxu0 %v979_v4  ;;  %v985_v13 = vld [vmem:[%s1274_s1 + $0x60] sm:$0xff]  ;;  %v984_v17 = vld [vmem:[%s1274_s1 + $0x58] sm:$0xff]  ;;  %v983_v21 = vld [vmem:[%s1274_s1 + $0x50] sm:$0xff] }
   0x7   :  { %571 = vmatpush.bf16.msra.mxu1 %v987_v5  ;;  %v993_v14 = vld [vmem:[%s1274_s1 + $0xa0] sm:$0xff]  ;;  %v992_v18 = vld [vmem:[%s1274_s1 + $0x98] sm:$0xff]  ;;  %v991_v22 = vld [vmem:[%s1274_s1 + $0x90] sm:$0xff] }
   0x8   :  { %584 = vmatpush.bf16.msra.mxu2 %v995_v6  ;;  %v1001_v15 = vld [vmem:[%s1274_s1 + $0xe0] sm:$0xff]  ;;  %v1000_v19 = vld [vmem:[%s1274_s1 + $0xd8] sm:$0xff]  ;;  %v999_v23 = vld [vmem:[%s1274_s1 + $0xd0] sm:$0xff] }
   0x9   :  { %597 = vmatpush.bf16.msra.mxu3 %v1003_v7  ;;  %v974_v24 = vld [vmem:[%s1274_s1 + $0x8] sm:$0xff]  ;;  %v13_v29 = vld [vmem:[%s1275_s0] sm:$0xff]  ;;  %v1012_v38 = vld [vmem:[%s1274_s1 + $0x138] sm:$0xff] }
   0xa   :  { %559 = vmatpush.bf16.msra.mxu0 %v978_v8  ;;  %v982_v25 = vld [vmem:[%s1274_s1 + $0x48] sm:$0xff]  ;;  %v973_v30 = vld [vmem:[%s1274_s1] sm:$0xff]  ;;  %v149_v33 = vunpack.c.l.b16 %v13_v29  ;;  %v150_v37 = vunpack.c.h.b16 %v13_v29  ;;  %v1020_v39 = vld [vmem:[%s1274_s1 + $0x178] sm:$0xff] }
   0xb   :  { %572 = vmatpush.bf16.msra.mxu1 %v986_v9  ;;  %v990_v26 = vld [vmem:[%s1274_s1 + $0x88] sm:$0xff]  ;;  %v981_v31 = vld [vmem:[%s1274_s1 + $0x40] sm:$0xff]  ;;  %v1028_v40 = vld [vmem:[%s1274_s1 + $0x1b8] sm:$0xff] }
   0xc   :  { %585 = vmatpush.bf16.msra.mxu2 %v994_v10  ;;  %v998_v27 = vld [vmem:[%s1274_s1 + $0xc8] sm:$0xff]  ;;  %v989_v34 = vld [vmem:[%s1274_s1 + $0x80] sm:$0xff]  ;;  %v1036_v41 = vld [vmem:[%s1274_s1 + $0x1f8] sm:$0xff]  ;;  %v157_v43 = vpack.c.b16 %v149_v33, %v149_v33  ;;  %v158_v45 = vpack.c.b16 %v150_v37, %v150_v37 }
   0xd   :  { %598 = vmatpush.bf16.msra.mxu3 %v1002_v11  ;;  %v14_v28 = vld [vmem:[%s1275_s0 + $0x8] sm:$0xff]  ;;  %v997_v35 = vld [vmem:[%s1274_s1 + $0xc0] sm:$0xff]  ;;  %v1011_v46 = vld [vmem:[%s1274_s1 + $0x130] sm:$0xff] }
   0xe   :  { %560 = vmatpush.bf16.msra.mxu0 %v977_v12  ;;  %v151_v32 = vunpack.c.l.b16 %v14_v28  ;;  %v152_v36 = vunpack.c.h.b16 %v14_v28  ;;  %v1019_v47 = vld [vmem:[%s1274_s1 + $0x170] sm:$0xff]  ;;  %v1010_v50 = vld [vmem:[%s1274_s1 + $0x128] sm:$0xff]  ;;  %v1009_v54 = vld [vmem:[%s1274_s1 + $0x120] sm:$0xff] }
   0xf   :  { %573 = vmatpush.bf16.msra.mxu1 %v985_v13  ;;  %v1027_v48 = vld [vmem:[%s1274_s1 + $0x1b0] sm:$0xff]  ;;  %v1018_v51 = vld [vmem:[%s1274_s1 + $0x168] sm:$0xff]  ;;  %v1017_v55 = vld [vmem:[%s1274_s1 + $0x160] sm:$0xff] }
  0x10   :  { %586 = vmatpush.bf16.msra.mxu2 %v993_v14  ;;  %v159_v42 = vpack.c.b16 %v151_v32, %v151_v32  ;;  %v160_v44 = vpack.c.b16 %v152_v36, %v152_v36  ;;  %v1035_v49 = vld [vmem:[%s1274_s1 + $0x1f0] sm:$0xff]  ;;  %v1026_v52 = vld [vmem:[%s1274_s1 + $0x1a8] sm:$0xff]  ;;  %v1025_v56 = vld [vmem:[%s1274_s1 + $0x1a0] sm:$0xff] }
  0x11   :  { %599 = vmatpush.bf16.msra.mxu3 %v1001_v15  ;;  %v1034_v53 = vld [vmem:[%s1274_s1 + $0x1e8] sm:$0xff]  ;;  %v1033_v57 = vld [vmem:[%s1274_s1 + $0x1e0] sm:$0xff]  ;;  %v1008_v58 = vld [vmem:[%s1274_s1 + $0x118] sm:$0xff] }
  0x12   :  { %561 = vmatpush.bf16.msra.mxu0 %v976_v16  ;;  %v1016_v59 = vld [vmem:[%s1274_s1 + $0x158] sm:$0xff]  ;;  %v1007_v62 = vld [vmem:[%s1274_s1 + $0x110] sm:$0xff]  ;;  %v1006_v2 = vld [vmem:[%s1274_s1 + $0x108] sm:$0xff] }
  0x13   :  { %574 = vmatpush.bf16.msra.mxu1 %v984_v17  ;;  %v1024_v60 = vld [vmem:[%s1274_s1 + $0x198] sm:$0xff]  ;;  %v1015_v63 = vld [vmem:[%s1274_s1 + $0x150] sm:$0xff]  ;;  %v1014_v3 = vld [vmem:[%s1274_s1 + $0x148] sm:$0xff] }
  0x14   :  { %587 = vmatpush.bf16.msra.mxu2 %v992_v18  ;;  %v1032_v61 = vld [vmem:[%s1274_s1 + $0x1d8] sm:$0xff]  ;;  %v1023_v0 = vld [vmem:[%s1274_s1 + $0x190] sm:$0xff]  ;;  %v1022_v5 = vld [vmem:[%s1274_s1 + $0x188] sm:$0xff] }
  0x15   :  { %600 = vmatpush.bf16.msra.mxu3 %v1000_v19  ;;  %v1031_v1 = vld [vmem:[%s1274_s1 + $0x1d0] sm:$0xff]  ;;  %v1030_v6 = vld [vmem:[%s1274_s1 + $0x1c8] sm:$0xff]  ;;  %v16_v7 = vld [vmem:[%s1275_s0 + $0x18] sm:$0xff] }
  0x16   :  { %562 = vmatpush.bf16.msra.mxu0 %v975_v20  ;;  %v15_v4 = vld [vmem:[%s1275_s0 + $0x10] sm:$0xff]  ;;  %v1005_v10 = vld [vmem:[%s1274_s1 + $0x100] sm:$0xff]  ;;  %v155_v12 = vunpack.c.l.b16 %v16_v7  ;;  %v156_v13 = vunpack.c.h.b16 %v16_v7 }
  0x17   :  { %575 = vmatpush.bf16.msra.mxu1 %v983_v21  ;;  %v153_v8 = vunpack.c.l.b16 %v15_v4  ;;  %v154_v9 = vunpack.c.h.b16 %v15_v4  ;;  %v1013_v11 = vld [vmem:[%s1274_s1 + $0x140] sm:$0xff] }
  0x18   :  { %588 = vmatpush.bf16.msra.mxu2 %v991_v22  ;;  %v1021_v14 = vld [vmem:[%s1274_s1 + $0x180] sm:$0xff]  ;;  %v163_v18 = vpack.c.b16 %v155_v12, %v155_v12  ;;  %v164_v19 = vpack.c.b16 %v156_v13, %v156_v13 }
  0x19   :  { %601 = vmatpush.bf16.msra.mxu3 %v999_v23  ;;  %v1029_v15 = vld [vmem:[%s1274_s1 + $0x1c0] sm:$0xff]  ;;  %v161_v16 = vpack.c.b16 %v153_v8, %v153_v8  ;;  %v162_v17 = vpack.c.b16 %v154_v9, %v154_v9 }
  0x1a   :  { %563 = vmatpush.bf16.msra.mxu0 %v974_v24 }
  0x1b   :  { %576 = vmatpush.bf16.msra.mxu1 %v982_v25 }
  0x1c   :  { %589 = vmatpush.bf16.msra.mxu2 %v990_v26 }
  0x1d   :  { %602 = vmatpush.bf16.msra.mxu3 %v998_v27 }
  0x1e   :  { %564 = vmatpush.bf16.msra.mxu0 %v973_v30  ;;  %v1040_v30 = vmov 8.0  }
  0x1f   :  { %577 = vmatpush.bf16.msra.mxu1 %v981_v31  ;;  %1038 = vrcp.f32 %v1040_v30 }
  0x20   :  { %590 = vmatpush.bf16.msra.mxu2 %v989_v34 }
  0x21   :  { %603 = vmatpush.bf16.msra.mxu3 %v997_v35  ;;  %565 = vmatmul.bf16.vlgmr.msra.gmra.mxu0 %v157_v43 }
  0x22   :  { %609 = vmatpush.bf16.msrb.mxu0 %v1012_v38  ;;  %578 = vmatmul.bf16.vlgmr.msra.gmra.mxu1 %v158_v45 }
  0x23   :  { %622 = vmatpush.bf16.msrb.mxu1 %v1020_v39  ;;  %591 = vmatmul.bf16.vlgmr.msra.gmra.mxu2 %v159_v42 }
  0x24   :  { %635 = vmatpush.bf16.msrb.mxu2 %v1028_v40  ;;  %604 = vmatmul.bf16.vlgmr.msra.gmra.mxu3 %v160_v44 }
  0x25   :  { %648 = vmatpush.bf16.msrb.mxu3 %v1036_v41  ;;  %v1039_v34 = vpop.eup %1038 }
  0x26   :  { %610 = vmatpush.bf16.msrb.mxu0 %v1011_v46  ;;  %v684_v36 = vmul.f32 8.0, %v1039_v34  ;;  %vm689_vm0 = vweird.f32 %v1039_v34 }
  0x27   :  { %623 = vmatpush.bf16.msrb.mxu1 %v1019_v47 }
  0x28   :  { %636 = vmatpush.bf16.msrb.mxu2 %v1027_v48  ;;  %v685_v43 = vsub.f32 1.0, %v684_v36 }
  0x29   :  { %649 = vmatpush.bf16.msrb.mxu3 %v1035_v49 }
  0x2a   :  { %611 = vmatpush.bf16.msrb.mxu0 %v1010_v50  ;;  %v686_v47 = vmul.f32 %v1039_v34, %v685_v43 }
  0x2b   :  { %624 = vmatpush.bf16.msrb.mxu1 %v1018_v51 }
  0x2c   :  { %637 = vmatpush.bf16.msrb.mxu2 %v1026_v52  ;;  %v687_v52 = vadd.f32 %v1039_v34, %v686_v47 }
  0x2d   :  { %650 = vmatpush.bf16.msrb.mxu3 %v1034_v53 }
  0x2e   :  { %612 = vmatpush.bf16.msrb.mxu0 %v1009_v54 }
  0x2f   :  { %625 = vmatpush.bf16.msrb.mxu1 %v1017_v55  ;;  %v691_v55 = vsel %vm689_vm0, %v1039_v34, %v687_v52 }
  0x30   :  { %638 = vmatpush.bf16.msrb.mxu2 %v1025_v56 }
  0x31   :  { %651 = vmatpush.bf16.msrb.mxu3 %v1033_v57 }
  0x32   :  { %613 = vmatpush.bf16.msrb.mxu0 %v1008_v58 }
  0x33   :  { %626 = vmatpush.bf16.msrb.mxu1 %v1016_v59 }
  0x34   :  { %639 = vmatpush.bf16.msrb.mxu2 %v1024_v60 }
  0x35   :  { %652 = vmatpush.bf16.msrb.mxu3 %v1032_v61 }
  0x36   :  { %614 = vmatpush.bf16.msrb.mxu0 %v1007_v62 }
  0x37   :  { %627 = vmatpush.bf16.msrb.mxu1 %v1015_v63 }
  0x38   :  { %640 = vmatpush.bf16.msrb.mxu2 %v1023_v0 }
  0x39   :  { %653 = vmatpush.bf16.msrb.mxu3 %v1031_v1 }
  0x3a   :  { %615 = vmatpush.bf16.msrb.mxu0 %v1006_v2 }
  0x3b   :  { %628 = vmatpush.bf16.msrb.mxu1 %v1014_v3 }
  0x3c   :  { %641 = vmatpush.bf16.msrb.mxu2 %v1022_v5 }
  0x3d   :  { %654 = vmatpush.bf16.msrb.mxu3 %v1030_v6 }
  0x3e   :  { %616 = vmatpush.bf16.msrb.mxu0 %v1005_v10 }
  0x3f   :  { %629 = vmatpush.bf16.msrb.mxu1 %v1013_v11 }
  0x40   :  { %642 = vmatpush.bf16.msrb.mxu2 %v1021_v14 }
  0x41   :  { %655 = vmatpush.bf16.msrb.mxu3 %v1029_v15  ;;  %617 = vmatmul.bf16.vlgmr.msrb.gmra.mxu0 %v161_v16 }
  0x42   :  { %630 = vmatmul.bf16.vlgmr.msrb.gmra.mxu1 %v162_v17 }
  0x43   :  { %643 = vmatmul.bf16.vlgmr.msrb.gmra.mxu2 %v163_v18 }
  0x44   :  { %656 = vmatmul.bf16.vlgmr.msrb.gmra.mxu3 %v164_v19 }
  0x9e   :  { %v566_v20 = vpop.f32.mrf.mxu0 }
  0x9f   :  { %v579_v21 = vpop.f32.mrf.mxu1 }
  0xa0   :  { %v580_v28 = vadd.f32 %v579_v21, %v566_v20 }
  0xa6   :  { %v592_v22 = vpop.f32.mrf.mxu2  ;;  %v568_v24 = vpop.f32.mrf.mxu0 }
  0xa7   :  { %v605_v23 = vpop.f32.mrf.mxu3  ;;  %v581_v25 = vpop.f32.mrf.mxu1  ;;  %v593_v29 = vadd.f32 %v592_v22, %v580_v28 }
  0xa9   :  { %v606_v31 = vadd.f32 %v605_v23, %v593_v29 }
  0xae   :  { %v594_v26 = vpop.f32.mrf.mxu2 }
  0xaf   :  { %v607_v27 = vpop.f32.mrf.mxu3 }
  0xbe   :  { %v618_v32 = vpop.f32.mrf.mxu0 }
  0xbf   :  { %v631_v33 = vpop.f32.mrf.mxu1  ;;  %v619_v35 = vadd.f32 %v618_v32, %v606_v31 }
  0xc1   :  { %v632_v37 = vadd.f32 %v631_v33, %v619_v35 }
  0xc6   :  { %v644_v38 = vpop.f32.mrf.mxu2  ;;  %v620_v41 = vpop.f32.mrf.mxu0 }
  0xc7   :  { %v657_v39 = vpop.f32.mrf.mxu3  ;;  %v645_v40 = vadd.f32 %v644_v38, %v632_v37  ;;  %v633_v42 = vpop.f32.mrf.mxu1 }
  0xc9   :  { %v658_v44 = vadd.f32 %v657_v39, %v645_v40 }
  0xcb   :  { %v661_v45 = vpack.c.bf16 %v658_v44, %v658_v44  ;;  %v676_v46 = vrot.slane %v658_v44, 4 }
  0xcd   :  { %662 = vst [vmem:[%s1276_s2] sm:$0xf] %v661_v45  ;;  %v677_v48 = vadd.f32 %v676_v46, %v658_v44 }
  0xce   :  { %v646_v49 = vpop.f32.mrf.mxu2 }
  0xcf   :  { %v659_v50 = vpop.f32.mrf.mxu3  ;;  %v678_v51 = vrot.slane %v677_v48, 2 }
  0xd1   :  { %v679_v53 = vadd.f32 %v678_v51, %v677_v48 }
  0xd3   :  { %v680_v54 = vrot.slane %v679_v53, 1 }
  0xd5   :  { %v681_v56 = vadd.f32 %v680_v54, %v679_v53 }
  0xd7   :  { %v697_v57 = vmul.f32 %v691_v55, %v681_v56  ;;  %707 = vst [vmem:[%s1277_s3] sm:$0x1] %v681_v56 }
  0xd9   :  { %v698_v58 = vsub.f32 %v658_v44, %v697_v57 }
  0xdb   :  { %v700_v59 = vmul.f32 %v698_v58, %v698_v58 }
  0xdd   :  { %v701_v60 = vrot.slane %v700_v59, 4 }
  0xdf   :  { %v702_v61 = vadd.f32 %v701_v60, %v700_v59 }
  0xe1   :  { %v703_v62 = vrot.slane %v702_v61, 2 }
  0xe3   :  { %v704_v63 = vadd.f32 %v703_v62, %v702_v61 }
  0xe5   :  { %v705_v0 = vrot.slane %v704_v63, 1 }
  0xe7   :  { %v706_v1 = vadd.f32 %v705_v0, %v704_v63 }
  0xe9   :  { %708 = vst [vmem:[%s1277_s3 + $0x1] sm:$0x1] %v706_v1 }

// kernel: discriminator_forward.8
= control target key start
LH: loop header
LB: loop body
LE: loop exit
PB: predicated region body
PF: predicated region fallthrough
CT: control target
= control target key end

     0   :  { %vm2095_vm2 = vcmask 1040384   ;;  %s5090_s1 = inlined_call_operand.vmem [shape: bf16[2048,256], index: 1, kind: input, shape index: {}]   ;;  %s5091_s0 = inlined_call_operand.vmem [shape: bf16[8,2048], index: 0, kind: input, shape index: {}]   ;;  %s5092_s2 = inlined_call_operand.vmem [shape: bf16[8,256], index: 2, kind: output, shape index: {0}]   ;;  %s5093_s3 = inlined_call_operand.vmem [shape: f32[8,256], index: 3, kind: output, shape index: {1}]  }
   0x1   :  { %v2178_v0 = vld [vmem:[%s5090_s1 + $0x70] sm:$0xf]  ;;  %v3160_v1 = vld [vmem:[%s5090_s1 + $0x74] sm:$0xf0]  ;;  %v2170_v11 = vld [vmem:[%s5090_s1 + $0x60] sm:$0xf] }
   0x2   :  { %v2242_v2 = vld [vmem:[%s5090_s1 + $0xf0] sm:$0xf]  ;;  %v2179_v3 = vor.u32 %v3160_v1, %v2178_v0  ;;  %v3176_v4 = vld [vmem:[%s5090_s1 + $0xf4] sm:$0xf0]  ;;  %v3158_v13 = vld [vmem:[%s5090_s1 + $0x64] sm:$0xf0] }
   0x3   :  { %v2306_v5 = vld [vmem:[%s5090_s1 + $0x170] sm:$0xf]  ;;  %v3192_v6 = vld [vmem:[%s5090_s1 + $0x174] sm:$0xf0]  ;;  %v2243_v7 = vor.u32 %v3176_v4, %v2242_v2  ;;  %v2234_v14 = vld [vmem:[%s5090_s1 + $0xe0] sm:$0xf]  ;;  %v2171_v16 = vor.u32 %v3158_v13, %v2170_v11 }
   0x4   :  { %v2307_v8 = vor.u32 %v3192_v6, %v2306_v5  ;;  %v2370_v9 = vld [vmem:[%s5090_s1 + $0x1f0] sm:$0xf]  ;;  %v3208_v10 = vld [vmem:[%s5090_s1 + $0x1f4] sm:$0xf0]  ;;  %1613 = vmatpush.bf16.msra.mxu0 %v2179_v3  ;;  %v3174_v15 = vld [vmem:[%s5090_s1 + $0xe4] sm:$0xf0] }
   0x5   :  { %v2371_v12 = vor.u32 %v3208_v10, %v2370_v9  ;;  %1626 = vmatpush.bf16.msra.mxu1 %v2243_v7  ;;  %v2235_v17 = vor.u32 %v3174_v15, %v2234_v14  ;;  %v2298_v18 = vld [vmem:[%s5090_s1 + $0x160] sm:$0xf]  ;;  %v3190_v19 = vld [vmem:[%s5090_s1 + $0x164] sm:$0xf0]  ;;  %v2162_v23 = vld [vmem:[%s5090_s1 + $0x50] sm:$0xf] }
   0x6   :  { %1639 = vmatpush.bf16.msra.mxu2 %v2307_v8  ;;  %v2362_v20 = vld [vmem:[%s5090_s1 + $0x1e0] sm:$0xf]  ;;  %v2299_v21 = vor.u32 %v3190_v19, %v2298_v18  ;;  %v3206_v22 = vld [vmem:[%s5090_s1 + $0x1e4] sm:$0xf0]  ;;  %v3156_v24 = vld [vmem:[%s5090_s1 + $0x54] sm:$0xf0] }
   0x7   :  { %1652 = vmatpush.bf16.msra.mxu3 %v2371_v12  ;;  %v2363_v25 = vor.u32 %v3206_v22, %v2362_v20  ;;  %v2226_v26 = vld [vmem:[%s5090_s1 + $0xd0] sm:$0xf]  ;;  %v3172_v27 = vld [vmem:[%s5090_s1 + $0xd4] sm:$0xf0]  ;;  %v2163_v29 = vor.u32 %v3156_v24, %v2162_v23  ;;  %v2154_v35 = vld [vmem:[%s5090_s1 + $0x40] sm:$0xf] }
   0x8   :  { %v2290_v28 = vld [vmem:[%s5090_s1 + $0x150] sm:$0xf]  ;;  %1614 = vmatpush.bf16.msra.mxu0 %v2171_v16  ;;  %v3188_v30 = vld [vmem:[%s5090_s1 + $0x154] sm:$0xf0]  ;;  %v2227_v33 = vor.u32 %v3172_v27, %v2226_v26  ;;  %v3154_v36 = vld [vmem:[%s5090_s1 + $0x44] sm:$0xf0] }
   0x9   :  { %v2354_v31 = vld [vmem:[%s5090_s1 + $0x1d0] sm:$0xf]  ;;  %v3204_v32 = vld [vmem:[%s5090_s1 + $0x1d4] sm:$0xf0]  ;;  %1627 = vmatpush.bf16.msra.mxu1 %v2235_v17  ;;  %v2291_v34 = vor.u32 %v3188_v30, %v2290_v28  ;;  %v2218_v37 = vld [vmem:[%s5090_s1 + $0xc0] sm:$0xf]  ;;  %v2155_v44 = vor.u32 %v3154_v36, %v2154_v35 }
   0xa   :  { %1640 = vmatpush.bf16.msra.mxu2 %v2299_v21  ;;  %v2355_v38 = vor.u32 %v3204_v32, %v2354_v31  ;;  %v3170_v39 = vld [vmem:[%s5090_s1 + $0xc4] sm:$0xf0]  ;;  %v2282_v40 = vld [vmem:[%s5090_s1 + $0x140] sm:$0xf]  ;;  %v2146_v47 = vld [vmem:[%s5090_s1 + $0x30] sm:$0xf] }
   0xb   :  { %1653 = vmatpush.bf16.msra.mxu3 %v2363_v25  ;;  %v3186_v41 = vld [vmem:[%s5090_s1 + $0x144] sm:$0xf0]  ;;  %v2346_v42 = vld [vmem:[%s5090_s1 + $0x1c0] sm:$0xf]  ;;  %v2219_v45 = vor.u32 %v3170_v39, %v2218_v37  ;;  %v3152_v48 = vld [vmem:[%s5090_s1 + $0x34] sm:$0xf0] }
   0xc   :  { %v3202_v43 = vld [vmem:[%s5090_s1 + $0x1c4] sm:$0xf0]  ;;  %1615 = vmatpush.bf16.msra.mxu0 %v2163_v29  ;;  %v2283_v46 = vor.u32 %v3186_v41, %v2282_v40  ;;  %v2210_v49 = vld [vmem:[%s5090_s1 + $0xb0] sm:$0xf]  ;;  %v3168_v51 = vld [vmem:[%s5090_s1 + $0xb4] sm:$0xf0]  ;;  %v2147_v56 = vor.u32 %v3152_v48, %v2146_v47 }
   0xd   :  { %1628 = vmatpush.bf16.msra.mxu1 %v2227_v33  ;;  %v2347_v50 = vor.u32 %v3202_v43, %v2346_v42  ;;  %v2274_v52 = vld [vmem:[%s5090_s1 + $0x130] sm:$0xf]  ;;  %v3184_v53 = vld [vmem:[%s5090_s1 + $0x134] sm:$0xf0]  ;;  %v2211_v57 = vor.u32 %v3168_v51, %v2210_v49  ;;  %v2138_v59 = vld [vmem:[%s5090_s1 + $0x20] sm:$0xf] }
   0xe   :  { %1641 = vmatpush.bf16.msra.mxu2 %v2291_v34  ;;  %v2338_v54 = vld [vmem:[%s5090_s1 + $0x1b0] sm:$0xf]  ;;  %v3200_v55 = vld [vmem:[%s5090_s1 + $0x1b4] sm:$0xf0]  ;;  %v2275_v58 = vor.u32 %v3184_v53, %v2274_v52  ;;  %v3150_v60 = vld [vmem:[%s5090_s1 + $0x24] sm:$0xf0] }
   0xf   :  { %1654 = vmatpush.bf16.msra.mxu3 %v2355_v38  ;;  %v2202_v61 = vld [vmem:[%s5090_s1 + $0xa0] sm:$0xf]  ;;  %v2339_v62 = vor.u32 %v3200_v55, %v2338_v54  ;;  %v3166_v63 = vld [vmem:[%s5090_s1 + $0xa4] sm:$0xf0]  ;;  %v2139_v4 = vor.u32 %v3150_v60, %v2138_v59  ;;  %v2130_v7 = vld [vmem:[%s5090_s1 + $0x10] sm:$0xf] }
  0x10   :  { %1616 = vmatpush.bf16.msra.mxu0 %v2155_v44  ;;  %v2266_v0 = vld [vmem:[%s5090_s1 + $0x120] sm:$0xf]  ;;  %v3182_v1 = vld [vmem:[%s5090_s1 + $0x124] sm:$0xf0]  ;;  %v2203_v5 = vor.u32 %v3166_v63, %v2202_v61  ;;  %v3148_v8 = vld [vmem:[%s5090_s1 + $0x14] sm:$0xf0] }
  0x11   :  { %1629 = vmatpush.bf16.msra.mxu1 %v2219_v45  ;;  %v2330_v2 = vld [vmem:[%s5090_s1 + $0x1a0] sm:$0xf]  ;;  %v3198_v3 = vld [vmem:[%s5090_s1 + $0x1a4] sm:$0xf0]  ;;  %v2267_v6 = vor.u32 %v3182_v1, %v2266_v0  ;;  %v2194_v9 = vld [vmem:[%s5090_s1 + $0x90] sm:$0xf]  ;;  %v2131_v16 = vor.u32 %v3148_v8, %v2130_v7 }
  0x12   :  { %1642 = vmatpush.bf16.msra.mxu2 %v2283_v46  ;;  %v2331_v10 = vor.u32 %v3198_v3, %v2330_v2  ;;  %v3164_v11 = vld [vmem:[%s5090_s1 + $0x94] sm:$0xf0]  ;;  %v2258_v12 = vld [vmem:[%s5090_s1 + $0x110] sm:$0xf]  ;;  %v2122_v17 = vld [vmem:[%s5090_s1] sm:$0xf] }
  0x13   :  { %1655 = vmatpush.bf16.msra.mxu3 %v2347_v50  ;;  %v3180_v13 = vld [vmem:[%s5090_s1 + $0x114] sm:$0xf0]  ;;  %v2322_v14 = vld [vmem:[%s5090_s1 + $0x190] sm:$0xf]  ;;  %v3146_v18 = vld [vmem:[%s5090_s1 + $0x4] sm:$0xf0]  ;;  %v2195_v19 = vor.u32 %v3164_v11, %v2194_v9 }
  0x14   :  { %1617 = vmatpush.bf16.msra.mxu0 %v2147_v56  ;;  %v3196_v15 = vld [vmem:[%s5090_s1 + $0x194] sm:$0xf0]  ;;  %v2259_v20 = vor.u32 %v3180_v13, %v2258_v12  ;;  %v2186_v21 = vld [vmem:[%s5090_s1 + $0x80] sm:$0xf]  ;;  %v3162_v22 = vld [vmem:[%s5090_s1 + $0x84] sm:$0xf0]  ;;  %v2123_v31 = vor.u32 %v3146_v18, %v2122_v17 }
  0x15   :  { %1630 = vmatpush.bf16.msra.mxu1 %v2211_v57  ;;  %v2250_v23 = vld [vmem:[%s5090_s1 + $0x100] sm:$0xf]  ;;  %v2323_v24 = vor.u32 %v3196_v15, %v2322_v14  ;;  %v3178_v25 = vld [vmem:[%s5090_s1 + $0x104] sm:$0xf0]  ;;  %v2434_v28 = vld [vmem:[%s5090_s1 + $0x270] sm:$0xf]  ;;  %v2187_v35 = vor.u32 %v3162_v22, %v2186_v21 }
  0x16   :  { %1643 = vmatpush.bf16.msra.mxu2 %v2275_v58  ;;  %v2314_v26 = vld [vmem:[%s5090_s1 + $0x180] sm:$0xf]  ;;  %v3194_v27 = vld [vmem:[%s5090_s1 + $0x184] sm:$0xf0]  ;;  %v3224_v29 = vld [vmem:[%s5090_s1 + $0x274] sm:$0xf0]  ;;  %v2251_v36 = vor.u32 %v3178_v25, %v2250_v23 }
  0x17   :  { %1656 = vmatpush.bf16.msra.mxu3 %v2339_v62  ;;  %v2498_v30 = vld [vmem:[%s5090_s1 + $0x2f0] sm:$0xf]  ;;  %v3240_v32 = vld [vmem:[%s5090_s1 + $0x2f4] sm:$0xf0]  ;;  %v2315_v39 = vor.u32 %v3194_v27, %v2314_v26  ;;  %v2435_v40 = vor.u32 %v3224_v29, %v2434_v28  ;;  %v2426_v43 = vld [vmem:[%s5090_s1 + $0x260] sm:$0xf] }
  0x18   :  { %1618 = vmatpush.bf16.msra.mxu0 %v2139_v4  ;;  %v2562_v33 = vld [vmem:[%s5090_s1 + $0x370] sm:$0xf]  ;;  %v3256_v34 = vld [vmem:[%s5090_s1 + $0x374] sm:$0xf0]  ;;  %v2499_v41 = vor.u32 %v3240_v32, %v2498_v30  ;;  %v3222_v44 = vld [vmem:[%s5090_s1 + $0x264] sm:$0xf0] }
  0x19   :  { %1631 = vmatpush.bf16.msra.mxu1 %v2203_v5  ;;  %v2626_v37 = vld [vmem:[%s5090_s1 + $0x3f0] sm:$0xf]  ;;  %v3272_v38 = vld [vmem:[%s5090_s1 + $0x3f4] sm:$0xf0]  ;;  %v2563_v42 = vor.u32 %v3256_v34, %v2562_v33  ;;  %v2490_v45 = vld [vmem:[%s5090_s1 + $0x2e0] sm:$0xf]  ;;  %v2427_v52 = vor.u32 %v3222_v44, %v2426_v43 }
  0x1a   :  { %1644 = vmatpush.bf16.msra.mxu2 %v2267_v6  ;;  %v2627_v46 = vor.u32 %v3272_v38, %v2626_v37  ;;  %v3238_v47 = vld [vmem:[%s5090_s1 + $0x2e4] sm:$0xf0]  ;;  %v2554_v48 = vld [vmem:[%s5090_s1 + $0x360] sm:$0xf]  ;;  %v2418_v53 = vld [vmem:[%s5090_s1 + $0x250] sm:$0xf] }
  0x1b   :  { %1657 = vmatpush.bf16.msra.mxu3 %v2331_v10  ;;  %v3254_v49 = vld [vmem:[%s5090_s1 + $0x364] sm:$0xf0]  ;;  %v2618_v50 = vld [vmem:[%s5090_s1 + $0x3e0] sm:$0xf]  ;;  %v2491_v54 = vor.u32 %v3238_v47, %v2490_v45  ;;  %v3220_v56 = vld [vmem:[%s5090_s1 + $0x254] sm:$0xf0] }
  0x1c   :  { %1619 = vmatpush.bf16.msra.mxu0 %v2131_v16  ;;  %v3270_v51 = vld [vmem:[%s5090_s1 + $0x3e4] sm:$0xf0]  ;;  %v2555_v55 = vor.u32 %v3254_v49, %v2554_v48  ;;  %v2482_v57 = vld [vmem:[%s5090_s1 + $0x2d0] sm:$0xf]  ;;  %v3236_v60 = vld [vmem:[%s5090_s1 + $0x2d4] sm:$0xf0]  ;;  %v2419_v3 = vor.u32 %v3220_v56, %v2418_v53 }
  0x1d   :  { %1632 = vmatpush.bf16.msra.mxu1 %v2195_v19  ;;  %v14_v58 = vld [vmem:[%s5091_s0 + $0x8] sm:$0xff]  ;;  %v2619_v59 = vor.u32 %v3270_v51, %v2618_v50  ;;  %v2546_v61 = vld [vmem:[%s5090_s1 + $0x350] sm:$0xf]  ;;  %v3252_v62 = vld [vmem:[%s5090_s1 + $0x354] sm:$0xf0]  ;;  %v2483_v7 = vor.u32 %v3236_v60, %v2482_v57 }
  0x1e   :  { %1645 = vmatpush.bf16.msra.mxu2 %v2259_v20  ;;  %v287_v63 = vunpack.c.l.b16 %v14_v58  ;;  %v288_v0 = vunpack.c.h.b16 %v14_v58  ;;  %v2610_v1 = vld [vmem:[%s5090_s1 + $0x3d0] sm:$0xf]  ;;  %v3268_v2 = vld [vmem:[%s5090_s1 + $0x3d4] sm:$0xf0]  ;;  %v13_v5 = vld [vmem:[%s5091_s0] sm:$0xff]  ;;  %v2547_v8 = vor.u32 %v3252_v62, %v2546_v61 }
  0x1f   :  { %1658 = vmatpush.bf16.msra.mxu3 %v2323_v24  ;;  %v2410_v9 = vld [vmem:[%s5090_s1 + $0x240] sm:$0xf]  ;;  %v3218_v10 = vld [vmem:[%s5090_s1 + $0x244] sm:$0xf0]  ;;  %v285_v12 = vunpack.c.l.b16 %v13_v5  ;;  %v286_v13 = vunpack.c.h.b16 %v13_v5  ;;  %v2611_v14 = vor.u32 %v3268_v2, %v2610_v1  ;;  %v2402_v25 = vld [vmem:[%s5090_s1 + $0x230] sm:$0xf] }
  0x20   :  { %1620 = vmatpush.bf16.msra.mxu0 %v2123_v31  ;;  %v3692_v4 = vpack.c.b16 %v287_v63, %v287_v63  ;;  %v3697_v6 = vpack.c.b16 %v288_v0, %v288_v0  ;;  %v2474_v11 = vld [vmem:[%s5090_s1 + $0x2c0] sm:$0xf]  ;;  %v3234_v15 = vld [vmem:[%s5090_s1 + $0x2c4] sm:$0xf0]  ;;  %v2411_v22 = vor.u32 %v3218_v10, %v2410_v9  ;;  %v3216_v26 = vld [vmem:[%s5090_s1 + $0x234] sm:$0xf0] }
  0x21   :  { %1633 = vmatpush.bf16.msra.mxu1 %v2187_v35  ;;  %v2538_v16 = vld [vmem:[%s5090_s1 + $0x340] sm:$0xf]  ;;  %v3250_v17 = vld [vmem:[%s5090_s1 + $0x344] sm:$0xf0]  ;;  %v3724_v20 = vpack.c.b16 %v285_v12, %v285_v12  ;;  %v3727_v21 = vpack.c.b16 %v286_v13, %v286_v13  ;;  %v2475_v23 = vor.u32 %v3234_v15, %v2474_v11  ;;  %v2466_v27 = vld [vmem:[%s5090_s1 + $0x2b0] sm:$0xf]  ;;  %v2403_v34 = vor.u32 %v3216_v26, %v2402_v25 }
  0x22   :  { %1646 = vmatpush.bf16.msra.mxu2 %v2251_v36  ;;  %v2602_v18 = vld [vmem:[%s5090_s1 + $0x3c0] sm:$0xf]  ;;  %v3266_v19 = vld [vmem:[%s5090_s1 + $0x3c4] sm:$0xf0]  ;;  %v2539_v24 = vor.u32 %v3250_v17, %v2538_v16  ;;  %v3232_v29 = vld [vmem:[%s5090_s1 + $0x2b4] sm:$0xf0] }
  0x23   :  { %1659 = vmatpush.bf16.msra.mxu3 %v2315_v39  ;;  %v2603_v28 = vor.u32 %v3266_v19, %v2602_v18  ;;  %v2530_v30 = vld [vmem:[%s5090_s1 + $0x330] sm:$0xf]  ;;  %v3248_v31 = vld [vmem:[%s5090_s1 + $0x334] sm:$0xf0]  ;;  %1621 = vmatmul.bf16.vlgmr.msra.gmra.mxu0 %v3724_v20  ;;  %v2467_v35 = vor.u32 %v3232_v29, %v2466_v27  ;;  %v2394_v37 = vld [vmem:[%s5090_s1 + $0x220] sm:$0xf] }
  0x24   :  { %1665 = vmatpush.bf16.msrb.mxu0 %v2435_v40  ;;  %v2594_v32 = vld [vmem:[%s5090_s1 + $0x3b0] sm:$0xf]  ;;  %v3264_v33 = vld [vmem:[%s5090_s1 + $0x3b4] sm:$0xf0]  ;;  %1634 = vmatmul.bf16.vlgmr.msra.gmra.mxu1 %v3727_v21  ;;  %v2531_v36 = vor.u32 %v3248_v31, %v2530_v30  ;;  %v3214_v38 = vld [vmem:[%s5090_s1 + $0x224] sm:$0xf0] }
  0x25   :  { %1678 = vmatpush.bf16.msrb.mxu1 %v2499_v41  ;;  %1647 = vmatmul.bf16.vlgmr.msra.gmra.mxu2 %v3692_v4  ;;  %v2458_v39 = vld [vmem:[%s5090_s1 + $0x2a0] sm:$0xf]  ;;  %v2595_v40 = vor.u32 %v3264_v33, %v2594_v32  ;;  %v3230_v41 = vld [vmem:[%s5090_s1 + $0x2a4] sm:$0xf0]  ;;  %v2386_v49 = vld [vmem:[%s5090_s1 + $0x210] sm:$0xf] }
  0x26   :  { %1691 = vmatpush.bf16.msrb.mxu2 %v2563_v42  ;;  %1660 = vmatmul.bf16.vlgmr.msra.gmra.mxu3 %v3697_v6  ;;  %v2522_v42 = vld [vmem:[%s5090_s1 + $0x320] sm:$0xf]  ;;  %v3246_v43 = vld [vmem:[%s5090_s1 + $0x324] sm:$0xf0]  ;;  %v2459_v47 = vor.u32 %v3230_v41, %v2458_v39  ;;  %v3212_v50 = vld [vmem:[%s5090_s1 + $0x214] sm:$0xf0] }
  0x27   :  { %1704 = vmatpush.bf16.msrb.mxu3 %v2627_v46  ;;  %v2586_v44 = vld [vmem:[%s5090_s1 + $0x3a0] sm:$0xf]  ;;  %v3262_v45 = vld [vmem:[%s5090_s1 + $0x3a4] sm:$0xf0]  ;;  %v2395_v46 = vor.u32 %v3214_v38, %v2394_v37  ;;  %v2523_v48 = vor.u32 %v3246_v43, %v2522_v42  ;;  %v2450_v51 = vld [vmem:[%s5090_s1 + $0x290] sm:$0xf] }
  0x28   :  { %1666 = vmatpush.bf16.msrb.mxu0 %v2427_v52  ;;  %v2587_v52 = vor.u32 %v3262_v45, %v2586_v44  ;;  %v3228_v53 = vld [vmem:[%s5090_s1 + $0x294] sm:$0xf0]  ;;  %v2578_v56 = vld [vmem:[%s5090_s1 + $0x390] sm:$0xf]  ;;  %v2378_v58 = vld [vmem:[%s5090_s1 + $0x200] sm:$0xf] }
  0x29   :  { %1679 = vmatpush.bf16.msrb.mxu1 %v2491_v54  ;;  %v2514_v54 = vld [vmem:[%s5090_s1 + $0x310] sm:$0xf]  ;;  %v3260_v57 = vld [vmem:[%s5090_s1 + $0x394] sm:$0xf0]  ;;  %v3210_v60 = vld [vmem:[%s5090_s1 + $0x204] sm:$0xf0]  ;;  %v2451_v63 = vor.u32 %v3228_v53, %v2450_v51 }
  0x2a   :  { %1692 = vmatpush.bf16.msrb.mxu2 %v2555_v55  ;;  %v3244_v55 = vld [vmem:[%s5090_s1 + $0x314] sm:$0xf0]  ;;  %v2442_v61 = vld [vmem:[%s5090_s1 + $0x280] sm:$0xf]  ;;  %v3226_v62 = vld [vmem:[%s5090_s1 + $0x284] sm:$0xf0]  ;;  %v2579_v5 = vor.u32 %v3260_v57, %v2578_v56  ;;  %v2379_v13 = vor.u32 %v3210_v60, %v2378_v58 }
  0x2b   :  { %1705 = vmatpush.bf16.msrb.mxu3 %v2619_v59  ;;  %v2387_v59 = vor.u32 %v3212_v50, %v2386_v49  ;;  %v2515_v0 = vor.u32 %v3244_v55, %v2514_v54  ;;  %v2506_v1 = vld [vmem:[%s5090_s1 + $0x300] sm:$0xf]  ;;  %v3242_v2 = vld [vmem:[%s5090_s1 + $0x304] sm:$0xf0]  ;;  %v15_v9 = vld [vmem:[%s5091_s0 + $0x10] sm:$0xff]  ;;  %v2443_v18 = vor.u32 %v3226_v62, %v2442_v61 }
  0x2c   :  { %1667 = vmatpush.bf16.msrb.mxu0 %v2419_v3  ;;  %v16_v3 = vld [vmem:[%s5091_s0 + $0x18] sm:$0xff]  ;;  %v2690_v10 = vld [vmem:[%s5090_s1 + $0x470] sm:$0xf]  ;;  %v2507_v19 = vor.u32 %v3242_v2, %v2506_v1  ;;  %v2682_v31 = vld [vmem:[%s5090_s1 + $0x460] sm:$0xf] }
  0x2d   :  { %1680 = vmatpush.bf16.msrb.mxu1 %v2483_v7  ;;  %v2570_v7 = vld [vmem:[%s5090_s1 + $0x380] sm:$0xf]  ;;  %v3288_v11 = vld [vmem:[%s5090_s1 + $0x474] sm:$0xf0]  ;;  %v2754_v12 = vld [vmem:[%s5090_s1 + $0x4f0] sm:$0xf]  ;;  %v291_v17 = vunpack.c.l.b16 %v16_v3  ;;  %v292_v25 = vunpack.c.h.b16 %v16_v3 }
  0x2e   :  { %1693 = vmatpush.bf16.msrb.mxu2 %v2547_v8  ;;  %v3258_v8 = vld [vmem:[%s5090_s1 + $0x384] sm:$0xf0]  ;;  %v2818_v15 = vld [vmem:[%s5090_s1 + $0x570] sm:$0xf]  ;;  %v3320_v16 = vld [vmem:[%s5090_s1 + $0x574] sm:$0xf0]  ;;  %v2691_v27 = vor.u32 %v3288_v11, %v2690_v10 }
  0x2f   :  { %1706 = vmatpush.bf16.msrb.mxu3 %v2611_v14  ;;  %v3304_v14 = vld [vmem:[%s5090_s1 + $0x4f4] sm:$0xf0]  ;;  %v2571_v26 = vor.u32 %v3258_v8, %v2570_v7  ;;  %v2819_v30 = vor.u32 %v3320_v16, %v2818_v15  ;;  %v3286_v32 = vld [vmem:[%s5090_s1 + $0x464] sm:$0xf0]  ;;  %v2746_v33 = vld [vmem:[%s5090_s1 + $0x4e0] sm:$0xf]  ;;  %v3875_v38 = vpack.c.b16 %v291_v17, %v291_v17  ;;  %v3885_v42 = vpack.c.b16 %v292_v25, %v292_v25 }
  0x30   :  { %1668 = vmatpush.bf16.msrb.mxu0 %v2411_v22  ;;  %v2882_v22 = vld [vmem:[%s5090_s1 + $0x5f0] sm:$0xf]  ;;  %v2755_v29 = vor.u32 %v3304_v14, %v2754_v12  ;;  %v3318_v37 = vld [vmem:[%s5090_s1 + $0x564] sm:$0xf0]  ;;  %v2874_v39 = vld [vmem:[%s5090_s1 + $0x5e0] sm:$0xf]  ;;  %v2683_v43 = vor.u32 %v3286_v32, %v2682_v31 }
  0x31   :  { %1681 = vmatpush.bf16.msrb.mxu1 %v2475_v23  ;;  %v3336_v23 = vld [vmem:[%s5090_s1 + $0x5f4] sm:$0xf0]  ;;  %v2738_v49 = vld [vmem:[%s5090_s1 + $0x4d0] sm:$0xf]  ;;  %v3282_v60 = vld [vmem:[%s5090_s1 + $0x444] sm:$0xf0] }
  0x32   :  { %1694 = vmatpush.bf16.msrb.mxu2 %v2539_v24  ;;  %v289_v24 = vunpack.c.l.b16 %v15_v9  ;;  %v3300_v51 = vld [vmem:[%s5090_s1 + $0x4d4] sm:$0xf0]  ;;  %v2866_v54 = vld [vmem:[%s5090_s1 + $0x5d0] sm:$0xf]  ;;  %v2730_v61 = vld [vmem:[%s5090_s1 + $0x4c0] sm:$0xf] }
  0x33   :  { %1707 = vmatpush.bf16.msrb.mxu3 %v2603_v28  ;;  %v290_v28 = vunpack.c.h.b16 %v15_v9  ;;  %v3316_v53 = vld [vmem:[%s5090_s1 + $0x554] sm:$0xf0]  ;;  %v2739_v57 = vor.u32 %v3300_v51, %v2738_v49  ;;  %v3314_v1 = vld [vmem:[%s5090_s1 + $0x544] sm:$0xf0]  ;;  %v2858_v2 = vld [vmem:[%s5090_s1 + $0x5c0] sm:$0xf] }
  0x34   :  { %1669 = vmatpush.bf16.msrb.mxu0 %v2403_v34  ;;  %v2883_v34 = vor.u32 %v3336_v23, %v2882_v22  ;;  %v3883_v41 = vpack.c.b16 %v289_v24, %v289_v24  ;;  %v3332_v55 = vld [vmem:[%s5090_s1 + $0x5d4] sm:$0xf0]  ;;  %v3330_v3 = vld [vmem:[%s5090_s1 + $0x5c4] sm:$0xf0]  ;;  %v2658_v9 = vld [vmem:[%s5090_s1 + $0x430] sm:$0xf] }
  0x35   :  { %1682 = vmatpush.bf16.msrb.mxu1 %v2467_v35  ;;  %v3302_v35 = vld [vmem:[%s5090_s1 + $0x4e4] sm:$0xf0]  ;;  %v3887_v44 = vpack.c.b16 %v290_v28, %v290_v28  ;;  %v2867_v62 = vor.u32 %v3332_v55, %v2866_v54  ;;  %v3280_v10 = vld [vmem:[%s5090_s1 + $0x434] sm:$0xf0]  ;;  %v2722_v11 = vld [vmem:[%s5090_s1 + $0x4b0] sm:$0xf]  ;;  %v2859_v12 = vor.u32 %v3330_v3, %v2858_v2 }
  0x36   :  { %1695 = vmatpush.bf16.msrb.mxu2 %v2531_v36  ;;  %v2810_v36 = vld [vmem:[%s5090_s1 + $0x560] sm:$0xf]  ;;  %v2747_v45 = vor.u32 %v3302_v35, %v2746_v33  ;;  %v2786_v14 = vld [vmem:[%s5090_s1 + $0x530] sm:$0xf]  ;;  %v3312_v15 = vld [vmem:[%s5090_s1 + $0x534] sm:$0xf0] }
  0x37   :  { %1708 = vmatpush.bf16.msrb.mxu3 %v2595_v40  ;;  %v3334_v40 = vld [vmem:[%s5090_s1 + $0x5e4] sm:$0xf0]  ;;  %v2850_v16 = vld [vmem:[%s5090_s1 + $0x5b0] sm:$0xf]  ;;  %v3328_v17 = vld [vmem:[%s5090_s1 + $0x5b4] sm:$0xf0]  ;;  %v2787_v22 = vor.u32 %v3312_v15, %v2786_v14 }
  0x38   :  { %1670 = vmatpush.bf16.msrb.mxu0 %v2395_v46  ;;  %v2811_v46 = vor.u32 %v3318_v37, %v2810_v36  ;;  %v2875_v50 = vor.u32 %v3334_v40, %v2874_v39  ;;  %v2650_v23 = vld [vmem:[%s5090_s1 + $0x420] sm:$0xf]  ;;  %v3278_v24 = vld [vmem:[%s5090_s1 + $0x424] sm:$0xf0]  ;;  %v2642_v35 = vld [vmem:[%s5090_s1 + $0x410] sm:$0xf] }
  0x39   :  { %1683 = vmatpush.bf16.msrb.mxu1 %v2459_v47  ;;  %v2674_v47 = vld [vmem:[%s5090_s1 + $0x450] sm:$0xf]  ;;  %v2714_v25 = vld [vmem:[%s5090_s1 + $0x4a0] sm:$0xf]  ;;  %v3326_v31 = vld [vmem:[%s5090_s1 + $0x5a4] sm:$0xf0]  ;;  %v2651_v32 = vor.u32 %v3278_v24, %v2650_v23 }
  0x3a   :  { %1696 = vmatpush.bf16.msrb.mxu2 %v2523_v48  ;;  %v3284_v48 = vld [vmem:[%s5090_s1 + $0x454] sm:$0xf0]  ;;  %v2778_v28 = vld [vmem:[%s5090_s1 + $0x520] sm:$0xf]  ;;  %v2706_v37 = vld [vmem:[%s5090_s1 + $0x490] sm:$0xf] }
  0x3b   :  { %1709 = vmatpush.bf16.msrb.mxu3 %v2587_v52  ;;  %v2802_v52 = vld [vmem:[%s5090_s1 + $0x550] sm:$0xf]  ;;  %v2675_v56 = vor.u32 %v3284_v48, %v2674_v47  ;;  %v3276_v36 = vld [vmem:[%s5090_s1 + $0x414] sm:$0xf0]  ;;  %v2634_v48 = vld [vmem:[%s5090_s1 + $0x400] sm:$0xf] }
  0x3c   :  { %1671 = vmatpush.bf16.msrb.mxu0 %v2387_v59  ;;  %v2803_v58 = vor.u32 %v3316_v53, %v2802_v52  ;;  %v2666_v59 = vld [vmem:[%s5090_s1 + $0x440] sm:$0xf]  ;;  %v3292_v40 = vld [vmem:[%s5090_s1 + $0x494] sm:$0xf0]  ;;  %v2643_v49 = vor.u32 %v3276_v36, %v2642_v35  ;;  %v3290_v52 = vld [vmem:[%s5090_s1 + $0x484] sm:$0xf0] }
  0x3d   :  { %1684 = vmatpush.bf16.msrb.mxu1 %v2451_v63  ;;  %v3298_v63 = vld [vmem:[%s5090_s1 + $0x4c4] sm:$0xf0]  ;;  %v3324_v47 = vld [vmem:[%s5090_s1 + $0x594] sm:$0xf0]  ;;  %v2698_v51 = vld [vmem:[%s5090_s1 + $0x480] sm:$0xf]  ;;  %v2707_v53 = vor.u32 %v3292_v40, %v2706_v37 }
  0x3e   :  { %1697 = vmatpush.bf16.msrb.mxu2 %v2515_v0  ;;  %v2794_v0 = vld [vmem:[%s5090_s1 + $0x540] sm:$0xf]  ;;  %v2731_v7 = vor.u32 %v3298_v63, %v2730_v61  ;;  %v18_v61 = vld [vmem:[%s5091_s0 + $0x28] sm:$0xff]  ;;  %v3352_v63 = vld [vmem:[%s5090_s1 + $0x674] sm:$0xf0] }
  0x3f   :  { %1710 = vmatpush.bf16.msrb.mxu3 %v2579_v5  ;;  %v2667_v5 = vor.u32 %v3282_v60, %v2666_v59  ;;  %v2795_v8 = vor.u32 %v3314_v1, %v2794_v0  ;;  %v2762_v55 = vld [vmem:[%s5090_s1 + $0x500] sm:$0xf]  ;;  %v3322_v60 = vld [vmem:[%s5090_s1 + $0x584] sm:$0xf0]  ;;  %v3010_v0 = vld [vmem:[%s5090_s1 + $0x6f0] sm:$0xf] }
  0x40   :  { %1672 = vmatpush.bf16.msrb.mxu0 %v2379_v13  ;;  %v3296_v13 = vld [vmem:[%s5090_s1 + $0x4b4] sm:$0xf0]  ;;  %v2826_v59 = vld [vmem:[%s5090_s1 + $0x580] sm:$0xf]  ;;  %v3074_v3 = vld [vmem:[%s5090_s1 + $0x770] sm:$0xf] }
  0x41   :  { %1685 = vmatpush.bf16.msrb.mxu1 %v2443_v18  ;;  %v2659_v18 = vor.u32 %v3280_v10, %v2658_v9  ;;  %v3368_v2 = vld [vmem:[%s5090_s1 + $0x6f4] sm:$0xf0]  ;;  %v3138_v10 = vld [vmem:[%s5090_s1 + $0x7f0] sm:$0xf]  ;;  %v2827_v14 = vor.u32 %v3322_v60, %v2826_v59  ;;  %v3002_v23 = vld [vmem:[%s5090_s1 + $0x6e0] sm:$0xf] }
  0x42   :  { %1698 = vmatpush.bf16.msrb.mxu2 %v2507_v19  ;;  %v2723_v19 = vor.u32 %v3296_v13, %v2722_v11  ;;  %v3400_v11 = vld [vmem:[%s5090_s1 + $0x7f4] sm:$0xf0]  ;;  %v2930_v37 = vld [vmem:[%s5090_s1 + $0x650] sm:$0xf]  ;;  %v3378_v59 = vld [vmem:[%s5090_s1 + $0x744] sm:$0xf0] }
  0x43   :  { %1711 = vmatpush.bf16.msrb.mxu3 %v2571_v26  ;;  %1673 = vmatmul.bf16.vlgmr.msrb.gmra.mxu0 %v3883_v41  ;;  %v2851_v26 = vor.u32 %v3328_v17, %v2850_v16  ;;  %v296_v16 = vunpack.c.h.b16 %v18_v61  ;;  %v3011_v17 = vor.u32 %v3368_v2, %v3010_v0  ;;  %v3139_v24 = vor.u32 %v3400_v11, %v3138_v10  ;;  %v2994_v40 = vld [vmem:[%s5090_s1 + $0x6d0] sm:$0xf]  ;;  %v3114_v60 = vld [vmem:[%s5090_s1 + $0x7c0] sm:$0xf]  ;;  %v3344_v2 = vld [vmem:[%s5090_s1 + $0x634] sm:$0xf0] }
  0x44   :  { %1717 = vmatpush.bf16.msra.mxu0 %v2691_v27  ;;  %1686 = vmatmul.bf16.vlgmr.msrb.gmra.mxu1 %v3887_v44  ;;  %v3294_v27 = vld [vmem:[%s5090_s1 + $0x4a4] sm:$0xf0]  ;;  %v3106_v10 = vld [vmem:[%s5090_s1 + $0x7b0] sm:$0xf]  ;;  %v3392_v11 = vld [vmem:[%s5090_s1 + $0x7b4] sm:$0xf0] }
  0x45   :  { %1730 = vmatpush.bf16.msra.mxu1 %v2755_v29  ;;  %1699 = vmatmul.bf16.vlgmr.msrb.gmra.mxu2 %v3875_v38  ;;  %v3310_v29 = vld [vmem:[%s5090_s1 + $0x524] sm:$0xf0]  ;;  %v2715_v33 = vor.u32 %v3294_v27, %v2714_v25  ;;  %v3066_v27 = vld [vmem:[%s5090_s1 + $0x760] sm:$0xf] }
  0x46   :  { %1743 = vmatpush.bf16.msra.mxu2 %v2819_v30  ;;  %1712 = vmatmul.bf16.vlgmr.msrb.gmra.mxu3 %v3885_v42  ;;  %v2842_v30 = vld [vmem:[%s5090_s1 + $0x5a0] sm:$0xf] }
  0x47   :  { %1756 = vmatpush.bf16.msra.mxu3 %v2883_v34  ;;  %v2779_v34 = vor.u32 %v3310_v29, %v2778_v28  ;;  %v2843_v39 = vor.u32 %v3326_v31, %v2842_v30  ;;  %v3382_v28 = vld [vmem:[%s5090_s1 + $0x764] sm:$0xf0]  ;;  %v3130_v31 = vld [vmem:[%s5090_s1 + $0x7e0] sm:$0xf] }
  0x48   :  { %1718 = vmatpush.bf16.msra.mxu0 %v2683_v43  ;;  %v2770_v43 = vld [vmem:[%s5090_s1 + $0x510] sm:$0xf]  ;;  %v3067_v36 = vor.u32 %v3382_v28, %v3066_v27 }
  0x49   :  { %1731 = vmatpush.bf16.msra.mxu1 %v2747_v45  ;;  %v3308_v45 = vld [vmem:[%s5090_s1 + $0x514] sm:$0xf0] }
  0x4a   :  { %1744 = vmatpush.bf16.msra.mxu2 %v2811_v46  ;;  %v2834_v46 = vld [vmem:[%s5090_s1 + $0x590] sm:$0xf]  ;;  %v2771_v54 = vor.u32 %v3308_v45, %v2770_v43  ;;  %v3364_v45 = vld [vmem:[%s5090_s1 + $0x6d4] sm:$0xf0] }
  0x4b   :  { %1757 = vmatpush.bf16.msra.mxu3 %v2875_v50  ;;  %v3274_v50 = vld [vmem:[%s5090_s1 + $0x404] sm:$0xf0] }
  0x4c   :  { %1719 = vmatpush.bf16.msra.mxu0 %v2675_v56  ;;  %v3306_v56 = vld [vmem:[%s5090_s1 + $0x504] sm:$0xf0]  ;;  %v2635_v1 = vor.u32 %v3274_v50, %v2634_v48  ;;  %v3122_v48 = vld [vmem:[%s5090_s1 + $0x7d0] sm:$0xf] }
  0x4d   :  { %1732 = vmatpush.bf16.msra.mxu1 %v2739_v57  ;;  %v17_v57 = vld [vmem:[%s5091_s0 + $0x20] sm:$0xff]  ;;  %v2763_v9 = vor.u32 %v3306_v56, %v2762_v55 }
  0x4e   :  { %1745 = vmatpush.bf16.msra.mxu2 %v2803_v58  ;;  %v2835_v58 = vor.u32 %v3324_v47, %v2834_v46  ;;  %v294_v13 = vunpack.c.h.b16 %v17_v57  ;;  %v3058_v46 = vld [vmem:[%s5090_s1 + $0x750] sm:$0xf]  ;;  %v3380_v47 = vld [vmem:[%s5090_s1 + $0x754] sm:$0xf0]  ;;  %v2986_v55 = vld [vmem:[%s5090_s1 + $0x6c0] sm:$0xf] }
  0x4f   :  { %1758 = vmatpush.bf16.msra.mxu3 %v2867_v62  ;;  %v2946_v62 = vld [vmem:[%s5090_s1 + $0x670] sm:$0xf] }
  0x50   :  { %1720 = vmatpush.bf16.msra.mxu0 %v2667_v5  ;;  %v3384_v5 = vld [vmem:[%s5090_s1 + $0x774] sm:$0xf0]  ;;  %v2947_v15 = vor.u32 %v3352_v63, %v2946_v62  ;;  %v4089_v30 = vpack.c.b16 %v294_v13, %v294_v13 }
  0x51   :  { %1733 = vmatpush.bf16.msra.mxu1 %v2731_v7  ;;  %v293_v7 = vunpack.c.l.b16 %v17_v57  ;;  %v3362_v57 = vld [vmem:[%s5090_s1 + $0x6c4] sm:$0xf0] }
  0x52   :  { %1746 = vmatpush.bf16.msra.mxu2 %v2795_v8  ;;  %v2699_v8 = vor.u32 %v3290_v52, %v2698_v51  ;;  %v2995_v51 = vor.u32 %v3364_v45, %v2994_v40  ;;  %v3059_v52 = vor.u32 %v3380_v47, %v3058_v46  ;;  %v2987_v63 = vor.u32 %v3362_v57, %v2986_v55  ;;  %v3372_v40 = vld [vmem:[%s5090_s1 + $0x714] sm:$0xf0]  ;;  %v2890_v46 = vld [vmem:[%s5090_s1 + $0x600] sm:$0xf]  ;;  %v19_v55 = vld [vmem:[%s5091_s0 + $0x30] sm:$0xff] }
  0x53   :  { %1759 = vmatpush.bf16.msra.mxu3 %v2859_v12  ;;  %v295_v12 = vunpack.c.l.b16 %v18_v61  ;;  %v4076_v25 = vpack.c.b16 %v293_v7, %v293_v7  ;;  %v3394_v61 = vld [vmem:[%s5090_s1 + $0x7c4] sm:$0xf0]  ;;  %v3360_v7 = vld [vmem:[%s5090_s1 + $0x6b4] sm:$0xf0]  ;;  %v3082_v57 = vld [vmem:[%s5090_s1 + $0x780] sm:$0xf] }
  0x54   :  { %1721 = vmatpush.bf16.msra.mxu0 %v2659_v18  ;;  %v3075_v18 = vor.u32 %v3384_v5, %v3074_v3  ;;  %v2978_v3 = vld [vmem:[%s5090_s1 + $0x6b0] sm:$0xf]  ;;  %v3115_v5 = vor.u32 %v3394_v61, %v3114_v60  ;;  %v3388_v45 = vld [vmem:[%s5090_s1 + $0x794] sm:$0xf0]  ;;  %v3159_v60 = vld [vmem:[%s5090_s1 + $0x74] sm:$0xf] }
  0x55   :  { %1734 = vmatpush.bf16.msra.mxu1 %v2723_v19  ;;  %v2938_v19 = vld [vmem:[%s5090_s1 + $0x660] sm:$0xf]  ;;  %v4087_v29 = vpack.c.b16 %v295_v12, %v295_v12  ;;  %v2979_v13 = vor.u32 %v3360_v7, %v2978_v3  ;;  %v2180_v61 = vld [vmem:[%s5090_s1 + $0x78] sm:$0xf0]  ;;  %v297_v3 = vunpack.c.l.b16 %v19_v55 }
  0x56   :  { %1747 = vmatpush.bf16.msra.mxu2 %v2787_v22  ;;  %v3350_v22 = vld [vmem:[%s5090_s1 + $0x664] sm:$0xf0] }
  0x57   :  { %1760 = vmatpush.bf16.msra.mxu3 %v2851_v26  ;;  %v3366_v26 = vld [vmem:[%s5090_s1 + $0x6e4] sm:$0xf0] }
  0x58   :  { %1722 = vmatpush.bf16.msra.mxu0 %v2651_v32  ;;  %v3398_v32 = vld [vmem:[%s5090_s1 + $0x7e4] sm:$0xf0]  ;;  %v3003_v35 = vor.u32 %v3366_v26, %v3002_v23 }
  0x59   :  { %1735 = vmatpush.bf16.msra.mxu1 %v2715_v33  ;;  %v4097_v33 = vpack.c.b16 %v296_v16, %v296_v16  ;;  %v3131_v43 = vor.u32 %v3398_v32, %v3130_v31  ;;  %v3342_v16 = vld [vmem:[%s5090_s1 + $0x624] sm:$0xf0]  ;;  %v2898_v32 = vld [vmem:[%s5090_s1 + $0x610] sm:$0xf] }
  0x5a   :  { %1748 = vmatpush.bf16.msra.mxu2 %v2779_v34  ;;  %v2939_v34 = vor.u32 %v3350_v22, %v2938_v19  ;;  %v3358_v19 = vld [vmem:[%s5090_s1 + $0x6a4] sm:$0xf0]  ;;  %v3034_v22 = vld [vmem:[%s5090_s1 + $0x720] sm:$0xf] }
  0x5b   :  { %1761 = vmatpush.bf16.msra.mxu3 %v2843_v39  ;;  %v3348_v39 = vld [vmem:[%s5090_s1 + $0x654] sm:$0xf0]  ;;  %v3374_v23 = vld [vmem:[%s5090_s1 + $0x724] sm:$0xf0] }
  0x5c   :  { %1723 = vmatpush.bf16.msra.mxu0 %v2643_v49  ;;  %v3396_v49 = vld [vmem:[%s5090_s1 + $0x7d4] sm:$0xf0]  ;;  %v2931_v50 = vor.u32 %v3348_v39, %v2930_v37  ;;  %v3390_v26 = vld [vmem:[%s5090_s1 + $0x7a4] sm:$0xf0]  ;;  %v3035_v31 = vor.u32 %v3374_v23, %v3034_v22  ;;  %v3026_v39 = vld [vmem:[%s5090_s1 + $0x710] sm:$0xf]  ;;  %v4286_v23 = vpack.c.b16 %v297_v3, %v297_v3 }
  0x5d   :  { %1736 = vmatpush.bf16.msra.mxu1 %v2707_v53  ;;  %v2922_v53 = vld [vmem:[%s5090_s1 + $0x640] sm:$0xf]  ;;  %v3123_v56 = vor.u32 %v3396_v49, %v3122_v48  ;;  %v3356_v37 = vld [vmem:[%s5090_s1 + $0x694] sm:$0xf0]  ;;  %v3338_v48 = vld [vmem:[%s5090_s1 + $0x604] sm:$0xf0] }
  0x5e   :  { %1749 = vmatpush.bf16.msra.mxu2 %v2771_v54  ;;  %v3346_v54 = vld [vmem:[%s5090_s1 + $0x644] sm:$0xf0]  ;;  %v2954_v49 = vld [vmem:[%s5090_s1 + $0x680] sm:$0xf]  ;;  %v3151_v3 = vld [vmem:[%s5090_s1 + $0x34] sm:$0xf] }
  0x5f   :  { %1762 = vmatpush.bf16.msra.mxu3 %v2835_v58  ;;  %v3050_v58 = vld [vmem:[%s5090_s1 + $0x740] sm:$0xf]  ;;  %v2923_v62 = vor.u32 %v3346_v54, %v2922_v53  ;;  %v3370_v54 = vld [vmem:[%s5090_s1 + $0x704] sm:$0xf0] }
  0x60   :  { %1724 = vmatpush.bf16.msra.mxu0 %v2635_v1  ;;  %v3051_v0 = vor.u32 %v3378_v59, %v3050_v58  ;;  %v2914_v1 = vld [vmem:[%s5090_s1 + $0x630] sm:$0xf]  ;;  %v3018_v53 = vld [vmem:[%s5090_s1 + $0x700] sm:$0xf]  ;;  %v3386_v58 = vld [vmem:[%s5090_s1 + $0x784] sm:$0xf0] }
  0x61   :  { %1737 = vmatpush.bf16.msra.mxu1 %v2699_v8  ;;  %v3042_v8 = vld [vmem:[%s5090_s1 + $0x730] sm:$0xf]  ;;  %v2915_v12 = vor.u32 %v3344_v2, %v2914_v1  ;;  %v20_v59 = vld [vmem:[%s5091_s0 + $0x38] sm:$0xff]  ;;  %v3191_v1 = vld [vmem:[%s5090_s1 + $0x174] sm:$0xf]  ;;  %v3019_v7 = vor.u32 %v3370_v54, %v3018_v53 }
  0x62   :  { %1750 = vmatpush.bf16.msra.mxu2 %v2763_v9  ;;  %v3376_v9 = vld [vmem:[%s5090_s1 + $0x734] sm:$0xf0]  ;;  %v2308_v2 = vld [vmem:[%s5090_s1 + $0x178] sm:$0xf0] }
  0x63   :  { %1763 = vmatpush.bf16.msra.mxu3 %v2827_v14  ;;  %1725 = vmatmul.bf16.vlgmr.msra.gmra.mxu0 %v4076_v25  ;;  %v3043_v14 = vor.u32 %v3376_v9, %v3042_v8  ;;  %v3207_v8 = vld [vmem:[%s5090_s1 + $0x1f4] sm:$0xf]  ;;  %v2372_v9 = vld [vmem:[%s5090_s1 + $0x1f8] sm:$0xf0] }
  0x64   :  { %1769 = vmatpush.bf16.msrb.mxu0 %v2947_v15  ;;  %1738 = vmatmul.bf16.vlgmr.msra.gmra.mxu1 %v4089_v30  ;;  %v2906_v15 = vld [vmem:[%s5090_s1 + $0x620] sm:$0xf]  ;;  %v2375_v22 = vor.u32 %v3207_v8, %v2372_v9  ;;  %v2212_v9 = vld [vmem:[%s5090_s1 + $0xb8] sm:$0xf0] }
  0x65   :  { %1782 = vmatpush.bf16.msrb.mxu1 %v3011_v17  ;;  %1751 = vmatmul.bf16.vlgmr.msra.gmra.mxu2 %v4087_v29  ;;  %v2970_v17 = vld [vmem:[%s5090_s1 + $0x6a0] sm:$0xf]  ;;  %v2907_v27 = vor.u32 %v3342_v16, %v2906_v15  ;;  %v2311_v16 = vor.u32 %v3191_v1, %v2308_v2 }
  0x66   :  { %1795 = vmatpush.bf16.msrb.mxu2 %v3075_v18  ;;  %1764 = vmatmul.bf16.vlgmr.msra.gmra.mxu3 %v4097_v33  ;;  %v3107_v18 = vor.u32 %v3392_v11, %v3106_v10  ;;  %v2971_v28 = vor.u32 %v3358_v19, %v2970_v17  ;;  %v299_v10 = vunpack.c.l.b16 %v20_v59  ;;  %v298_v11 = vunpack.c.h.b16 %v19_v55  ;;  %v3157_v17 = vld [vmem:[%s5090_s1 + $0x64] sm:$0xf] }
  0x67   :  { %1808 = vmatpush.bf16.msrb.mxu3 %v3139_v24  ;;  %v3098_v24 = vld [vmem:[%s5090_s1 + $0x7a0] sm:$0xf]  ;;  %v3173_v19 = vld [vmem:[%s5090_s1 + $0xe4] sm:$0xf] }
  0x68   :  { %1770 = vmatpush.bf16.msrb.mxu0 %v2939_v34  ;;  %v3340_v34 = vld [vmem:[%s5090_s1 + $0x614] sm:$0xf0]  ;;  %v3153_v55 = vld [vmem:[%s5090_s1 + $0x44] sm:$0xf] }
  0x69   :  { %1783 = vmatpush.bf16.msrb.mxu1 %v3003_v35  ;;  %v2962_v35 = vld [vmem:[%s5090_s1 + $0x690] sm:$0xf]  ;;  %v2899_v47 = vor.u32 %v3340_v34, %v2898_v32  ;;  %v3205_v32 = vld [vmem:[%s5090_s1 + $0x1e4] sm:$0xf]  ;;  %v2364_v34 = vld [vmem:[%s5090_s1 + $0x1e8] sm:$0xf0] }
  0x6a   :  { %1796 = vmatpush.bf16.msrb.mxu2 %v3067_v36  ;;  %v3099_v36 = vor.u32 %v3390_v26, %v3098_v24  ;;  %v2236_v24 = vld [vmem:[%s5090_s1 + $0xe8] sm:$0xf0]  ;;  %v3189_v26 = vld [vmem:[%s5090_s1 + $0x164] sm:$0xf] }
  0x6b   :  { %1809 = vmatpush.bf16.msrb.mxu3 %v3131_v43  ;;  %v3090_v43 = vld [vmem:[%s5090_s1 + $0x790] sm:$0xf] }
  0x6c   :  { %1771 = vmatpush.bf16.msrb.mxu0 %v2931_v50  ;;  %v3354_v50 = vld [vmem:[%s5090_s1 + $0x684] sm:$0xf0] }
  0x6d   :  { %1784 = vmatpush.bf16.msrb.mxu1 %v2995_v51  ;;  %v2963_v51 = vor.u32 %v3356_v37, %v2962_v35  ;;  %v2239_v37 = vor.u32 %v3173_v19, %v2236_v24  ;;  %v3165_v19 = vld [vmem:[%s5090_s1 + $0xa4] sm:$0xf]  ;;  %v2204_v24 = vld [vmem:[%s5090_s1 + $0xa8] sm:$0xf0] }
  0x6e   :  { %1797 = vmatpush.bf16.msrb.mxu2 %v3059_v52  ;;  %v3027_v52 = vor.u32 %v3372_v40, %v3026_v39  ;;  %v3155_v40 = vld [vmem:[%s5090_s1 + $0x54] sm:$0xf] }
  0x6f   :  { %1810 = vmatpush.bf16.msrb.mxu3 %v3123_v56  ;;  %v3091_v56 = vor.u32 %v3388_v45, %v3090_v43  ;;  %v2164_v43 = vld [vmem:[%s5090_s1 + $0x58] sm:$0xf0]  ;;  %v3171_v45 = vld [vmem:[%s5090_s1 + $0xd4] sm:$0xf] }
  0x70   :  { %1772 = vmatpush.bf16.msrb.mxu0 %v2923_v62  ;;  %v3175_v62 = vld [vmem:[%s5090_s1 + $0xf4] sm:$0xf] }
  0x71   :  { %1785 = vmatpush.bf16.msrb.mxu1 %v2987_v63  ;;  %v2891_v63 = vor.u32 %v3338_v48, %v2890_v46  ;;  %v2367_v46 = vor.u32 %v3205_v32, %v2364_v34  ;;  %v3187_v48 = vld [vmem:[%s5090_s1 + $0x154] sm:$0xf]  ;;  %v3197_v32 = vld [vmem:[%s5090_s1 + $0x1a4] sm:$0xf]  ;;  %v2332_v34 = vld [vmem:[%s5090_s1 + $0x1a8] sm:$0xf0] }
  0x72   :  { %1798 = vmatpush.bf16.msrb.mxu2 %v3051_v0  ;;  %v2244_v0 = vld [vmem:[%s5090_s1 + $0xf8] sm:$0xf0] }
  0x73   :  { %1811 = vmatpush.bf16.msrb.mxu3 %v3115_v5  ;;  %v2955_v5 = vor.u32 %v3354_v50, %v2954_v49  ;;  %v2247_v15 = vor.u32 %v3175_v62, %v2244_v0  ;;  %v2292_v49 = vld [vmem:[%s5090_s1 + $0x158] sm:$0xf0]  ;;  %v3203_v50 = vld [vmem:[%s5090_s1 + $0x1d4] sm:$0xf]  ;;  %v3201_v62 = vld [vmem:[%s5090_s1 + $0x1c4] sm:$0xf] }
  0x74   :  { %1773 = vmatpush.bf16.msrb.mxu0 %v2915_v12  ;;  %v3083_v12 = vor.u32 %v3386_v58, %v3082_v57  ;;  %v2295_v54 = vor.u32 %v3187_v48, %v2292_v49  ;;  %v3169_v57 = vld [vmem:[%s5090_s1 + $0xc4] sm:$0xf]  ;;  %v3179_v48 = vld [vmem:[%s5090_s1 + $0x114] sm:$0xf]  ;;  %v2260_v49 = vld [vmem:[%s5090_s1 + $0x118] sm:$0xf0] }
  0x75   :  { %1786 = vmatpush.bf16.msrb.mxu1 %v2979_v13  ;;  %v2183_v13 = vor.u32 %v3159_v60, %v2180_v61  ;;  %v3185_v60 = vld [vmem:[%s5090_s1 + $0x144] sm:$0xf]  ;;  %v2284_v61 = vld [vmem:[%s5090_s1 + $0x148] sm:$0xf0] }
  0x76   :  { %1799 = vmatpush.bf16.msrb.mxu2 %v3043_v14  ;;  %v300_v14 = vunpack.c.h.b16 %v20_v59  ;;  %v2220_v59 = vld [vmem:[%s5090_s1 + $0xc8] sm:$0xf0]  ;;  %v2287_v2 = vor.u32 %v3185_v60, %v2284_v61 }
  0x77   :  { %1812 = vmatpush.bf16.msrb.mxu3 %v3107_v18  ;;  %v2172_v18 = vld [vmem:[%s5090_s1 + $0x68] sm:$0xf0]  ;;  %v2223_v1 = vor.u32 %v3169_v57, %v2220_v59  ;;  %v3161_v57 = vld [vmem:[%s5090_s1 + $0x84] sm:$0xf] }
  0x78   :  { %1774 = vmatpush.bf16.msrb.mxu0 %v2907_v27  ;;  %v2300_v27 = vld [vmem:[%s5090_s1 + $0x168] sm:$0xf0]  ;;  %v4307_v35 = vpack.c.b16 %v300_v14, %v300_v14  ;;  %v3177_v59 = vld [vmem:[%s5090_s1 + $0x104] sm:$0xf] }
  0x79   :  { %1787 = vmatpush.bf16.msrb.mxu1 %v2971_v28  ;;  %v4297_v28 = vpack.c.b16 %v299_v10, %v299_v10  ;;  %v2303_v39 = vor.u32 %v3189_v26, %v2300_v27  ;;  %v3183_v10 = vld [vmem:[%s5090_s1 + $0x134] sm:$0xf]  ;;  %v3181_v26 = vld [vmem:[%s5090_s1 + $0x124] sm:$0xf]  ;;  %v2268_v27 = vld [vmem:[%s5090_s1 + $0x128] sm:$0xf0] }
  0x7a   :  { %1800 = vmatpush.bf16.msrb.mxu2 %v3035_v31  ;;  %v4299_v31 = vpack.c.b16 %v298_v11, %v298_v11  ;;  %v2276_v11 = vld [vmem:[%s5090_s1 + $0x138] sm:$0xf0]  ;;  %v2252_v61 = vld [vmem:[%s5090_s1 + $0x108] sm:$0xf0] }
  0x7b   :  { %1813 = vmatpush.bf16.msrb.mxu3 %v3099_v36  ;;  %v2175_v36 = vor.u32 %v3157_v17, %v2172_v18  ;;  %v3149_v17 = vld [vmem:[%s5090_s1 + $0x24] sm:$0xf]  ;;  %v2140_v18 = vld [vmem:[%s5090_s1 + $0x28] sm:$0xf0] }
  0x7c   :  { %1775 = vmatpush.bf16.msrb.mxu0 %v2899_v47  ;;  %v2228_v47 = vld [vmem:[%s5090_s1 + $0xd8] sm:$0xf0] }
  0x7d   :  { %1788 = vmatpush.bf16.msrb.mxu1 %v2963_v51  ;;  %v2356_v51 = vld [vmem:[%s5090_s1 + $0x1d8] sm:$0xf0]  ;;  %v2231_v53 = vor.u32 %v3171_v45, %v2228_v47  ;;  %v3163_v45 = vld [vmem:[%s5090_s1 + $0x94] sm:$0xf] }
  0x7e   :  { %1801 = vmatpush.bf16.msrb.mxu2 %v3027_v52  ;;  %v2167_v52 = vor.u32 %v3155_v40, %v2164_v43  ;;  %v2359_v58 = vor.u32 %v3203_v50, %v2356_v51  ;;  %v3147_v40 = vld [vmem:[%s5090_s1 + $0x14] sm:$0xf]  ;;  %v2132_v43 = vld [vmem:[%s5090_s1 + $0x18] sm:$0xf0] }
  0x7f   :  { %1814 = vmatpush.bf16.msrb.mxu3 %v3091_v56  ;;  %v2156_v56 = vld [vmem:[%s5090_s1 + $0x48] sm:$0xf0]  ;;  %v2196_v47 = vld [vmem:[%s5090_s1 + $0x98] sm:$0xf0]  ;;  %v3195_v50 = vld [vmem:[%s5090_s1 + $0x194] sm:$0xf] }
  0x80   :  { %1776 = vmatpush.bf16.msrb.mxu0 %v2891_v63  ;;  %v2348_v63 = vld [vmem:[%s5090_s1 + $0x1c8] sm:$0xf0]  ;;  %v2159_v0 = vor.u32 %v3153_v55, %v2156_v56  ;;  %v2324_v51 = vld [vmem:[%s5090_s1 + $0x198] sm:$0xf0]  ;;  %v2199_v55 = vor.u32 %v3163_v45, %v2196_v47  ;;  %v2263_v56 = vor.u32 %v3179_v48, %v2260_v49  ;;  %v3235_v45 = vld [vmem:[%s5090_s1 + $0x2d4] sm:$0xf] }
  0x81   :  { %1789 = vmatpush.bf16.msrb.mxu1 %v2955_v5  ;;  %v2148_v5 = vld [vmem:[%s5090_s1 + $0x38] sm:$0xf0]  ;;  %v2351_v8 = vor.u32 %v3201_v62, %v2348_v63  ;;  %v2327_v60 = vor.u32 %v3195_v50, %v2324_v51  ;;  %v3193_v62 = vld [vmem:[%s5090_s1 + $0x184] sm:$0xf]  ;;  %v2316_v63 = vld [vmem:[%s5090_s1 + $0x188] sm:$0xf0] }
  0x82   :  { %1802 = vmatpush.bf16.msrb.mxu2 %v3019_v7  ;;  %v3167_v7 = vld [vmem:[%s5090_s1 + $0xb4] sm:$0xf]  ;;  %v2151_v14 = vor.u32 %v3151_v3, %v2148_v5  ;;  %v2500_v5 = vld [vmem:[%s5090_s1 + $0x2f8] sm:$0xf0] }
  0x83   :  { %1815 = vmatpush.bf16.msrb.mxu3 %v3083_v12  ;;  %1777 = vmatmul.bf16.vlgmr.msrb.gmra.mxu0 %v4286_v23  ;;  %v3199_v12 = vld [vmem:[%s5090_s1 + $0x1b4] sm:$0xf]  ;;  %v2484_v47 = vld [vmem:[%s5090_s1 + $0x2d8] sm:$0xf0] }
  0x84   :  { %1821 = vmatpush.bf16.msra.mxu0 %v2183_v13  ;;  %1790 = vmatmul.bf16.vlgmr.msrb.gmra.mxu1 %v4299_v31  ;;  %v2340_v13 = vld [vmem:[%s5090_s1 + $0x1b8] sm:$0xf0]  ;;  %v3251_v48 = vld [vmem:[%s5090_s1 + $0x354] sm:$0xf] }
  0x85   :  { %1834 = vmatpush.bf16.msra.mxu1 %v2247_v15  ;;  %1803 = vmatmul.bf16.vlgmr.msrb.gmra.mxu2 %v4297_v28  ;;  %v2215_v15 = vor.u32 %v3167_v7, %v2212_v9  ;;  %v3255_v7 = vld [vmem:[%s5090_s1 + $0x374] sm:$0xf]  ;;  %v2548_v49 = vld [vmem:[%s5090_s1 + $0x358] sm:$0xf0] }
  0x86   :  { %1847 = vmatpush.bf16.msra.mxu2 %v2311_v16  ;;  %1816 = vmatmul.bf16.vlgmr.msrb.gmra.mxu3 %v4307_v35  ;;  %v2279_v16 = vor.u32 %v3183_v10, %v2276_v11  ;;  %v2255_v10 = vor.u32 %v3177_v59, %v2252_v61  ;;  %v3271_v11 = vld [vmem:[%s5090_s1 + $0x3f4] sm:$0xf]  ;;  %v2612_v51 = vld [vmem:[%s5090_s1 + $0x3d8] sm:$0xf0]  ;;  %v2604_v59 = vld [vmem:[%s5090_s1 + $0x3c8] sm:$0xf0] }
  0x87   :  { %1860 = vmatpush.bf16.msra.mxu3 %v2375_v22  ;;  %v2343_v22 = vor.u32 %v3199_v12, %v2340_v13  ;;  %v2628_v12 = vld [vmem:[%s5090_s1 + $0x3f8] sm:$0xf0]  ;;  %v2319_v13 = vor.u32 %v3193_v62, %v2316_v63  ;;  %v3267_v50 = vld [vmem:[%s5090_s1 + $0x3d4] sm:$0xf] }
  0x88   :  { %1822 = vmatpush.bf16.msra.mxu0 %v2175_v36  ;;  %v2143_v36 = vor.u32 %v3149_v17, %v2140_v18  ;;  %v3221_v17 = vld [vmem:[%s5090_s1 + $0x264] sm:$0xf]  ;;  %v2428_v18 = vld [vmem:[%s5090_s1 + $0x268] sm:$0xf0]  ;;  %v3215_v63 = vld [vmem:[%s5090_s1 + $0x234] sm:$0xf] }
  0x89   :  { %1835 = vmatpush.bf16.msra.mxu1 %v2239_v37  ;;  %v2207_v37 = vor.u32 %v3165_v19, %v2204_v24  ;;  %v3237_v19 = vld [vmem:[%s5090_s1 + $0x2e4] sm:$0xf]  ;;  %v2492_v24 = vld [vmem:[%s5090_s1 + $0x2e8] sm:$0xf0] }
  0x8a   :  { %1848 = vmatpush.bf16.msra.mxu2 %v2303_v39  ;;  %v2271_v39 = vor.u32 %v3181_v26, %v2268_v27  ;;  %v3253_v26 = vld [vmem:[%s5090_s1 + $0x364] sm:$0xf]  ;;  %v2556_v27 = vld [vmem:[%s5090_s1 + $0x368] sm:$0xf0] }
  0x8b   :  { %1861 = vmatpush.bf16.msra.mxu3 %v2367_v46  ;;  %v2335_v46 = vor.u32 %v3197_v32, %v2332_v34  ;;  %v3269_v32 = vld [vmem:[%s5090_s1 + $0x3e4] sm:$0xf]  ;;  %v2620_v34 = vld [vmem:[%s5090_s1 + $0x3e8] sm:$0xf0] }
  0x8c   :  { %1823 = vmatpush.bf16.msra.mxu0 %v2167_v52  ;;  %v2135_v52 = vor.u32 %v3147_v40, %v2132_v43  ;;  %v3219_v40 = vld [vmem:[%s5090_s1 + $0x254] sm:$0xf]  ;;  %v2420_v43 = vld [vmem:[%s5090_s1 + $0x258] sm:$0xf0] }
  0x8d   :  { %1836 = vmatpush.bf16.msra.mxu1 %v2231_v53  ;;  %v3145_v53 = vld [vmem:[%s5090_s1 + $0x4] sm:$0xf] }
  0x8e   :  { %1849 = vmatpush.bf16.msra.mxu2 %v2295_v54  ;;  %v2124_v54 = vld [vmem:[%s5090_s1 + $0x8] sm:$0xf0] }
  0x8f   :  { %1862 = vmatpush.bf16.msra.mxu3 %v2359_v58  ;;  %v2188_v58 = vld [vmem:[%s5090_s1 + $0x88] sm:$0xf0]  ;;  %v2127_v3 = vor.u32 %v3145_v53, %v2124_v54  ;;  %v2487_v53 = vor.u32 %v3235_v45, %v2484_v47  ;;  %v3217_v54 = vld [vmem:[%s5090_s1 + $0x244] sm:$0xf]  ;;  %v2452_v47 = vld [vmem:[%s5090_s1 + $0x298] sm:$0xf0] }
  0x90   :  { %1824 = vmatpush.bf16.msra.mxu0 %v2159_v0  ;;  %v3223_v0 = vld [vmem:[%s5090_s1 + $0x274] sm:$0xf]  ;;  %v2191_v9 = vor.u32 %v3161_v57, %v2188_v58  ;;  %v2540_v57 = vld [vmem:[%s5090_s1 + $0x348] sm:$0xf0]  ;;  %v3265_v58 = vld [vmem:[%s5090_s1 + $0x3c4] sm:$0xf] }
  0x91   :  { %1837 = vmatpush.bf16.msra.mxu1 %v2223_v1  ;;  %v2436_v1 = vld [vmem:[%s5090_s1 + $0x278] sm:$0xf0] }
  0x92   :  { %1850 = vmatpush.bf16.msra.mxu2 %v2287_v2  ;;  %v3239_v2 = vld [vmem:[%s5090_s1 + $0x2f4] sm:$0xf] }
  0x93   :  { %1863 = vmatpush.bf16.msra.mxu3 %v2351_v8  ;;  %v2564_v8 = vld [vmem:[%s5090_s1 + $0x378] sm:$0xf0] }
  0x94   :  { %1825 = vmatpush.bf16.msra.mxu0 %v2151_v14  ;;  %v2439_v14 = vor.u32 %v3223_v0, %v2436_v1  ;;  %v2404_v0 = vld [vmem:[%s5090_s1 + $0x238] sm:$0xf0]  ;;  %v3231_v1 = vld [vmem:[%s5090_s1 + $0x2b4] sm:$0xf] }
  0x95   :  { %1838 = vmatpush.bf16.msra.mxu1 %v2215_v15  ;;  %v2503_v15 = vor.u32 %v3239_v2, %v2500_v5  ;;  %v2607_v2 = vor.u32 %v3265_v58, %v2604_v59  ;;  %v3247_v5 = vld [vmem:[%s5090_s1 + $0x334] sm:$0xf] }
  0x96   :  { %1851 = vmatpush.bf16.msra.mxu2 %v2279_v16  ;;  %v2567_v16 = vor.u32 %v3255_v7, %v2564_v8  ;;  %v2532_v7 = vld [vmem:[%s5090_s1 + $0x338] sm:$0xf0]  ;;  %v3263_v8 = vld [vmem:[%s5090_s1 + $0x3b4] sm:$0xf] }
  0x97   :  { %1864 = vmatpush.bf16.msra.mxu3 %v2343_v22  ;;  %v2631_v22 = vor.u32 %v3271_v11, %v2628_v12  ;;  %v2535_v12 = vor.u32 %v3247_v5, %v2532_v7  ;;  %v2756_v5 = vld [vmem:[%s5090_s1 + $0x4f8] sm:$0xf0]  ;;  %v3319_v7 = vld [vmem:[%s5090_s1 + $0x574] sm:$0xf] }
  0x98   :  { %1826 = vmatpush.bf16.msra.mxu0 %v2143_v36  ;;  %v2431_v36 = vor.u32 %v3221_v17, %v2428_v18  ;;  %v2460_v17 = vld [vmem:[%s5090_s1 + $0x2a8] sm:$0xf0]  ;;  %v3245_v18 = vld [vmem:[%s5090_s1 + $0x324] sm:$0xf] }
  0x99   :  { %1839 = vmatpush.bf16.msra.mxu1 %v2207_v37  ;;  %v2495_v37 = vor.u32 %v3237_v19, %v2492_v24  ;;  %v2524_v19 = vld [vmem:[%s5090_s1 + $0x328] sm:$0xf0] }
  0x9a   :  { %1852 = vmatpush.bf16.msra.mxu2 %v2271_v39  ;;  %v2559_v39 = vor.u32 %v3253_v26, %v2556_v27  ;;  %v2588_v24 = vld [vmem:[%s5090_s1 + $0x3a8] sm:$0xf0] }
  0x9b   :  { %1865 = vmatpush.bf16.msra.mxu3 %v2335_v46  ;;  %v2623_v46 = vor.u32 %v3269_v32, %v2620_v34 }
  0x9c   :  { %1827 = vmatpush.bf16.msra.mxu0 %v2135_v52  ;;  %v2423_v52 = vor.u32 %v3219_v40, %v2420_v43  ;;  %v3227_v40 = vld [vmem:[%s5090_s1 + $0x294] sm:$0xf] }
  0x9d   :  { %1840 = vmatpush.bf16.msra.mxu1 %v2199_v55  ;;  %v2412_v55 = vld [vmem:[%s5090_s1 + $0x248] sm:$0xf0] }
  0x9e   :  { %1853 = vmatpush.bf16.msra.mxu2 %v2263_v56  ;;  %v3249_v56 = vld [vmem:[%s5090_s1 + $0x344] sm:$0xf] }
  0x9f   :  { %1866 = vmatpush.bf16.msra.mxu3 %v2327_v60  ;;  %v2415_v60 = vor.u32 %v3217_v54, %v2412_v55  ;;  %v2543_v62 = vor.u32 %v3249_v56, %v2540_v57  ;;  %v3209_v54 = vld [vmem:[%s5090_s1 + $0x204] sm:$0xf]  ;;  %v2380_v55 = vld [vmem:[%s5090_s1 + $0x208] sm:$0xf0] }
  0xa0   :  { %1828 = vmatpush.bf16.msra.mxu0 %v2127_v3  ;;  %v2468_v3 = vld [vmem:[%s5090_s1 + $0x2b8] sm:$0xf0]  ;;  %v1622_v26 = vpop.f32.mrf.mxu0  ;;  %v2444_v56 = vld [vmem:[%s5090_s1 + $0x288] sm:$0xf0]  ;;  %v3241_v57 = vld [vmem:[%s5090_s1 + $0x304] sm:$0xf] }
  0xa1   :  { %1841 = vmatpush.bf16.msra.mxu1 %v2191_v9  ;;  %v2596_v9 = vld [vmem:[%s5090_s1 + $0x3b8] sm:$0xf0]  ;;  %v2471_v11 = vor.u32 %v3231_v1, %v2468_v3  ;;  %v1635_v32 = vpop.f32.mrf.mxu1  ;;  %v3303_v1 = vld [vmem:[%s5090_s1 + $0x4f4] sm:$0xf]  ;;  %v2383_v3 = vor.u32 %v3209_v54, %v2380_v55 }
  0xa2   :  { %1854 = vmatpush.bf16.msra.mxu2 %v2255_v10  ;;  %v2407_v10 = vor.u32 %v3215_v63, %v2404_v0  ;;  %v1636_v43 = vadd.f32 %v1635_v32, %v1622_v26  ;;  %v3287_v63 = vld [vmem:[%s5090_s1 + $0x474] sm:$0xf]  ;;  %v2692_v0 = vld [vmem:[%s5090_s1 + $0x478] sm:$0xf0]  ;;  %v3301_v26 = vld [vmem:[%s5090_s1 + $0x4e4] sm:$0xf] }
  0xa3   :  { %1867 = vmatpush.bf16.msra.mxu3 %v2319_v13  ;;  %1829 = vmatmul.bf16.vlgmr.msra.gmra.mxu0 %v3724_v20  ;;  %v2615_v20 = vor.u32 %v3267_v50, %v2612_v51  ;;  %v3213_v13 = vld [vmem:[%s5090_s1 + $0x224] sm:$0xf]  ;;  %v3259_v51 = vld [vmem:[%s5090_s1 + $0x394] sm:$0xf]  ;;  %v2748_v32 = vld [vmem:[%s5090_s1 + $0x4e8] sm:$0xf0] }
  0xa4   :  { %1873 = vmatpush.bf16.msrb.mxu0 %v2439_v14  ;;  %1842 = vmatmul.bf16.vlgmr.msra.gmra.mxu1 %v3727_v21  ;;  %v2476_v21 = vld [vmem:[%s5090_s1 + $0x2c8] sm:$0xf0] }
  0xa5   :  { %1886 = vmatpush.bf16.msrb.mxu1 %v2503_v15  ;;  %1855 = vmatmul.bf16.vlgmr.msra.gmra.mxu2 %v3692_v4  ;;  %v2551_v4 = vor.u32 %v3251_v48, %v2548_v49  ;;  %v2396_v14 = vld [vmem:[%s5090_s1 + $0x228] sm:$0xf0]  ;;  %v3229_v15 = vld [vmem:[%s5090_s1 + $0x2a4] sm:$0xf]  ;;  %v3243_v48 = vld [vmem:[%s5090_s1 + $0x314] sm:$0xf] }
  0xa6   :  { %1899 = vmatpush.bf16.msrb.mxu2 %v2567_v16  ;;  %1868 = vmatmul.bf16.vlgmr.msra.gmra.mxu3 %v3697_v6  ;;  %v3233_v6 = vld [vmem:[%s5090_s1 + $0x2c4] sm:$0xf]  ;;  %v2599_v16 = vor.u32 %v3263_v8, %v2596_v9  ;;  %v2399_v27 = vor.u32 %v3213_v13, %v2396_v14  ;;  %v2463_v34 = vor.u32 %v3229_v15, %v2460_v17  ;;  %v2516_v49 = vld [vmem:[%s5090_s1 + $0x318] sm:$0xf0] }
  0xa7   :  { %1912 = vmatpush.bf16.msrb.mxu3 %v2631_v22  ;;  %v2479_v61 = vor.u32 %v3233_v6, %v2476_v21  ;;  %v3261_v22 = vld [vmem:[%s5090_s1 + $0x3a4] sm:$0xf]  ;;  %v2455_v6 = vor.u32 %v3227_v40, %v2452_v47  ;;  %v2820_v8 = vld [vmem:[%s5090_s1 + $0x578] sm:$0xf0] }
  0xa8   :  { %1874 = vmatpush.bf16.msrb.mxu0 %v2431_v36  ;;  %v2527_v36 = vor.u32 %v3245_v18, %v2524_v19  ;;  %v1648_v45 = vpop.f32.mrf.mxu2  ;;  %v3225_v21 = vld [vmem:[%s5090_s1 + $0x284] sm:$0xf]  ;;  %v2884_v13 = vld [vmem:[%s5090_s1 + $0x5f8] sm:$0xf0]  ;;  %v2759_v18 = vor.u32 %v3303_v1, %v2756_v5  ;;  %v2823_v19 = vor.u32 %v3319_v7, %v2820_v8 }
  0xa9   :  { %1887 = vmatpush.bf16.msrb.mxu1 %v2495_v37  ;;  %v3211_v37 = vld [vmem:[%s5090_s1 + $0x214] sm:$0xf]  ;;  %v1661_v50 = vpop.f32.mrf.mxu3  ;;  %v1637_v9 = vpop.f32.mrf.mxu1  ;;  %v2676_v47 = vld [vmem:[%s5090_s1 + $0x458] sm:$0xf0] }
  0xaa   :  { %1900 = vmatpush.bf16.msrb.mxu2 %v2559_v39  ;;  %v2388_v39 = vld [vmem:[%s5090_s1 + $0x218] sm:$0xf0]  ;;  %v3311_v9 = vld [vmem:[%s5090_s1 + $0x534] sm:$0xf] }
  0xab   :  { %1913 = vmatpush.bf16.msrb.mxu3 %v2623_v46  ;;  %v2591_v46 = vor.u32 %v3261_v22, %v2588_v24  ;;  %v3285_v22 = vld [vmem:[%s5090_s1 + $0x464] sm:$0xf]  ;;  %v2684_v24 = vld [vmem:[%s5090_s1 + $0x468] sm:$0xf0]  ;;  %v2660_v1 = vld [vmem:[%s5090_s1 + $0x438] sm:$0xf0] }
  0xac   :  { %1875 = vmatpush.bf16.msrb.mxu0 %v2423_v52  ;;  %v2580_v52 = vld [vmem:[%s5090_s1 + $0x398] sm:$0xf0]  ;;  %v2687_v40 = vor.u32 %v3285_v22, %v2684_v24  ;;  %v2716_v24 = vld [vmem:[%s5090_s1 + $0x4a8] sm:$0xf0] }
  0xad   :  { %1888 = vmatpush.bf16.msrb.mxu1 %v2487_v53  ;;  %v1649_v53 = vadd.f32 %v1648_v45, %v1636_v43  ;;  %v2583_v59 = vor.u32 %v3259_v51, %v2580_v52  ;;  %v2751_v43 = vor.u32 %v3301_v26, %v2748_v32  ;;  %v3315_v51 = vld [vmem:[%s5090_s1 + $0x554] sm:$0xf]  ;;  %v2804_v52 = vld [vmem:[%s5090_s1 + $0x558] sm:$0xf0]  ;;  %v3309_v26 = vld [vmem:[%s5090_s1 + $0x524] sm:$0xf] }
  0xae   :  { %1901 = vmatpush.bf16.msrb.mxu2 %v2551_v4  ;;  %v2391_v4 = vor.u32 %v3211_v37, %v2388_v39  ;;  %v3333_v37 = vld [vmem:[%s5090_s1 + $0x5e4] sm:$0xf]  ;;  %v2876_v39 = vld [vmem:[%s5090_s1 + $0x5e8] sm:$0xf0]  ;;  %v2807_v55 = vor.u32 %v3315_v51, %v2804_v52  ;;  %v2724_v8 = vld [vmem:[%s5090_s1 + $0x4b8] sm:$0xf0] }
  0xaf   :  { %1914 = vmatpush.bf16.msrb.mxu3 %v2615_v20  ;;  %v2519_v20 = vor.u32 %v3243_v48, %v2516_v49  ;;  %v4644_v58 = vadd.f32 %v1661_v50, %v1649_v53  ;;  %v3299_v48 = vld [vmem:[%s5090_s1 + $0x4d4] sm:$0xf]  ;;  %v2879_v49 = vor.u32 %v3333_v37, %v2876_v39  ;;  %v2740_v50 = vld [vmem:[%s5090_s1 + $0x4d8] sm:$0xf0]  ;;  %v2844_v37 = vld [vmem:[%s5090_s1 + $0x5a8] sm:$0xf0] }
  0xb0   :  { %1876 = vmatpush.bf16.msrb.mxu0 %v2415_v60  ;;  %v2508_v60 = vld [vmem:[%s5090_s1 + $0x308] sm:$0xf0]  ;;  %v1650_v14 = vpop.f32.mrf.mxu2  ;;  %v2868_v53 = vld [vmem:[%s5090_s1 + $0x5d8] sm:$0xf0]  ;;  %v2743_v54 = vor.u32 %v3299_v48, %v2740_v50 }
  0xb1   :  { %1889 = vmatpush.bf16.msrb.mxu1 %v2479_v61  ;;  %v3257_v61 = vld [vmem:[%s5090_s1 + $0x384] sm:$0xf]  ;;  %v1663_v17 = vpop.f32.mrf.mxu3  ;;  %v2644_v48 = vld [vmem:[%s5090_s1 + $0x418] sm:$0xf0] }
  0xb2   :  { %1902 = vmatpush.bf16.msrb.mxu2 %v2543_v62  ;;  %v2572_v62 = vld [vmem:[%s5090_s1 + $0x388] sm:$0xf0]  ;;  %v2708_v52 = vld [vmem:[%s5090_s1 + $0x498] sm:$0xf0] }
  0xb3   :  { %1915 = vmatpush.bf16.msrb.mxu3 %v2607_v2  ;;  %v1624_v2 = vpop.f32.mrf.mxu0  ;;  %v2575_v15 = vor.u32 %v3257_v61, %v2572_v62  ;;  %v2652_v17 = vld [vmem:[%s5090_s1 + $0x428] sm:$0xf0] }
  0xb4   :  { %1877 = vmatpush.bf16.msrb.mxu0 %v2407_v10  ;;  %v2447_v10 = vor.u32 %v3225_v21, %v2444_v56  ;;  %v3313_v21 = vld [vmem:[%s5090_s1 + $0x544] sm:$0xf]  ;;  %v2796_v56 = vld [vmem:[%s5090_s1 + $0x548] sm:$0xf0]  ;;  %v3295_v2 = vld [vmem:[%s5090_s1 + $0x4b4] sm:$0xf] }
  0xb5   :  { %1890 = vmatpush.bf16.msrb.mxu1 %v2471_v11  ;;  %v2511_v11 = vor.u32 %v3241_v57, %v2508_v60  ;;  %v3329_v57 = vld [vmem:[%s5090_s1 + $0x5c4] sm:$0xf]  ;;  %v2727_v14 = vor.u32 %v3295_v2, %v2724_v8  ;;  %v3367_v2 = vld [vmem:[%s5090_s1 + $0x6f4] sm:$0xf]  ;;  %v3076_v8 = vld [vmem:[%s5090_s1 + $0x778] sm:$0xf0] }
  0xb6   :  { %1903 = vmatpush.bf16.msrb.mxu2 %v2535_v12  ;;  %v3335_v12 = vld [vmem:[%s5090_s1 + $0x5f4] sm:$0xf] }
  0xb7   :  { %1916 = vmatpush.bf16.msrb.mxu3 %v2599_v16  ;;  %v2695_v16 = vor.u32 %v3287_v63, %v2692_v0  ;;  %v2799_v63 = vor.u32 %v3313_v21, %v2796_v56  ;;  %v3279_v0 = vld [vmem:[%s5090_s1 + $0x434] sm:$0xf]  ;;  %v2700_v21 = vld [vmem:[%s5090_s1 + $0x488] sm:$0xf0]  ;;  %v3305_v56 = vld [vmem:[%s5090_s1 + $0x504] sm:$0xf] }
  0xb8   :  { %1878 = vmatpush.bf16.msrb.mxu0 %v2399_v27  ;;  %v2887_v27 = vor.u32 %v3335_v12, %v2884_v13  ;;  %v2663_v13 = vor.u32 %v3279_v0, %v2660_v1  ;;  %v3351_v0 = vld [vmem:[%s5090_s1 + $0x674] sm:$0xf]  ;;  %v2948_v1 = vld [vmem:[%s5090_s1 + $0x678] sm:$0xf0] }
  0xb9   :  { %1891 = vmatpush.bf16.msrb.mxu1 %v2463_v34  ;;  %v3317_v34 = vld [vmem:[%s5090_s1 + $0x564] sm:$0xf] }
  0xba   :  { %1904 = vmatpush.bf16.msrb.mxu2 %v2527_v36  ;;  %v2812_v36 = vld [vmem:[%s5090_s1 + $0x568] sm:$0xf0] }
  0xbb   :  { %1917 = vmatpush.bf16.msrb.mxu3 %v2591_v46  ;;  %v2815_v45 = vor.u32 %v3317_v34, %v2812_v36  ;;  %v3283_v46 = vld [vmem:[%s5090_s1 + $0x454] sm:$0xf]  ;;  %v3325_v36 = vld [vmem:[%s5090_s1 + $0x5a4] sm:$0xf] }
  0xbc   :  { %1879 = vmatpush.bf16.msrb.mxu0 %v2391_v4  ;;  %v2679_v4 = vor.u32 %v3283_v46, %v2676_v47  ;;  %v3275_v47 = vld [vmem:[%s5090_s1 + $0x414] sm:$0xf]  ;;  %v2847_v51 = vor.u32 %v3325_v36, %v2844_v37 }
  0xbd   :  { %1892 = vmatpush.bf16.msrb.mxu1 %v2455_v6  ;;  %v3297_v6 = vld [vmem:[%s5090_s1 + $0x4c4] sm:$0xf] }
  0xbe   :  { %1905 = vmatpush.bf16.msrb.mxu2 %v2519_v20 }
  0xbf   :  { %1918 = vmatpush.bf16.msrb.mxu3 %v2583_v59  ;;  %v2860_v59 = vld [vmem:[%s5090_s1 + $0x5c8] sm:$0xf0] }
  0xc0   :  { %1880 = vmatpush.bf16.msrb.mxu0 %v2383_v3  ;;  %v1674_v61 = vpop.f32.mrf.mxu0  ;;  %v2863_v7 = vor.u32 %v3329_v57, %v2860_v59 }
  0xc1   :  { %1893 = vmatpush.bf16.msrb.mxu1 %v2447_v10  ;;  %v1675_v3 = vadd.f32 %v1674_v61, %v4644_v58  ;;  %v1687_v5 = vpop.f32.mrf.mxu1  ;;  %v2788_v10 = vld [vmem:[%s5090_s1 + $0x538] sm:$0xf0]  ;;  %v3321_v61 = vld [vmem:[%s5090_s1 + $0x584] sm:$0xf] }
  0xc2   :  { %1906 = vmatpush.bf16.msrb.mxu2 %v2511_v11  ;;  %v3327_v11 = vld [vmem:[%s5090_s1 + $0x5b4] sm:$0xf]  ;;  %v2852_v58 = vld [vmem:[%s5090_s1 + $0x5b8] sm:$0xf0] }
  0xc3   :  { %1919 = vmatpush.bf16.msrb.mxu3 %v2575_v15  ;;  %1881 = vmatmul.bf16.vlgmr.msrb.gmra.mxu0 %v3883_v41  ;;  %v3281_v41 = vld [vmem:[%s5090_s1 + $0x444] sm:$0xf]  ;;  %v1688_v12 = vadd.f32 %v1687_v5, %v1675_v3  ;;  %v2791_v15 = vor.u32 %v3311_v9, %v2788_v10  ;;  %v2855_v22 = vor.u32 %v3327_v11, %v2852_v58  ;;  %v3012_v5 = vld [vmem:[%s5090_s1 + $0x6f8] sm:$0xf0]  ;;  %v3399_v11 = vld [vmem:[%s5090_s1 + $0x7f4] sm:$0xf] }
  0xc4   :  { %1925 = vmatpush.bf16.msra.mxu0 %v2695_v16  ;;  %1894 = vmatmul.bf16.vlgmr.msrb.gmra.mxu1 %v3887_v44  ;;  %v2732_v44 = vld [vmem:[%s5090_s1 + $0x4c8] sm:$0xf0]  ;;  %v3277_v16 = vld [vmem:[%s5090_s1 + $0x424] sm:$0xf]  ;;  %v3140_v58 = vld [vmem:[%s5090_s1 + $0x7f8] sm:$0xf0] }
  0xc5   :  { %1938 = vmatpush.bf16.msra.mxu1 %v2759_v18  ;;  %1907 = vmatmul.bf16.vlgmr.msrb.gmra.mxu2 %v3875_v38  ;;  %v3331_v38 = vld [vmem:[%s5090_s1 + $0x5d4] sm:$0xf]  ;;  %v2735_v62 = vor.u32 %v3297_v6, %v2732_v44  ;;  %v3293_v18 = vld [vmem:[%s5090_s1 + $0x4a4] sm:$0xf]  ;;  %v2655_v39 = vor.u32 %v3277_v16, %v2652_v17  ;;  %v2940_v17 = vld [vmem:[%s5090_s1 + $0x668] sm:$0xf0] }
  0xc6   :  { %1951 = vmatpush.bf16.msra.mxu2 %v2823_v19  ;;  %1920 = vmatmul.bf16.vlgmr.msrb.gmra.mxu3 %v3885_v42  ;;  %v2668_v42 = vld [vmem:[%s5090_s1 + $0x448] sm:$0xf0]  ;;  %v2871_v20 = vor.u32 %v3331_v38, %v2868_v53  ;;  %v3307_v38 = vld [vmem:[%s5090_s1 + $0x514] sm:$0xf]  ;;  %v2772_v53 = vld [vmem:[%s5090_s1 + $0x518] sm:$0xf0] }
  0xc7   :  { %1964 = vmatpush.bf16.msra.mxu3 %v2887_v27  ;;  %v2671_v60 = vor.u32 %v3281_v41, %v2668_v42  ;;  %v2780_v27 = vld [vmem:[%s5090_s1 + $0x528] sm:$0xf0]  ;;  %v3273_v41 = vld [vmem:[%s5090_s1 + $0x404] sm:$0xf] }
  0xc8   :  { %1926 = vmatpush.bf16.msra.mxu0 %v2687_v40  ;;  %v1700_v19 = vpop.f32.mrf.mxu2  ;;  %v2783_v46 = vor.u32 %v3309_v26, %v2780_v27  ;;  %v2636_v42 = vld [vmem:[%s5090_s1 + $0x408] sm:$0xf0]  ;;  %v3289_v44 = vld [vmem:[%s5090_s1 + $0x484] sm:$0xf] }
  0xc9   :  { %1939 = vmatpush.bf16.msra.mxu1 %v2751_v43  ;;  %v1701_v32 = vadd.f32 %v1700_v19, %v1688_v12  ;;  %v1713_v34 = vpop.f32.mrf.mxu3  ;;  %v1676_v43 = vpop.f32.mrf.mxu0  ;;  %v2639_v3 = vor.u32 %v3273_v41, %v2636_v42  ;;  %v2703_v9 = vor.u32 %v3289_v44, %v2700_v21  ;;  %v3349_v16 = vld [vmem:[%s5090_s1 + $0x664] sm:$0xf]  ;;  %v3143_v19 = vor.u32 %v3399_v11, %v3140_v58  ;;  %v3068_v26 = vld [vmem:[%s5090_s1 + $0x768] sm:$0xf0] }
  0xca   :  { %1952 = vmatpush.bf16.msra.mxu2 %v2815_v45  ;;  %v2719_v45 = vor.u32 %v3293_v18, %v2716_v24  ;;  %v1689_v50 = vpop.f32.mrf.mxu1  ;;  %v3365_v18 = vld [vmem:[%s5090_s1 + $0x6e4] sm:$0xf]  ;;  %v2932_v43 = vld [vmem:[%s5090_s1 + $0x658] sm:$0xf0] }
  0xcb   :  { %1965 = vmatpush.bf16.msra.mxu3 %v2879_v49  ;;  %v4804_v40 = vadd.f32 %v1713_v34, %v1701_v32  ;;  %v3291_v49 = vld [vmem:[%s5090_s1 + $0x494] sm:$0xf]  ;;  %v3381_v24 = vld [vmem:[%s5090_s1 + $0x764] sm:$0xf]  ;;  %v3132_v32 = vld [vmem:[%s5090_s1 + $0x7e8] sm:$0xf0]  ;;  %v2943_v34 = vor.u32 %v3349_v16, %v2940_v17 }
  0xcc   :  { %1927 = vmatpush.bf16.msra.mxu0 %v2679_v4  ;;  %v3323_v4 = vld [vmem:[%s5090_s1 + $0x594] sm:$0xf]  ;;  %v2711_v6 = vor.u32 %v3291_v49, %v2708_v52  ;;  %v3397_v27 = vld [vmem:[%s5090_s1 + $0x7e4] sm:$0xf]  ;;  %v3071_v37 = vor.u32 %v3381_v24, %v3068_v26  ;;  %v3060_v49 = vld [vmem:[%s5090_s1 + $0x758] sm:$0xf0] }
  0xcd   :  { %1940 = vmatpush.bf16.msra.mxu1 %v2743_v54  ;;  %v2836_v54 = vld [vmem:[%s5090_s1 + $0x598] sm:$0xf0]  ;;  %v3393_v42 = vld [vmem:[%s5090_s1 + $0x7c4] sm:$0xf] }
  0xce   :  { %1953 = vmatpush.bf16.msra.mxu2 %v2807_v55  ;;  %v2647_v55 = vor.u32 %v3275_v47, %v2644_v48  ;;  %v2839_v59 = vor.u32 %v3323_v4, %v2836_v54  ;;  %v2996_v47 = vld [vmem:[%s5090_s1 + $0x6d8] sm:$0xf0]  ;;  %v3379_v48 = vld [vmem:[%s5090_s1 + $0x754] sm:$0xf]  ;;  %v2988_v4 = vld [vmem:[%s5090_s1 + $0x6c8] sm:$0xf0] }
  0xcf   :  { %1966 = vmatpush.bf16.msra.mxu3 %v2871_v20  ;;  %v2775_v20 = vor.u32 %v3307_v38, %v2772_v53  ;;  %v3124_v50 = vld [vmem:[%s5090_s1 + $0x7d8] sm:$0xf0]  ;;  %v3063_v38 = vor.u32 %v3379_v48, %v3060_v49  ;;  %v3361_v53 = vld [vmem:[%s5090_s1 + $0x6c4] sm:$0xf]  ;;  %v3387_v48 = vld [vmem:[%s5090_s1 + $0x794] sm:$0xf] }
  0xd0   :  { %1928 = vmatpush.bf16.msra.mxu0 %v2671_v60  ;;  %v1702_v57 = vpop.f32.mrf.mxu2  ;;  %v2764_v60 = vld [vmem:[%s5090_s1 + $0x508] sm:$0xf0]  ;;  %v3377_v54 = vld [vmem:[%s5090_s1 + $0x744] sm:$0xf]  ;;  %v3092_v49 = vld [vmem:[%s5090_s1 + $0x798] sm:$0xf0] }
  0xd1   :  { %1941 = vmatpush.bf16.msra.mxu1 %v2735_v62  ;;  %v2828_v62 = vld [vmem:[%s5090_s1 + $0x588] sm:$0xf0]  ;;  %v2767_v10 = vor.u32 %v3305_v56, %v2764_v60  ;;  %v2991_v56 = vor.u32 %v3361_v53, %v2988_v4  ;;  %v2916_v60 = vld [vmem:[%s5090_s1 + $0x638] sm:$0xf0]  ;;  %v3357_v11 = vld [vmem:[%s5090_s1 + $0x6a4] sm:$0xf] }
  0xd2   :  { %1954 = vmatpush.bf16.msra.mxu2 %v2799_v63  ;;  %v1715_v63 = vpop.f32.mrf.mxu3  ;;  %v2831_v12 = vor.u32 %v3321_v61, %v2828_v62  ;;  %v3359_v61 = vld [vmem:[%s5090_s1 + $0x6b4] sm:$0xf]  ;;  %v2956_v53 = vld [vmem:[%s5090_s1 + $0x688] sm:$0xf0] }
  0xd3   :  { %1967 = vmatpush.bf16.msra.mxu3 %v2863_v7  ;;  %v3383_v7 = vld [vmem:[%s5090_s1 + $0x774] sm:$0xf]  ;;  %v2980_v63 = vld [vmem:[%s5090_s1 + $0x6b8] sm:$0xf0]  ;;  %v3020_v4 = vld [vmem:[%s5090_s1 + $0x708] sm:$0xf0] }
  0xd4   :  { %1929 = vmatpush.bf16.msra.mxu0 %v2663_v13  ;;  %v2951_v13 = vor.u32 %v3351_v0, %v2948_v1  ;;  %v3375_v0 = vld [vmem:[%s5090_s1 + $0x734] sm:$0xf]  ;;  %v3044_v1 = vld [vmem:[%s5090_s1 + $0x738] sm:$0xf0] }
  0xd5   :  { %1942 = vmatpush.bf16.msra.mxu1 %v2727_v14  ;;  %v3015_v14 = vor.u32 %v3367_v2, %v3012_v5  ;;  %v3391_v2 = vld [vmem:[%s5090_s1 + $0x7b4] sm:$0xf] }
  0xd6   :  { %1955 = vmatpush.bf16.msra.mxu2 %v2791_v15  ;;  %v3079_v15 = vor.u32 %v3383_v7, %v3076_v8  ;;  %v2983_v7 = vor.u32 %v3359_v61, %v2980_v63  ;;  %v3047_v8 = vor.u32 %v3375_v0, %v3044_v1 }
  0xd7   :  { %1968 = vmatpush.bf16.msra.mxu3 %v2855_v22  ;;  %v3004_v22 = vld [vmem:[%s5090_s1 + $0x6e8] sm:$0xf0] }
  0xd8   :  { %1930 = vmatpush.bf16.msra.mxu0 %v2655_v39  ;;  %v3007_v36 = vor.u32 %v3365_v18, %v3004_v22  ;;  %v3347_v39 = vld [vmem:[%s5090_s1 + $0x654] sm:$0xf]  ;;  %v3389_v18 = vld [vmem:[%s5090_s1 + $0x7a4] sm:$0xf] }
  0xd9   :  { %1943 = vmatpush.bf16.msra.mxu1 %v2719_v45  ;;  %v3363_v45 = vld [vmem:[%s5090_s1 + $0x6d4] sm:$0xf] }
  0xda   :  { %1956 = vmatpush.bf16.msra.mxu2 %v2783_v46  ;;  %v3135_v46 = vor.u32 %v3397_v27, %v3132_v32  ;;  %v2999_v52 = vor.u32 %v3363_v45, %v2996_v47  ;;  %v2964_v45 = vld [vmem:[%s5090_s1 + $0x698] sm:$0xf0] }
  0xdb   :  { %1969 = vmatpush.bf16.msra.mxu3 %v2847_v51  ;;  %v2935_v51 = vor.u32 %v3347_v39, %v2932_v43  ;;  %v3355_v39 = vld [vmem:[%s5090_s1 + $0x694] sm:$0xf]  ;;  %v3028_v47 = vld [vmem:[%s5090_s1 + $0x718] sm:$0xf0] }
  0xdc   :  { %1931 = vmatpush.bf16.msra.mxu0 %v2647_v55  ;;  %v3052_v55 = vld [vmem:[%s5090_s1 + $0x748] sm:$0xf0] }
  0xdd   :  { %1944 = vmatpush.bf16.msra.mxu1 %v2711_v6  ;;  %v3116_v6 = vld [vmem:[%s5090_s1 + $0x7c8] sm:$0xf0]  ;;  %v3055_v57 = vor.u32 %v3377_v54, %v3052_v55  ;;  %v3385_v55 = vld [vmem:[%s5090_s1 + $0x784] sm:$0xf] }
  0xde   :  { %1957 = vmatpush.bf16.msra.mxu2 %v2775_v20 }
  0xdf   :  { %1970 = vmatpush.bf16.msra.mxu3 %v2839_v59  ;;  %v3343_v59 = vld [vmem:[%s5090_s1 + $0x634] sm:$0xf] }
  0xe0   :  { %1932 = vmatpush.bf16.msra.mxu0 %v2639_v3  ;;  %v1726_v41 = vpop.f32.mrf.mxu0  ;;  %v3108_v3 = vld [vmem:[%s5090_s1 + $0x7b8] sm:$0xf0]  ;;  %v2919_v5 = vor.u32 %v3343_v59, %v2916_v60 }
  0xe1   :  { %1945 = vmatpush.bf16.msra.mxu1 %v2703_v9  ;;  %v1727_v20 = vadd.f32 %v1726_v41, %v4804_v40  ;;  %v1739_v21 = vpop.f32.mrf.mxu1  ;;  %v3119_v40 = vor.u32 %v3393_v42, %v3116_v6  ;;  %v3341_v9 = vld [vmem:[%s5090_s1 + $0x624] sm:$0xf]  ;;  %v3111_v58 = vor.u32 %v3391_v2, %v3108_v3  ;;  %v3084_v41 = vld [vmem:[%s5090_s1 + $0x788] sm:$0xf0] }
  0xe2   :  { %1958 = vmatpush.bf16.msra.mxu2 %v2767_v10  ;;  %v2908_v10 = vld [vmem:[%s5090_s1 + $0x628] sm:$0xf0] }
  0xe3   :  { %1971 = vmatpush.bf16.msra.mxu3 %v2831_v12  ;;  %1933 = vmatmul.bf16.vlgmr.msra.gmra.mxu0 %v4076_v25  ;;  %v3395_v25 = vld [vmem:[%s5090_s1 + $0x7d4] sm:$0xf]  ;;  %v1740_v62 = vadd.f32 %v1739_v21, %v1727_v20  ;;  %v2911_v24 = vor.u32 %v3341_v9, %v2908_v10  ;;  %v3087_v21 = vor.u32 %v3385_v55, %v3084_v41 }
  0xe4   :  { %1977 = vmatpush.bf16.msrb.mxu0 %v2951_v13  ;;  %1946 = vmatmul.bf16.vlgmr.msra.gmra.mxu1 %v4089_v30  ;;  %v2924_v30 = vld [vmem:[%s5090_s1 + $0x648] sm:$0xf0] }
  0xe5   :  { %1990 = vmatpush.bf16.msrb.mxu1 %v3015_v14  ;;  %1959 = vmatmul.bf16.vlgmr.msra.gmra.mxu2 %v4087_v29  ;;  %v3345_v29 = vld [vmem:[%s5090_s1 + $0x644] sm:$0xf]  ;;  %v2972_v13 = vld [vmem:[%s5090_s1 + $0x6a8] sm:$0xf0] }
  0xe6   :  { %2003 = vmatpush.bf16.msrb.mxu2 %v3079_v15  ;;  %1972 = vmatmul.bf16.vlgmr.msra.gmra.mxu3 %v4097_v33  ;;  %v3127_v33 = vor.u32 %v3395_v25, %v3124_v50  ;;  %v2927_v44 = vor.u32 %v3345_v29, %v2924_v30  ;;  %v3373_v14 = vld [vmem:[%s5090_s1 + $0x724] sm:$0xf]  ;;  %v3036_v15 = vld [vmem:[%s5090_s1 + $0x728] sm:$0xf0]  ;;  %v2975_v32 = vor.u32 %v3357_v11, %v2972_v13 }
  0xe7   :  { %2016 = vmatpush.bf16.msrb.mxu3 %v3143_v19  ;;  %v3100_v19 = vld [vmem:[%s5090_s1 + $0x7a8] sm:$0xf0]  ;;  %v2967_v50 = vor.u32 %v3355_v39, %v2964_v45  ;;  %v3353_v29 = vld [vmem:[%s5090_s1 + $0x684] sm:$0xf]  ;;  %v3095_v30 = vor.u32 %v3387_v48, %v3092_v49  ;;  %v3404_v45 = vmov 2.0  }
  0xe8   :  { %1978 = vmatpush.bf16.msrb.mxu0 %v2943_v34  ;;  %v1752_v12 = vpop.f32.mrf.mxu2  ;;  %v1728_v22 = vpop.f32.mrf.mxu0  ;;  %v3039_v34 = vor.u32 %v3373_v14, %v3036_v15  ;;  %v3103_v43 = vor.u32 %v3389_v18, %v3100_v19  ;;  %v2959_v20 = vor.u32 %v3353_v29, %v2956_v53  ;;  %3402 = vrcp.f32 %v3404_v45 }
  0xe9   :  { %1991 = vmatpush.bf16.msrb.mxu1 %v3007_v36  ;;  %v1753_v16 = vadd.f32 %v1752_v12, %v1740_v62  ;;  %v1765_v17 = vpop.f32.mrf.mxu3  ;;  %v1741_v26 = vpop.f32.mrf.mxu1  ;;  %v3339_v36 = vld [vmem:[%s5090_s1 + $0x614] sm:$0xf]  ;;  %v2032_v22 = vlaneseq }
  0xea   :  { %2004 = vmatpush.bf16.msrb.mxu2 %v3071_v37  ;;  %v2900_v37 = vld [vmem:[%s5090_s1 + $0x618] sm:$0xf0] }
  0xeb   :  { %2017 = vmatpush.bf16.msrb.mxu3 %v3135_v46  ;;  %v1766_v27 = vadd.f32 %v1765_v17, %v1753_v16  ;;  %v3371_v46 = vld [vmem:[%s5090_s1 + $0x714] sm:$0xf]  ;;  %v2903_v25 = vor.u32 %v3339_v36, %v2900_v37  ;;  %vm5072_vm3 = vcmp.lt.s32.totalorder %v2032_v22, 256 }
  0xec   :  { %1979 = vmatpush.bf16.msrb.mxu0 %v2935_v51  ;;  %v3031_v51 = vor.u32 %v3371_v46, %v3028_v47 }
  0xed   :  { %1992 = vmatpush.bf16.msrb.mxu1 %v2999_v52  ;;  %v3337_v52 = vld [vmem:[%s5090_s1 + $0x604] sm:$0xf] }
  0xee   :  { %2005 = vmatpush.bf16.msrb.mxu2 %v3063_v38  ;;  %v2892_v38 = vld [vmem:[%s5090_s1 + $0x608] sm:$0xf0] }
  0xef   :  { %2018 = vmatpush.bf16.msrb.mxu3 %v3127_v33  ;;  %v3369_v33 = vld [vmem:[%s5090_s1 + $0x704] sm:$0xf]  ;;  %v2895_v6 = vor.u32 %v3337_v52, %v2892_v38 }
  0xf0   :  { %1980 = vmatpush.bf16.msrb.mxu0 %v2927_v44  ;;  %v1754_v54 = vpop.f32.mrf.mxu2  ;;  %v3023_v44 = vor.u32 %v3369_v33, %v3020_v4 }
  0xf1   :  { %1993 = vmatpush.bf16.msrb.mxu1 %v2991_v56  ;;  %v1767_v42 = vpop.f32.mrf.mxu3 }
  0xf2   :  { %2006 = vmatpush.bf16.msrb.mxu2 %v3055_v57 }
  0xf3   :  { %2019 = vmatpush.bf16.msrb.mxu3 %v3119_v40 }
  0xf4   :  { %1981 = vmatpush.bf16.msrb.mxu0 %v2919_v5 }
  0xf5   :  { %1994 = vmatpush.bf16.msrb.mxu1 %v2983_v7 }
  0xf6   :  { %2007 = vmatpush.bf16.msrb.mxu2 %v3047_v8 }
  0xf7   :  { %2020 = vmatpush.bf16.msrb.mxu3 %v3111_v58 }
  0xf8   :  { %1982 = vmatpush.bf16.msrb.mxu0 %v2911_v24 }
  0xf9   :  { %1995 = vmatpush.bf16.msrb.mxu1 %v2975_v32 }
  0xfa   :  { %2008 = vmatpush.bf16.msrb.mxu2 %v3039_v34 }
  0xfb   :  { %2021 = vmatpush.bf16.msrb.mxu3 %v3103_v43 }
  0xfc   :  { %1983 = vmatpush.bf16.msrb.mxu0 %v2903_v25  ;;  %v3403_v25 = vpop.eup %3402 }
  0xfd   :  { %1996 = vmatpush.bf16.msrb.mxu1 %v2967_v50  ;;  %v2059_v38 = vmul.f32 2.0, %v3403_v25  ;;  %vm2064_vm1 = vweird.f32 %v3403_v25 }
  0xfe   :  { %2009 = vmatpush.bf16.msrb.mxu2 %v3031_v51 }
  0xff   :  { %2022 = vmatpush.bf16.msrb.mxu3 %v3095_v30  ;;  %v2060_v53 = vsub.f32 1.0, %v2059_v38 }
 0x100   :  { %1984 = vmatpush.bf16.msrb.mxu0 %v2895_v6  ;;  %v1778_v56 = vpop.f32.mrf.mxu0 }
 0x101   :  { %1997 = vmatpush.bf16.msrb.mxu1 %v2959_v20  ;;  %v1779_v57 = vadd.f32 %v1778_v56, %v1766_v27  ;;  %v1791_v59 = vpop.f32.mrf.mxu1  ;;  %v5057_v27 = vshrl.u32 %v2032_v22, 7  ;;  %v2061_v55 = vmul.f32 %v3403_v25, %v2060_v53 }
 0x102   :  { %2010 = vmatpush.bf16.msrb.mxu2 %v3023_v44 }
 0x103   :  { %2023 = vmatpush.bf16.msrb.mxu3 %v3087_v21  ;;  %1985 = vmatmul.bf16.vlgmr.msrb.gmra.mxu0 %v4286_v23  ;;  %v1792_v60 = vadd.f32 %v1791_v59, %v1779_v57  ;;  %vm2036_vm0 = vcmp.lt.s32.totalorder %v5057_v27, 2  ;;  %v2062_v44 = vadd.f32 %v3403_v25, %v2061_v55 }
 0x104   :  { %1998 = vmatmul.bf16.vlgmr.msrb.gmra.mxu1 %v4299_v31 }
 0x105   :  { %2011 = vmatmul.bf16.vlgmr.msrb.gmra.mxu2 %v4297_v28  ;;  %v2066_v57 = vsel %vm2064_vm1, %v3403_v25, %v2062_v44 }
 0x106   :  { %2024 = vmatmul.bf16.vlgmr.msrb.gmra.mxu3 %v4307_v35 }
 0x108   :  { %v1804_v61 = vpop.f32.mrf.mxu2  ;;  %v1780_v63 = vpop.f32.mrf.mxu0 }
 0x109   :  { %v1805_v40 = vadd.f32 %v1804_v61, %v1792_v60  ;;  %v1817_v62 = vpop.f32.mrf.mxu3  ;;  %v1793_v0 = vpop.f32.mrf.mxu1 }
 0x10b   :  { %v5055_v1 = vadd.f32 %v1817_v62, %v1805_v40 }
 0x10d   :  { %v2043_v46 = vsel %vm2036_vm0, %v5055_v1, 0.0 }
 0x10e   :  { %v2045_v48 = vrot.slane %v2043_v46, 4 }
 0x110   :  { %v1806_v2 = vpop.f32.mrf.mxu2  ;;  %v2046_v52 = vadd.f32 %v2045_v48, %v2043_v46 }
 0x111   :  { %v1819_v3 = vpop.f32.mrf.mxu3 }
 0x112   :  { %v2047_v30 = vrot.slane %v2046_v52, 2 }
 0x114   :  { %v2048_v54 = vadd.f32 %v2047_v30, %v2046_v52 }
 0x116   :  { %v2049_v6 = vrot.slane %v2048_v54, 1 }
 0x118   :  { %v2050_v56 = vadd.f32 %v2049_v6, %v2048_v54 }
 0x11a   :  { %v2072_v63 = vmul.f32 %v2066_v57, %v2050_v56 }
 0x120   :  { %v1830_v23 = vpop.f32.mrf.mxu0 }
 0x121   :  { %v1843_v5 = vpop.f32.mrf.mxu1 }
 0x122   :  { %v1844_v31 = vadd.f32 %v1843_v5, %v1830_v23  ;;  %v2074_v5 = vsub.f32 %v5055_v1, %v2072_v63 }
 0x128   :  { %v1856_v7 = vpop.f32.mrf.mxu2  ;;  %v1832_v9 = vpop.f32.mrf.mxu0 }
 0x129   :  { %v1857_v28 = vadd.f32 %v1856_v7, %v1844_v31  ;;  %v1869_v8 = vpop.f32.mrf.mxu3  ;;  %v1845_v10 = vpop.f32.mrf.mxu1 }
 0x12b   :  { %v1870_v35 = vadd.f32 %v1869_v8, %v1857_v28 }
 0x130   :  { %v1858_v11 = vpop.f32.mrf.mxu2 }
 0x131   :  { %v1871_v58 = vpop.f32.mrf.mxu3 }
 0x140   :  { %v1882_v12 = vpop.f32.mrf.mxu0 }
 0x141   :  { %v1895_v13 = vpop.f32.mrf.mxu1  ;;  %v1883_v32 = vadd.f32 %v1882_v12, %v1870_v35  ;;  %v2076_v35 = vsel %vm2036_vm0, %v2074_v5, 0.0 }
 0x142   :  { %v2078_v11 = vmul.f32 %v2076_v35, %v2076_v35 }
 0x143   :  { %v1896_v39 = vadd.f32 %v1895_v13, %v1883_v32 }
 0x144   :  { %v2080_v13 = vrot.slane %v2078_v11, 4 }
 0x148   :  { %v1908_v14 = vpop.f32.mrf.mxu2  ;;  %v1884_v16 = vpop.f32.mrf.mxu0 }
 0x149   :  { %v1921_v15 = vpop.f32.mrf.mxu3  ;;  %v1897_v17 = vpop.f32.mrf.mxu1  ;;  %v1909_v47 = vadd.f32 %v1908_v14, %v1896_v39 }
 0x14b   :  { %v1922_v51 = vadd.f32 %v1921_v15, %v1909_v47 }
 0x150   :  { %v1910_v18 = vpop.f32.mrf.mxu2 }
 0x151   :  { %v1923_v19 = vpop.f32.mrf.mxu3  ;;  %v2081_v18 = vadd.f32 %v2080_v13, %v2078_v11 }
 0x153   :  { %v2082_v22 = vrot.slane %v2081_v18, 2 }
 0x160   :  { %v1934_v24 = vpop.f32.mrf.mxu0 }
 0x161   :  { %v1947_v26 = vpop.f32.mrf.mxu1  ;;  %v1935_v29 = vadd.f32 %v1934_v24, %v1922_v51 }
 0x163   :  { %v1948_v33 = vadd.f32 %v1947_v26, %v1935_v29 }
 0x168   :  { %v1960_v34 = vpop.f32.mrf.mxu2  ;;  %v1936_v37 = vpop.f32.mrf.mxu0 }
 0x169   :  { %v1973_v36 = vpop.f32.mrf.mxu3  ;;  %v1949_v43 = vpop.f32.mrf.mxu1  ;;  %v1961_v4 = vadd.f32 %v1960_v34, %v1948_v33  ;;  %v2083_v34 = vadd.f32 %v2082_v22, %v2081_v18 }
 0x16b   :  { %v1974_v41 = vadd.f32 %v1973_v36, %v1961_v4  ;;  %v2084_v39 = vrot.slane %v2083_v34, 1 }
 0x16d   :  { %v2085_v46 = vadd.f32 %v2084_v39, %v2083_v34 }
 0x170   :  { %v1962_v49 = vpop.f32.mrf.mxu2 }
 0x171   :  { %v1975_v50 = vpop.f32.mrf.mxu3 }
 0x180   :  { %v1986_v42 = vpop.f32.mrf.mxu0 }
 0x181   :  { %v1999_v20 = vpop.f32.mrf.mxu1  ;;  %v1987_v21 = vadd.f32 %v1986_v42, %v1974_v41 }
 0x183   :  { %v2000_v59 = vadd.f32 %v1999_v20, %v1987_v21 }
 0x188   :  { %v2012_v60 = vpop.f32.mrf.mxu2  ;;  %v1988_v62 = vpop.f32.mrf.mxu0 }
 0x189   :  { %v2013_v61 = vadd.f32 %v2012_v60, %v2000_v59  ;;  %v2025_v40 = vpop.f32.mrf.mxu3  ;;  %v2001_v0 = vpop.f32.mrf.mxu1 }
 0x18b   :  { %v2026_v2 = vadd.f32 %v2025_v40, %v2013_v61 }
 0x18d   :  { %v2029_v3 = vpack.c.bf16 %v2026_v2, %v5055_v1  ;;  %v2044_v23 = vsel %vm2036_vm0, %v2026_v2, 0.0 }
 0x18e   :  { %v2051_v31 = vrot.slane %v2044_v23, 4 }
 0x18f   :  { %2030 = vst [vmem:[%s5092_s2] sm:$0xff] %v2029_v3 }
 0x190   :  { %v2052_v7 = vadd.f32 %v2051_v31, %v2044_v23  ;;  %v2014_v28 = vpop.f32.mrf.mxu2 }
 0x191   :  { %v2027_v8 = vpop.f32.mrf.mxu3 }
 0x192   :  { %v2053_v9 = vrot.slane %v2052_v7, 2 }
 0x194   :  { %v2054_v10 = vadd.f32 %v2053_v9, %v2052_v7 }
 0x196   :  { %v2055_v58 = vrot.slane %v2054_v10, 1 }
 0x198   :  { %v2056_v12 = vadd.f32 %v2055_v58, %v2054_v10 }
 0x19a   :  { %v2073_v14 = vmul.f32 %v2066_v57, %v2056_v12  ;;  %v2094_v15 = vrot.slane %v2056_v12, 7 }
 0x19c   :  { %v2075_v16 = vsub.f32 %v2026_v2, %v2073_v14  ;;  %v2096_v17 = vsel %vm2095_vm2, %v2050_v56, %v2094_v15 }
 0x19d   :  { %2102 = vst.msk [vmem:[%s5093_s3] ss:$8 sm:$0x3] %vm5072_vm3, %v2096_v17 }
 0x19e   :  { %v2077_v19 = vsel %vm2036_vm0, %v2075_v16, 0.0 }
 0x19f   :  { %v2079_v24 = vmul.f32 %v2077_v19, %v2077_v19 }
 0x1a1   :  { %v2086_v26 = vrot.slane %v2079_v24, 4 }
 0x1a3   :  { %v2087_v32 = vadd.f32 %v2086_v26, %v2079_v24 }
 0x1a5   :  { %v2088_v36 = vrot.slane %v2087_v32, 2 }
 0x1a7   :  { %v2089_v37 = vadd.f32 %v2088_v36, %v2087_v32 }
 0x1a9   :  { %v2090_v43 = vrot.slane %v2089_v37, 1 }
 0x1ab   :  { %v2091_v45 = vadd.f32 %v2090_v43, %v2089_v37 }
 0x1ad   :  { %v2106_v47 = vrot.slane %v2091_v45, 7 }
 0x1af   :  { %v2107_v48 = vsel %vm2095_vm2, %v2085_v46, %v2106_v47 }
 0x1b0   :  { %3144 = vst.msk [vmem:[%s5093_s3 + $0x1] ss:$8 sm:$0x3] %vm5072_vm3, %v2107_v48 }

// kernel: discriminator_forward.9
= control target key start
LH: loop header
LB: loop body
LE: loop exit
PB: predicated region body
PF: predicated region fallthrough
CT: control target
= control target key end

     0   :  { %s4728_s1 = inlined_call_operand.vmem [shape: bf16[4096,128], index: 1, kind: input, shape index: {}]   ;;  %s4729_s0 = inlined_call_operand.vmem [shape: bf16[8,4096], index: 0, kind: input, shape index: {}]   ;;  %s4730_s2 = inlined_call_operand.vmem [shape: f32[8,128], index: 2, kind: output, shape index: {}]  }
   0x1   :  { %v3639_v0 = vld [vmem:[%s4728_s1 + $0x38] sm:$0xff]  ;;  %v3638_v4 = vld [vmem:[%s4728_s1 + $0x30] sm:$0xff]  ;;  %v3637_v8 = vld [vmem:[%s4728_s1 + $0x28] sm:$0xff] }
   0x2   :  { %v3647_v1 = vld [vmem:[%s4728_s1 + $0x78] sm:$0xff]  ;;  %2187 = vmatpush.bf16.msra.mxu0 %v3639_v0  ;;  %v3646_v5 = vld [vmem:[%s4728_s1 + $0x70] sm:$0xff]  ;;  %v3645_v9 = vld [vmem:[%s4728_s1 + $0x68] sm:$0xff] }
   0x3   :  { %v3655_v2 = vld [vmem:[%s4728_s1 + $0xb8] sm:$0xff]  ;;  %2200 = vmatpush.bf16.msra.mxu1 %v3647_v1  ;;  %v3654_v6 = vld [vmem:[%s4728_s1 + $0xb0] sm:$0xff]  ;;  %v3653_v10 = vld [vmem:[%s4728_s1 + $0xa8] sm:$0xff] }
   0x4   :  { %v3663_v3 = vld [vmem:[%s4728_s1 + $0xf8] sm:$0xff]  ;;  %2213 = vmatpush.bf16.msra.mxu2 %v3655_v2  ;;  %v3662_v7 = vld [vmem:[%s4728_s1 + $0xf0] sm:$0xff]  ;;  %v3661_v11 = vld [vmem:[%s4728_s1 + $0xe8] sm:$0xff] }
   0x5   :  { %2226 = vmatpush.bf16.msra.mxu3 %v3663_v3  ;;  %v3636_v12 = vld [vmem:[%s4728_s1 + $0x20] sm:$0xff]  ;;  %v3635_v16 = vld [vmem:[%s4728_s1 + $0x18] sm:$0xff]  ;;  %v3634_v20 = vld [vmem:[%s4728_s1 + $0x10] sm:$0xff] }
   0x6   :  { %2188 = vmatpush.bf16.msra.mxu0 %v3638_v4  ;;  %v3644_v13 = vld [vmem:[%s4728_s1 + $0x60] sm:$0xff]  ;;  %v3643_v17 = vld [vmem:[%s4728_s1 + $0x58] sm:$0xff]  ;;  %v3642_v21 = vld [vmem:[%s4728_s1 + $0x50] sm:$0xff] }
   0x7   :  { %2201 = vmatpush.bf16.msra.mxu1 %v3646_v5  ;;  %v3652_v14 = vld [vmem:[%s4728_s1 + $0xa0] sm:$0xff]  ;;  %v3651_v18 = vld [vmem:[%s4728_s1 + $0x98] sm:$0xff]  ;;  %v3650_v22 = vld [vmem:[%s4728_s1 + $0x90] sm:$0xff] }
   0x8   :  { %2214 = vmatpush.bf16.msra.mxu2 %v3654_v6  ;;  %v3660_v15 = vld [vmem:[%s4728_s1 + $0xe0] sm:$0xff]  ;;  %v3659_v19 = vld [vmem:[%s4728_s1 + $0xd8] sm:$0xff]  ;;  %v3658_v23 = vld [vmem:[%s4728_s1 + $0xd0] sm:$0xff] }
   0x9   :  { %2227 = vmatpush.bf16.msra.mxu3 %v3662_v7  ;;  %v3633_v24 = vld [vmem:[%s4728_s1 + $0x8] sm:$0xff]  ;;  %v11_v29 = vld [vmem:[%s4729_s0] sm:$0xff]  ;;  %v3671_v38 = vld [vmem:[%s4728_s1 + $0x138] sm:$0xff] }
   0xa   :  { %2189 = vmatpush.bf16.msra.mxu0 %v3637_v8  ;;  %v3641_v25 = vld [vmem:[%s4728_s1 + $0x48] sm:$0xff]  ;;  %v3632_v30 = vld [vmem:[%s4728_s1] sm:$0xff]  ;;  %v555_v33 = vunpack.c.l.b16 %v11_v29  ;;  %v556_v37 = vunpack.c.h.b16 %v11_v29  ;;  %v3679_v39 = vld [vmem:[%s4728_s1 + $0x178] sm:$0xff] }
   0xb   :  { %2202 = vmatpush.bf16.msra.mxu1 %v3645_v9  ;;  %v3649_v26 = vld [vmem:[%s4728_s1 + $0x88] sm:$0xff]  ;;  %v3640_v31 = vld [vmem:[%s4728_s1 + $0x40] sm:$0xff]  ;;  %v3687_v40 = vld [vmem:[%s4728_s1 + $0x1b8] sm:$0xff] }
   0xc   :  { %2215 = vmatpush.bf16.msra.mxu2 %v3653_v10  ;;  %v3657_v27 = vld [vmem:[%s4728_s1 + $0xc8] sm:$0xff]  ;;  %v3648_v34 = vld [vmem:[%s4728_s1 + $0x80] sm:$0xff]  ;;  %v3695_v41 = vld [vmem:[%s4728_s1 + $0x1f8] sm:$0xff]  ;;  %v587_v43 = vpack.c.b16 %v555_v33, %v555_v33  ;;  %v588_v45 = vpack.c.b16 %v556_v37, %v556_v37 }
   0xd   :  { %2228 = vmatpush.bf16.msra.mxu3 %v3661_v11  ;;  %v12_v28 = vld [vmem:[%s4729_s0 + $0x8] sm:$0xff]  ;;  %v3656_v35 = vld [vmem:[%s4728_s1 + $0xc0] sm:$0xff]  ;;  %v3670_v46 = vld [vmem:[%s4728_s1 + $0x130] sm:$0xff] }
   0xe   :  { %2190 = vmatpush.bf16.msra.mxu0 %v3636_v12  ;;  %v557_v32 = vunpack.c.l.b16 %v12_v28  ;;  %v558_v36 = vunpack.c.h.b16 %v12_v28  ;;  %v3678_v47 = vld [vmem:[%s4728_s1 + $0x170] sm:$0xff]  ;;  %v3669_v50 = vld [vmem:[%s4728_s1 + $0x128] sm:$0xff]  ;;  %v3668_v54 = vld [vmem:[%s4728_s1 + $0x120] sm:$0xff] }
   0xf   :  { %2203 = vmatpush.bf16.msra.mxu1 %v3644_v13  ;;  %v3686_v48 = vld [vmem:[%s4728_s1 + $0x1b0] sm:$0xff]  ;;  %v3677_v51 = vld [vmem:[%s4728_s1 + $0x168] sm:$0xff]  ;;  %v3676_v55 = vld [vmem:[%s4728_s1 + $0x160] sm:$0xff] }
  0x10   :  { %2216 = vmatpush.bf16.msra.mxu2 %v3652_v14  ;;  %v589_v42 = vpack.c.b16 %v557_v32, %v557_v32  ;;  %v590_v44 = vpack.c.b16 %v558_v36, %v558_v36  ;;  %v3694_v49 = vld [vmem:[%s4728_s1 + $0x1f0] sm:$0xff]  ;;  %v3685_v52 = vld [vmem:[%s4728_s1 + $0x1a8] sm:$0xff]  ;;  %v3684_v56 = vld [vmem:[%s4728_s1 + $0x1a0] sm:$0xff] }
  0x11   :  { %2229 = vmatpush.bf16.msra.mxu3 %v3660_v15  ;;  %v3693_v53 = vld [vmem:[%s4728_s1 + $0x1e8] sm:$0xff]  ;;  %v3692_v57 = vld [vmem:[%s4728_s1 + $0x1e0] sm:$0xff]  ;;  %v3667_v58 = vld [vmem:[%s4728_s1 + $0x118] sm:$0xff] }
  0x12   :  { %2191 = vmatpush.bf16.msra.mxu0 %v3635_v16  ;;  %v3675_v59 = vld [vmem:[%s4728_s1 + $0x158] sm:$0xff]  ;;  %v3666_v62 = vld [vmem:[%s4728_s1 + $0x110] sm:$0xff]  ;;  %v3665_v2 = vld [vmem:[%s4728_s1 + $0x108] sm:$0xff] }
  0x13   :  { %2204 = vmatpush.bf16.msra.mxu1 %v3643_v17  ;;  %v3683_v60 = vld [vmem:[%s4728_s1 + $0x198] sm:$0xff]  ;;  %v3674_v63 = vld [vmem:[%s4728_s1 + $0x150] sm:$0xff]  ;;  %v3673_v3 = vld [vmem:[%s4728_s1 + $0x148] sm:$0xff] }
  0x14   :  { %2217 = vmatpush.bf16.msra.mxu2 %v3651_v18  ;;  %v3691_v61 = vld [vmem:[%s4728_s1 + $0x1d8] sm:$0xff]  ;;  %v3682_v0 = vld [vmem:[%s4728_s1 + $0x190] sm:$0xff]  ;;  %v3681_v4 = vld [vmem:[%s4728_s1 + $0x188] sm:$0xff] }
  0x15   :  { %2230 = vmatpush.bf16.msra.mxu3 %v3659_v19  ;;  %v3690_v1 = vld [vmem:[%s4728_s1 + $0x1d0] sm:$0xff]  ;;  %v3689_v5 = vld [vmem:[%s4728_s1 + $0x1c8] sm:$0xff]  ;;  %v14_v6 = vld [vmem:[%s4729_s0 + $0x18] sm:$0xff] }
  0x16   :  { %2192 = vmatpush.bf16.msra.mxu0 %v3634_v20  ;;  %v13_v7 = vld [vmem:[%s4729_s0 + $0x10] sm:$0xff]  ;;  %v3664_v8 = vld [vmem:[%s4728_s1 + $0x100] sm:$0xff]  ;;  %v561_v10 = vunpack.c.l.b16 %v14_v6  ;;  %v562_v14 = vunpack.c.h.b16 %v14_v6  ;;  %v3703_v16 = vld [vmem:[%s4728_s1 + $0x238] sm:$0xff] }
  0x17   :  { %2205 = vmatpush.bf16.msra.mxu1 %v3642_v21  ;;  %v3672_v9 = vld [vmem:[%s4728_s1 + $0x140] sm:$0xff]  ;;  %v559_v11 = vunpack.c.l.b16 %v13_v7  ;;  %v560_v15 = vunpack.c.h.b16 %v13_v7  ;;  %v3711_v17 = vld [vmem:[%s4728_s1 + $0x278] sm:$0xff]  ;;  %v3701_v28 = vld [vmem:[%s4728_s1 + $0x228] sm:$0xff] }
  0x18   :  { %2218 = vmatpush.bf16.msra.mxu2 %v3650_v22  ;;  %v3680_v12 = vld [vmem:[%s4728_s1 + $0x180] sm:$0xff]  ;;  %v3719_v18 = vld [vmem:[%s4728_s1 + $0x2b8] sm:$0xff]  ;;  %v593_v20 = vpack.c.b16 %v561_v10, %v561_v10  ;;  %v594_v22 = vpack.c.b16 %v562_v14, %v562_v14  ;;  %v3709_v29 = vld [vmem:[%s4728_s1 + $0x268] sm:$0xff] }
  0x19   :  { %2231 = vmatpush.bf16.msra.mxu3 %v3658_v23  ;;  %v3688_v13 = vld [vmem:[%s4728_s1 + $0x1c0] sm:$0xff]  ;;  %v3727_v19 = vld [vmem:[%s4728_s1 + $0x2f8] sm:$0xff]  ;;  %v591_v21 = vpack.c.b16 %v559_v11, %v559_v11  ;;  %v592_v23 = vpack.c.b16 %v560_v15, %v560_v15  ;;  %v3733_v6 = vld [vmem:[%s4728_s1 + $0x328] sm:$0xff] }
  0x1a   :  { %2193 = vmatpush.bf16.msra.mxu0 %v3633_v24  ;;  %v3702_v24 = vld [vmem:[%s4728_s1 + $0x230] sm:$0xff]  ;;  %v3700_v32 = vld [vmem:[%s4728_s1 + $0x220] sm:$0xff]  ;;  %v3699_v36 = vld [vmem:[%s4728_s1 + $0x218] sm:$0xff] }
  0x1b   :  { %2206 = vmatpush.bf16.msra.mxu1 %v3641_v25  ;;  %v3710_v25 = vld [vmem:[%s4728_s1 + $0x270] sm:$0xff]  ;;  %v3708_v33 = vld [vmem:[%s4728_s1 + $0x260] sm:$0xff]  ;;  %v3707_v37 = vld [vmem:[%s4728_s1 + $0x258] sm:$0xff] }
  0x1c   :  { %2219 = vmatpush.bf16.msra.mxu2 %v3649_v26  ;;  %v3718_v26 = vld [vmem:[%s4728_s1 + $0x2b0] sm:$0xff]  ;;  %v3741_v7 = vld [vmem:[%s4728_s1 + $0x368] sm:$0xff]  ;;  %v3732_v10 = vld [vmem:[%s4728_s1 + $0x320] sm:$0xff] }
  0x1d   :  { %2232 = vmatpush.bf16.msra.mxu3 %v3657_v27  ;;  %v3726_v27 = vld [vmem:[%s4728_s1 + $0x2f0] sm:$0xff]  ;;  %v3740_v11 = vld [vmem:[%s4728_s1 + $0x360] sm:$0xff]  ;;  %v3731_v14 = vld [vmem:[%s4728_s1 + $0x318] sm:$0xff] }
  0x1e   :  { %2194 = vmatpush.bf16.msra.mxu0 %v3632_v30  ;;  %v3717_v30 = vld [vmem:[%s4728_s1 + $0x2a8] sm:$0xff]  ;;  %v3739_v15 = vld [vmem:[%s4728_s1 + $0x358] sm:$0xff] }
  0x1f   :  { %2207 = vmatpush.bf16.msra.mxu1 %v3640_v31  ;;  %v3725_v31 = vld [vmem:[%s4728_s1 + $0x2e8] sm:$0xff] }
  0x20   :  { %2220 = vmatpush.bf16.msra.mxu2 %v3648_v34  ;;  %v3716_v34 = vld [vmem:[%s4728_s1 + $0x2a0] sm:$0xff] }
  0x21   :  { %2233 = vmatpush.bf16.msra.mxu3 %v3656_v35  ;;  %2195 = vmatmul.bf16.vlgmr.msra.gmra.mxu0 %v587_v43  ;;  %v3724_v35 = vld [vmem:[%s4728_s1 + $0x2e0] sm:$0xff]  ;;  %v3722_v43 = vld [vmem:[%s4728_s1 + $0x2d0] sm:$0xff] }
  0x22   :  { %2239 = vmatpush.bf16.msrb.mxu0 %v3671_v38  ;;  %2208 = vmatmul.bf16.vlgmr.msra.gmra.mxu1 %v588_v45  ;;  %v3715_v38 = vld [vmem:[%s4728_s1 + $0x298] sm:$0xff]  ;;  %v3705_v45 = vld [vmem:[%s4728_s1 + $0x248] sm:$0xff] }
  0x23   :  { %2252 = vmatpush.bf16.msrb.mxu1 %v3679_v39  ;;  %2221 = vmatmul.bf16.vlgmr.msra.gmra.mxu2 %v589_v42  ;;  %v3723_v39 = vld [vmem:[%s4728_s1 + $0x2d8] sm:$0xff]  ;;  %v3714_v42 = vld [vmem:[%s4728_s1 + $0x290] sm:$0xff] }
  0x24   :  { %2265 = vmatpush.bf16.msrb.mxu2 %v3687_v40  ;;  %2234 = vmatmul.bf16.vlgmr.msra.gmra.mxu3 %v590_v44  ;;  %v3698_v40 = vld [vmem:[%s4728_s1 + $0x210] sm:$0xff]  ;;  %v3697_v44 = vld [vmem:[%s4728_s1 + $0x208] sm:$0xff] }
  0x25   :  { %2278 = vmatpush.bf16.msrb.mxu3 %v3695_v41  ;;  %v3706_v41 = vld [vmem:[%s4728_s1 + $0x250] sm:$0xff] }
  0x26   :  { %2240 = vmatpush.bf16.msrb.mxu0 %v3670_v46  ;;  %v3713_v46 = vld [vmem:[%s4728_s1 + $0x288] sm:$0xff] }
  0x27   :  { %2253 = vmatpush.bf16.msrb.mxu1 %v3678_v47  ;;  %v3721_v47 = vld [vmem:[%s4728_s1 + $0x2c8] sm:$0xff] }
  0x28   :  { %2266 = vmatpush.bf16.msrb.mxu2 %v3686_v48  ;;  %v15_v48 = vld [vmem:[%s4729_s0 + $0x20] sm:$0xff] }
  0x29   :  { %2279 = vmatpush.bf16.msrb.mxu3 %v3694_v49  ;;  %v16_v49 = vld [vmem:[%s4729_s0 + $0x28] sm:$0xff] }
  0x2a   :  { %2241 = vmatpush.bf16.msrb.mxu0 %v3669_v50  ;;  %v3696_v50 = vld [vmem:[%s4728_s1 + $0x200] sm:$0xff] }
  0x2b   :  { %2254 = vmatpush.bf16.msrb.mxu1 %v3677_v51  ;;  %v3704_v51 = vld [vmem:[%s4728_s1 + $0x240] sm:$0xff] }
  0x2c   :  { %2267 = vmatpush.bf16.msrb.mxu2 %v3685_v52  ;;  %v563_v52 = vunpack.c.l.b16 %v15_v48 }
  0x2d   :  { %2280 = vmatpush.bf16.msrb.mxu3 %v3693_v53  ;;  %v565_v53 = vunpack.c.l.b16 %v16_v49 }
  0x2e   :  { %2242 = vmatpush.bf16.msrb.mxu0 %v3668_v54  ;;  %v3712_v54 = vld [vmem:[%s4728_s1 + $0x280] sm:$0xff] }
  0x2f   :  { %2255 = vmatpush.bf16.msrb.mxu1 %v3676_v55  ;;  %v3720_v55 = vld [vmem:[%s4728_s1 + $0x2c0] sm:$0xff] }
  0x30   :  { %2268 = vmatpush.bf16.msrb.mxu2 %v3684_v56  ;;  %v564_v56 = vunpack.c.h.b16 %v15_v48  ;;  %v3765_v48 = vld [vmem:[%s4728_s1 + $0x428] sm:$0xff] }
  0x31   :  { %2281 = vmatpush.bf16.msrb.mxu3 %v3692_v57  ;;  %v566_v57 = vunpack.c.h.b16 %v16_v49  ;;  %v3773_v49 = vld [vmem:[%s4728_s1 + $0x468] sm:$0xff] }
  0x32   :  { %2243 = vmatpush.bf16.msrb.mxu0 %v3667_v58  ;;  %v3735_v58 = vld [vmem:[%s4728_s1 + $0x338] sm:$0xff] }
  0x33   :  { %2256 = vmatpush.bf16.msrb.mxu1 %v3675_v59  ;;  %v3743_v59 = vld [vmem:[%s4728_s1 + $0x378] sm:$0xff] }
  0x34   :  { %2269 = vmatpush.bf16.msrb.mxu2 %v3683_v60  ;;  %v3751_v60 = vld [vmem:[%s4728_s1 + $0x3b8] sm:$0xff] }
  0x35   :  { %2282 = vmatpush.bf16.msrb.mxu3 %v3691_v61  ;;  %v3759_v61 = vld [vmem:[%s4728_s1 + $0x3f8] sm:$0xff] }
  0x36   :  { %2244 = vmatpush.bf16.msrb.mxu0 %v3666_v62  ;;  %v595_v62 = vpack.c.b16 %v563_v52, %v563_v52  ;;  %v3764_v52 = vld [vmem:[%s4728_s1 + $0x420] sm:$0xff] }
  0x37   :  { %2257 = vmatpush.bf16.msrb.mxu1 %v3674_v63  ;;  %v597_v63 = vpack.c.b16 %v565_v53, %v565_v53  ;;  %v3772_v53 = vld [vmem:[%s4728_s1 + $0x460] sm:$0xff] }
  0x38   :  { %2270 = vmatpush.bf16.msrb.mxu2 %v3682_v0  ;;  %v596_v0 = vpack.c.b16 %v564_v56, %v564_v56  ;;  %v3763_v56 = vld [vmem:[%s4728_s1 + $0x418] sm:$0xff] }
  0x39   :  { %2283 = vmatpush.bf16.msrb.mxu3 %v3690_v1  ;;  %v598_v1 = vpack.c.b16 %v566_v57, %v566_v57  ;;  %v3771_v57 = vld [vmem:[%s4728_s1 + $0x458] sm:$0xff] }
  0x3a   :  { %2245 = vmatpush.bf16.msrb.mxu0 %v3665_v2  ;;  %v3734_v2 = vld [vmem:[%s4728_s1 + $0x330] sm:$0xff] }
  0x3b   :  { %2258 = vmatpush.bf16.msrb.mxu1 %v3673_v3  ;;  %v3742_v3 = vld [vmem:[%s4728_s1 + $0x370] sm:$0xff] }
  0x3c   :  { %2271 = vmatpush.bf16.msrb.mxu2 %v3681_v4  ;;  %v3750_v4 = vld [vmem:[%s4728_s1 + $0x3b0] sm:$0xff] }
  0x3d   :  { %2284 = vmatpush.bf16.msrb.mxu3 %v3689_v5  ;;  %v3758_v5 = vld [vmem:[%s4728_s1 + $0x3f0] sm:$0xff] }
  0x3e   :  { %2246 = vmatpush.bf16.msrb.mxu0 %v3664_v8  ;;  %v3749_v8 = vld [vmem:[%s4728_s1 + $0x3a8] sm:$0xff] }
  0x3f   :  { %2259 = vmatpush.bf16.msrb.mxu1 %v3672_v9  ;;  %v3757_v9 = vld [vmem:[%s4728_s1 + $0x3e8] sm:$0xff] }
  0x40   :  { %2272 = vmatpush.bf16.msrb.mxu2 %v3680_v12  ;;  %v3748_v12 = vld [vmem:[%s4728_s1 + $0x3a0] sm:$0xff] }
  0x41   :  { %2285 = vmatpush.bf16.msrb.mxu3 %v3688_v13  ;;  %2247 = vmatmul.bf16.vlgmr.msrb.gmra.mxu0 %v591_v21  ;;  %v3756_v13 = vld [vmem:[%s4728_s1 + $0x3e0] sm:$0xff]  ;;  %v3754_v21 = vld [vmem:[%s4728_s1 + $0x3d0] sm:$0xff] }
  0x42   :  { %2291 = vmatpush.bf16.msra.mxu0 %v3703_v16  ;;  %2260 = vmatmul.bf16.vlgmr.msrb.gmra.mxu1 %v592_v23  ;;  %v3747_v16 = vld [vmem:[%s4728_s1 + $0x398] sm:$0xff]  ;;  %v3737_v23 = vld [vmem:[%s4728_s1 + $0x348] sm:$0xff] }
  0x43   :  { %2304 = vmatpush.bf16.msra.mxu1 %v3711_v17  ;;  %2273 = vmatmul.bf16.vlgmr.msrb.gmra.mxu2 %v593_v20  ;;  %v3755_v17 = vld [vmem:[%s4728_s1 + $0x3d8] sm:$0xff]  ;;  %v3746_v20 = vld [vmem:[%s4728_s1 + $0x390] sm:$0xff] }
  0x44   :  { %2317 = vmatpush.bf16.msra.mxu2 %v3719_v18  ;;  %2286 = vmatmul.bf16.vlgmr.msrb.gmra.mxu3 %v594_v22  ;;  %v3730_v18 = vld [vmem:[%s4728_s1 + $0x310] sm:$0xff]  ;;  %v3729_v22 = vld [vmem:[%s4728_s1 + $0x308] sm:$0xff] }
  0x45   :  { %2330 = vmatpush.bf16.msra.mxu3 %v3727_v19  ;;  %v3738_v19 = vld [vmem:[%s4728_s1 + $0x350] sm:$0xff] }
  0x46   :  { %2292 = vmatpush.bf16.msra.mxu0 %v3702_v24  ;;  %v3745_v24 = vld [vmem:[%s4728_s1 + $0x388] sm:$0xff] }
  0x47   :  { %2305 = vmatpush.bf16.msra.mxu1 %v3710_v25  ;;  %v3753_v25 = vld [vmem:[%s4728_s1 + $0x3c8] sm:$0xff] }
  0x48   :  { %2318 = vmatpush.bf16.msra.mxu2 %v3718_v26  ;;  %v17_v26 = vld [vmem:[%s4729_s0 + $0x30] sm:$0xff] }
  0x49   :  { %2331 = vmatpush.bf16.msra.mxu3 %v3726_v27  ;;  %v18_v27 = vld [vmem:[%s4729_s0 + $0x38] sm:$0xff] }
  0x4a   :  { %2293 = vmatpush.bf16.msra.mxu0 %v3701_v28  ;;  %v3728_v28 = vld [vmem:[%s4728_s1 + $0x300] sm:$0xff] }
  0x4b   :  { %2306 = vmatpush.bf16.msra.mxu1 %v3709_v29  ;;  %v3736_v29 = vld [vmem:[%s4728_s1 + $0x340] sm:$0xff] }
  0x4c   :  { %2319 = vmatpush.bf16.msra.mxu2 %v3717_v30  ;;  %v567_v30 = vunpack.c.l.b16 %v17_v26 }
  0x4d   :  { %2332 = vmatpush.bf16.msra.mxu3 %v3725_v31  ;;  %v569_v31 = vunpack.c.l.b16 %v18_v27 }
  0x4e   :  { %2294 = vmatpush.bf16.msra.mxu0 %v3700_v32  ;;  %v3744_v32 = vld [vmem:[%s4728_s1 + $0x380] sm:$0xff] }
  0x4f   :  { %2307 = vmatpush.bf16.msra.mxu1 %v3708_v33  ;;  %v3752_v33 = vld [vmem:[%s4728_s1 + $0x3c0] sm:$0xff] }
  0x50   :  { %2320 = vmatpush.bf16.msra.mxu2 %v3716_v34  ;;  %v568_v34 = vunpack.c.h.b16 %v17_v26  ;;  %v3797_v26 = vld [vmem:[%s4728_s1 + $0x528] sm:$0xff] }
  0x51   :  { %2333 = vmatpush.bf16.msra.mxu3 %v3724_v35  ;;  %v570_v35 = vunpack.c.h.b16 %v18_v27  ;;  %v3805_v27 = vld [vmem:[%s4728_s1 + $0x568] sm:$0xff] }
  0x52   :  { %2295 = vmatpush.bf16.msra.mxu0 %v3699_v36  ;;  %v3767_v36 = vld [vmem:[%s4728_s1 + $0x438] sm:$0xff] }
  0x53   :  { %2308 = vmatpush.bf16.msra.mxu1 %v3707_v37  ;;  %v3775_v37 = vld [vmem:[%s4728_s1 + $0x478] sm:$0xff] }
  0x54   :  { %2321 = vmatpush.bf16.msra.mxu2 %v3715_v38  ;;  %v3783_v38 = vld [vmem:[%s4728_s1 + $0x4b8] sm:$0xff] }
  0x55   :  { %2334 = vmatpush.bf16.msra.mxu3 %v3723_v39  ;;  %v3791_v39 = vld [vmem:[%s4728_s1 + $0x4f8] sm:$0xff] }
  0x56   :  { %2296 = vmatpush.bf16.msra.mxu0 %v3698_v40  ;;  %v599_v40 = vpack.c.b16 %v567_v30, %v567_v30 }
  0x57   :  { %2309 = vmatpush.bf16.msra.mxu1 %v3706_v41  ;;  %v601_v41 = vpack.c.b16 %v569_v31, %v569_v31  ;;  %v3796_v31 = vld [vmem:[%s4728_s1 + $0x520] sm:$0xff] }
  0x58   :  { %2322 = vmatpush.bf16.msra.mxu2 %v3714_v42  ;;  %v600_v42 = vpack.c.b16 %v568_v34, %v568_v34  ;;  %v3812_v34 = vld [vmem:[%s4728_s1 + $0x5a0] sm:$0xff] }
  0x59   :  { %2335 = vmatpush.bf16.msra.mxu3 %v3722_v43  ;;  %v602_v43 = vpack.c.b16 %v570_v35, %v570_v35  ;;  %v3820_v35 = vld [vmem:[%s4728_s1 + $0x5e0] sm:$0xff] }
  0x5a   :  { %2297 = vmatpush.bf16.msra.mxu0 %v3697_v44  ;;  %v3766_v44 = vld [vmem:[%s4728_s1 + $0x430] sm:$0xff] }
  0x5b   :  { %2310 = vmatpush.bf16.msra.mxu1 %v3705_v45  ;;  %v3774_v45 = vld [vmem:[%s4728_s1 + $0x470] sm:$0xff] }
  0x5c   :  { %2323 = vmatpush.bf16.msra.mxu2 %v3713_v46  ;;  %v3782_v46 = vld [vmem:[%s4728_s1 + $0x4b0] sm:$0xff] }
  0x5d   :  { %2336 = vmatpush.bf16.msra.mxu3 %v3721_v47  ;;  %v3790_v47 = vld [vmem:[%s4728_s1 + $0x4f0] sm:$0xff] }
  0x5e   :  { %2298 = vmatpush.bf16.msra.mxu0 %v3696_v50  ;;  %v3781_v50 = vld [vmem:[%s4728_s1 + $0x4a8] sm:$0xff] }
  0x5f   :  { %2311 = vmatpush.bf16.msra.mxu1 %v3704_v51  ;;  %v3789_v51 = vld [vmem:[%s4728_s1 + $0x4e8] sm:$0xff] }
  0x60   :  { %2324 = vmatpush.bf16.msra.mxu2 %v3712_v54  ;;  %v3780_v54 = vld [vmem:[%s4728_s1 + $0x4a0] sm:$0xff] }
  0x61   :  { %2337 = vmatpush.bf16.msra.mxu3 %v3720_v55  ;;  %2299 = vmatmul.bf16.vlgmr.msra.gmra.mxu0 %v595_v62  ;;  %v3788_v55 = vld [vmem:[%s4728_s1 + $0x4e0] sm:$0xff]  ;;  %v3778_v62 = vld [vmem:[%s4728_s1 + $0x490] sm:$0xff] }
  0x62   :  { %2343 = vmatpush.bf16.msrb.mxu0 %v3735_v58  ;;  %2312 = vmatmul.bf16.vlgmr.msra.gmra.mxu1 %v596_v0  ;;  %v3779_v58 = vld [vmem:[%s4728_s1 + $0x498] sm:$0xff]  ;;  %v3761_v0 = vld [vmem:[%s4728_s1 + $0x408] sm:$0xff] }
  0x63   :  { %2356 = vmatpush.bf16.msrb.mxu1 %v3743_v59  ;;  %2325 = vmatmul.bf16.vlgmr.msra.gmra.mxu2 %v597_v63  ;;  %v3787_v59 = vld [vmem:[%s4728_s1 + $0x4d8] sm:$0xff]  ;;  %v3786_v63 = vld [vmem:[%s4728_s1 + $0x4d0] sm:$0xff] }
  0x64   :  { %2369 = vmatpush.bf16.msrb.mxu2 %v3751_v60  ;;  %2338 = vmatmul.bf16.vlgmr.msra.gmra.mxu3 %v598_v1  ;;  %v3762_v60 = vld [vmem:[%s4728_s1 + $0x410] sm:$0xff]  ;;  %v3769_v1 = vld [vmem:[%s4728_s1 + $0x448] sm:$0xff] }
  0x65   :  { %2382 = vmatpush.bf16.msrb.mxu3 %v3759_v61  ;;  %v3770_v61 = vld [vmem:[%s4728_s1 + $0x450] sm:$0xff] }
  0x66   :  { %2344 = vmatpush.bf16.msrb.mxu0 %v3734_v2  ;;  %v3777_v2 = vld [vmem:[%s4728_s1 + $0x488] sm:$0xff] }
  0x67   :  { %2357 = vmatpush.bf16.msrb.mxu1 %v3742_v3  ;;  %v3785_v3 = vld [vmem:[%s4728_s1 + $0x4c8] sm:$0xff] }
  0x68   :  { %2370 = vmatpush.bf16.msrb.mxu2 %v3750_v4  ;;  %v19_v4 = vld [vmem:[%s4729_s0 + $0x40] sm:$0xff] }
  0x69   :  { %2383 = vmatpush.bf16.msrb.mxu3 %v3758_v5  ;;  %v20_v5 = vld [vmem:[%s4729_s0 + $0x48] sm:$0xff] }
  0x6a   :  { %2345 = vmatpush.bf16.msrb.mxu0 %v3733_v6  ;;  %v3760_v6 = vld [vmem:[%s4728_s1 + $0x400] sm:$0xff] }
  0x6b   :  { %2358 = vmatpush.bf16.msrb.mxu1 %v3741_v7  ;;  %v3768_v7 = vld [vmem:[%s4728_s1 + $0x440] sm:$0xff] }
  0x6c   :  { %2371 = vmatpush.bf16.msrb.mxu2 %v3749_v8  ;;  %v571_v8 = vunpack.c.l.b16 %v19_v4 }
  0x6d   :  { %2384 = vmatpush.bf16.msrb.mxu3 %v3757_v9  ;;  %v573_v9 = vunpack.c.l.b16 %v20_v5 }
  0x6e   :  { %2346 = vmatpush.bf16.msrb.mxu0 %v3732_v10  ;;  %v3776_v10 = vld [vmem:[%s4728_s1 + $0x480] sm:$0xff] }
  0x6f   :  { %2359 = vmatpush.bf16.msrb.mxu1 %v3740_v11  ;;  %v3784_v11 = vld [vmem:[%s4728_s1 + $0x4c0] sm:$0xff] }
  0x70   :  { %2372 = vmatpush.bf16.msrb.mxu2 %v3748_v12  ;;  %v572_v12 = vunpack.c.h.b16 %v19_v4  ;;  %v3839_v4 = vld [vmem:[%s4728_s1 + $0x678] sm:$0xff] }
  0x71   :  { %2385 = vmatpush.bf16.msrb.mxu3 %v3756_v13  ;;  %v574_v13 = vunpack.c.h.b16 %v20_v5  ;;  %v3847_v5 = vld [vmem:[%s4728_s1 + $0x6b8] sm:$0xff] }
  0x72   :  { %2347 = vmatpush.bf16.msrb.mxu0 %v3731_v14  ;;  %v3799_v14 = vld [vmem:[%s4728_s1 + $0x538] sm:$0xff] }
  0x73   :  { %2360 = vmatpush.bf16.msrb.mxu1 %v3739_v15  ;;  %v3807_v15 = vld [vmem:[%s4728_s1 + $0x578] sm:$0xff] }
  0x74   :  { %2373 = vmatpush.bf16.msrb.mxu2 %v3747_v16  ;;  %v3815_v16 = vld [vmem:[%s4728_s1 + $0x5b8] sm:$0xff] }
  0x75   :  { %2386 = vmatpush.bf16.msrb.mxu3 %v3755_v17  ;;  %v3823_v17 = vld [vmem:[%s4728_s1 + $0x5f8] sm:$0xff] }
  0x76   :  { %2348 = vmatpush.bf16.msrb.mxu0 %v3730_v18  ;;  %v603_v18 = vpack.c.b16 %v571_v8, %v571_v8 }
  0x77   :  { %2361 = vmatpush.bf16.msrb.mxu1 %v3738_v19  ;;  %v605_v19 = vpack.c.b16 %v573_v9, %v573_v9 }
  0x78   :  { %2374 = vmatpush.bf16.msrb.mxu2 %v3746_v20  ;;  %v604_v20 = vpack.c.b16 %v572_v12, %v572_v12  ;;  %v3838_v12 = vld [vmem:[%s4728_s1 + $0x670] sm:$0xff] }
  0x79   :  { %2387 = vmatpush.bf16.msrb.mxu3 %v3754_v21  ;;  %v606_v21 = vpack.c.b16 %v574_v13, %v574_v13  ;;  %v3846_v13 = vld [vmem:[%s4728_s1 + $0x6b0] sm:$0xff] }
  0x7a   :  { %2349 = vmatpush.bf16.msrb.mxu0 %v3729_v22  ;;  %v3798_v22 = vld [vmem:[%s4728_s1 + $0x530] sm:$0xff] }
  0x7b   :  { %2362 = vmatpush.bf16.msrb.mxu1 %v3737_v23  ;;  %v3806_v23 = vld [vmem:[%s4728_s1 + $0x570] sm:$0xff] }
  0x7c   :  { %2375 = vmatpush.bf16.msrb.mxu2 %v3745_v24  ;;  %v3814_v24 = vld [vmem:[%s4728_s1 + $0x5b0] sm:$0xff] }
  0x7d   :  { %2388 = vmatpush.bf16.msrb.mxu3 %v3753_v25  ;;  %v3822_v25 = vld [vmem:[%s4728_s1 + $0x5f0] sm:$0xff] }
  0x7e   :  { %2350 = vmatpush.bf16.msrb.mxu0 %v3728_v28  ;;  %v3813_v28 = vld [vmem:[%s4728_s1 + $0x5a8] sm:$0xff] }
  0x7f   :  { %2363 = vmatpush.bf16.msrb.mxu1 %v3736_v29  ;;  %v3821_v29 = vld [vmem:[%s4728_s1 + $0x5e8] sm:$0xff] }
  0x80   :  { %2376 = vmatpush.bf16.msrb.mxu2 %v3744_v32  ;;  %v3804_v32 = vld [vmem:[%s4728_s1 + $0x560] sm:$0xff] }
  0x81   :  { %2389 = vmatpush.bf16.msrb.mxu3 %v3752_v33  ;;  %2351 = vmatmul.bf16.vlgmr.msrb.gmra.mxu0 %v599_v40  ;;  %v3819_v40 = vld [vmem:[%s4728_s1 + $0x5d8] sm:$0xff] }
  0x82   :  { %2395 = vmatpush.bf16.msra.mxu0 %v3767_v36  ;;  %2364 = vmatmul.bf16.vlgmr.msrb.gmra.mxu1 %v600_v42 }
  0x83   :  { %2408 = vmatpush.bf16.msra.mxu1 %v3775_v37  ;;  %2377 = vmatmul.bf16.vlgmr.msrb.gmra.mxu2 %v601_v41  ;;  %v3795_v37 = vld [vmem:[%s4728_s1 + $0x518] sm:$0xff] }
  0x84   :  { %2421 = vmatpush.bf16.msra.mxu2 %v3783_v38  ;;  %2390 = vmatmul.bf16.vlgmr.msrb.gmra.mxu3 %v602_v43  ;;  %v3803_v38 = vld [vmem:[%s4728_s1 + $0x558] sm:$0xff] }
  0x85   :  { %2434 = vmatpush.bf16.msra.mxu3 %v3791_v39  ;;  %v3811_v39 = vld [vmem:[%s4728_s1 + $0x598] sm:$0xff] }
  0x86   :  { %2396 = vmatpush.bf16.msra.mxu0 %v3766_v44 }
  0x87   :  { %2409 = vmatpush.bf16.msra.mxu1 %v3774_v45  ;;  %v3794_v45 = vld [vmem:[%s4728_s1 + $0x510] sm:$0xff] }
  0x88   :  { %2422 = vmatpush.bf16.msra.mxu2 %v3782_v46  ;;  %v3802_v46 = vld [vmem:[%s4728_s1 + $0x550] sm:$0xff] }
  0x89   :  { %2435 = vmatpush.bf16.msra.mxu3 %v3790_v47 }
  0x8a   :  { %2397 = vmatpush.bf16.msra.mxu0 %v3765_v48 }
  0x8b   :  { %2410 = vmatpush.bf16.msra.mxu1 %v3773_v49  ;;  %v3810_v49 = vld [vmem:[%s4728_s1 + $0x590] sm:$0xff] }
  0x8c   :  { %2423 = vmatpush.bf16.msra.mxu2 %v3781_v50  ;;  %v3818_v50 = vld [vmem:[%s4728_s1 + $0x5d0] sm:$0xff] }
  0x8d   :  { %2436 = vmatpush.bf16.msra.mxu3 %v3789_v51  ;;  %v3793_v51 = vld [vmem:[%s4728_s1 + $0x508] sm:$0xff] }
  0x8e   :  { %2398 = vmatpush.bf16.msra.mxu0 %v3764_v52  ;;  %v3801_v52 = vld [vmem:[%s4728_s1 + $0x548] sm:$0xff] }
  0x8f   :  { %2411 = vmatpush.bf16.msra.mxu1 %v3772_v53  ;;  %v3809_v53 = vld [vmem:[%s4728_s1 + $0x588] sm:$0xff] }
  0x90   :  { %2424 = vmatpush.bf16.msra.mxu2 %v3780_v54  ;;  %v3817_v54 = vld [vmem:[%s4728_s1 + $0x5c8] sm:$0xff] }
  0x91   :  { %2437 = vmatpush.bf16.msra.mxu3 %v3788_v55  ;;  %v21_v55 = vld [vmem:[%s4729_s0 + $0x50] sm:$0xff] }
  0x92   :  { %2399 = vmatpush.bf16.msra.mxu0 %v3763_v56  ;;  %v22_v56 = vld [vmem:[%s4729_s0 + $0x58] sm:$0xff] }
  0x93   :  { %2412 = vmatpush.bf16.msra.mxu1 %v3771_v57 }
  0x94   :  { %2425 = vmatpush.bf16.msra.mxu2 %v3779_v58 }
  0x95   :  { %2438 = vmatpush.bf16.msra.mxu3 %v3787_v59  ;;  %v3792_v59 = vld [vmem:[%s4728_s1 + $0x500] sm:$0xff] }
  0x96   :  { %2400 = vmatpush.bf16.msra.mxu0 %v3762_v60  ;;  %v3800_v60 = vld [vmem:[%s4728_s1 + $0x540] sm:$0xff] }
  0x97   :  { %2413 = vmatpush.bf16.msra.mxu1 %v3770_v61  ;;  %v575_v61 = vunpack.c.l.b16 %v21_v55 }
  0x98   :  { %2426 = vmatpush.bf16.msra.mxu2 %v3778_v62  ;;  %v577_v62 = vunpack.c.l.b16 %v22_v56 }
  0x99   :  { %2439 = vmatpush.bf16.msra.mxu3 %v3786_v63  ;;  %v3808_v63 = vld [vmem:[%s4728_s1 + $0x580] sm:$0xff] }
  0x9a   :  { %2401 = vmatpush.bf16.msra.mxu0 %v3761_v0  ;;  %v3816_v0 = vld [vmem:[%s4728_s1 + $0x5c0] sm:$0xff]  ;;  %v609_v8 = vpack.c.b16 %v577_v62, %v577_v62 }
  0x9b   :  { %2414 = vmatpush.bf16.msra.mxu1 %v3769_v1  ;;  %v576_v1 = vunpack.c.h.b16 %v21_v55 }
  0x9c   :  { %2427 = vmatpush.bf16.msra.mxu2 %v3777_v2  ;;  %v578_v2 = vunpack.c.h.b16 %v22_v56 }
  0x9d   :  { %2440 = vmatpush.bf16.msra.mxu3 %v3785_v3  ;;  %v3831_v3 = vld [vmem:[%s4728_s1 + $0x638] sm:$0xff]  ;;  %v608_v9 = vpack.c.b16 %v576_v1, %v576_v1  ;;  %v3862_v1 = vld [vmem:[%s4728_s1 + $0x730] sm:$0xff] }
  0x9e   :  { %2402 = vmatpush.bf16.msra.mxu0 %v3760_v6  ;;  %v2196_v30 = vpop.f32.mrf.mxu0  ;;  %v3855_v6 = vld [vmem:[%s4728_s1 + $0x6f8] sm:$0xff] }
  0x9f   :  { %2415 = vmatpush.bf16.msra.mxu1 %v3768_v7  ;;  %v2209_v33 = vpop.f32.mrf.mxu1  ;;  %v607_v7 = vpack.c.b16 %v575_v61, %v575_v61 }
  0xa0   :  { %2428 = vmatpush.bf16.msra.mxu2 %v3776_v10  ;;  %v2210_v36 = vadd.f32 %v2209_v33, %v2196_v30  ;;  %v610_v10 = vpack.c.b16 %v578_v2, %v578_v2  ;;  %v3851_v30 = vld [vmem:[%s4728_s1 + $0x6d8] sm:$0xff]  ;;  %v3870_v2 = vld [vmem:[%s4728_s1 + $0x770] sm:$0xff] }
  0xa1   :  { %2441 = vmatpush.bf16.msra.mxu3 %v3784_v11  ;;  %2403 = vmatmul.bf16.vlgmr.msra.gmra.mxu0 %v603_v18  ;;  %v3830_v11 = vld [vmem:[%s4728_s1 + $0x630] sm:$0xff]  ;;  %v3853_v18 = vld [vmem:[%s4728_s1 + $0x6e8] sm:$0xff] }
  0xa2   :  { %2447 = vmatpush.bf16.msrb.mxu0 %v3799_v14  ;;  %2416 = vmatmul.bf16.vlgmr.msra.gmra.mxu1 %v604_v20  ;;  %v3854_v14 = vld [vmem:[%s4728_s1 + $0x6f0] sm:$0xff]  ;;  %v3828_v20 = vld [vmem:[%s4728_s1 + $0x620] sm:$0xff] }
  0xa3   :  { %2460 = vmatpush.bf16.msrb.mxu1 %v3807_v15  ;;  %2429 = vmatmul.bf16.vlgmr.msra.gmra.mxu2 %v605_v19  ;;  %v3829_v15 = vld [vmem:[%s4728_s1 + $0x628] sm:$0xff] }
  0xa4   :  { %2473 = vmatpush.bf16.msrb.mxu2 %v3815_v16  ;;  %2442 = vmatmul.bf16.vlgmr.msra.gmra.mxu3 %v606_v21  ;;  %v3837_v16 = vld [vmem:[%s4728_s1 + $0x668] sm:$0xff]  ;;  %v3836_v21 = vld [vmem:[%s4728_s1 + $0x660] sm:$0xff] }
  0xa5   :  { %2486 = vmatpush.bf16.msrb.mxu3 %v3823_v17  ;;  %v3845_v17 = vld [vmem:[%s4728_s1 + $0x6a8] sm:$0xff] }
  0xa6   :  { %2448 = vmatpush.bf16.msrb.mxu0 %v3798_v22  ;;  %v2222_v41 = vpop.f32.mrf.mxu2  ;;  %v2198_v44 = vpop.f32.mrf.mxu0 }
  0xa7   :  { %2461 = vmatpush.bf16.msrb.mxu1 %v3806_v23  ;;  %v2223_v42 = vadd.f32 %v2222_v41, %v2210_v36  ;;  %v2235_v43 = vpop.f32.mrf.mxu3  ;;  %v2211_v48 = vpop.f32.mrf.mxu1  ;;  %v3834_v36 = vld [vmem:[%s4728_s1 + $0x650] sm:$0xff]  ;;  %v3825_v41 = vld [vmem:[%s4728_s1 + $0x608] sm:$0xff] }
  0xa8   :  { %2474 = vmatpush.bf16.msrb.mxu2 %v3814_v24  ;;  %v3844_v24 = vld [vmem:[%s4728_s1 + $0x6a0] sm:$0xff]  ;;  %v3849_v44 = vld [vmem:[%s4728_s1 + $0x6c8] sm:$0xff] }
  0xa9   :  { %2487 = vmatpush.bf16.msrb.mxu3 %v3822_v25  ;;  %v4479_v47 = vadd.f32 %v2235_v43, %v2223_v42  ;;  %v3852_v25 = vld [vmem:[%s4728_s1 + $0x6e0] sm:$0xff]  ;;  %v3833_v42 = vld [vmem:[%s4728_s1 + $0x648] sm:$0xff] }
  0xaa   :  { %2449 = vmatpush.bf16.msrb.mxu0 %v3797_v26  ;;  %v3841_v43 = vld [vmem:[%s4728_s1 + $0x688] sm:$0xff] }
  0xab   :  { %2462 = vmatpush.bf16.msrb.mxu1 %v3805_v27  ;;  %v3827_v27 = vld [vmem:[%s4728_s1 + $0x618] sm:$0xff] }
  0xac   :  { %2475 = vmatpush.bf16.msrb.mxu2 %v3813_v28  ;;  %v3835_v28 = vld [vmem:[%s4728_s1 + $0x658] sm:$0xff] }
  0xad   :  { %2488 = vmatpush.bf16.msrb.mxu3 %v3821_v29  ;;  %v3843_v29 = vld [vmem:[%s4728_s1 + $0x698] sm:$0xff] }
  0xae   :  { %2450 = vmatpush.bf16.msrb.mxu0 %v3796_v31  ;;  %v2224_v57 = vpop.f32.mrf.mxu2 }
  0xaf   :  { %2463 = vmatpush.bf16.msrb.mxu1 %v3804_v32  ;;  %v2237_v58 = vpop.f32.mrf.mxu3  ;;  %v3863_v57 = vld [vmem:[%s4728_s1 + $0x738] sm:$0xff] }
  0xb0   :  { %2476 = vmatpush.bf16.msrb.mxu2 %v3812_v34  ;;  %v3871_v58 = vld [vmem:[%s4728_s1 + $0x778] sm:$0xff] }
  0xb1   :  { %2489 = vmatpush.bf16.msrb.mxu3 %v3820_v35  ;;  %v3826_v35 = vld [vmem:[%s4728_s1 + $0x610] sm:$0xff] }
  0xb2   :  { %2451 = vmatpush.bf16.msrb.mxu0 %v3795_v37 }
  0xb3   :  { %2464 = vmatpush.bf16.msrb.mxu1 %v3803_v38 }
  0xb4   :  { %2477 = vmatpush.bf16.msrb.mxu2 %v3811_v39  ;;  %v3842_v39 = vld [vmem:[%s4728_s1 + $0x690] sm:$0xff] }
  0xb5   :  { %2490 = vmatpush.bf16.msrb.mxu3 %v3819_v40  ;;  %v3850_v40 = vld [vmem:[%s4728_s1 + $0x6d0] sm:$0xff] }
  0xb6   :  { %2452 = vmatpush.bf16.msrb.mxu0 %v3794_v45  ;;  %v23_v45 = vld [vmem:[%s4729_s0 + $0x60] sm:$0xff] }
  0xb7   :  { %2465 = vmatpush.bf16.msrb.mxu1 %v3802_v46  ;;  %v24_v46 = vld [vmem:[%s4729_s0 + $0x68] sm:$0xff]  ;;  %v580_v55 = vunpack.c.h.b16 %v23_v45 }
  0xb8   :  { %2478 = vmatpush.bf16.msrb.mxu2 %v3810_v49  ;;  %v3824_v49 = vld [vmem:[%s4728_s1 + $0x600] sm:$0xff]  ;;  %v582_v56 = vunpack.c.h.b16 %v24_v46 }
  0xb9   :  { %2491 = vmatpush.bf16.msrb.mxu3 %v3818_v50  ;;  %v3832_v50 = vld [vmem:[%s4728_s1 + $0x640] sm:$0xff] }
  0xba   :  { %2453 = vmatpush.bf16.msrb.mxu0 %v3793_v51  ;;  %v579_v51 = vunpack.c.l.b16 %v23_v45  ;;  %v3872_v45 = vld [vmem:[%s4728_s1 + $0x780] sm:$0xff] }
  0xbb   :  { %2466 = vmatpush.bf16.msrb.mxu1 %v3801_v52  ;;  %v581_v52 = vunpack.c.l.b16 %v24_v46  ;;  %v3880_v46 = vld [vmem:[%s4728_s1 + $0x7c0] sm:$0xff] }
  0xbc   :  { %2479 = vmatpush.bf16.msrb.mxu2 %v3809_v53  ;;  %v3840_v53 = vld [vmem:[%s4728_s1 + $0x680] sm:$0xff]  ;;  %v611_v61 = vpack.c.b16 %v579_v51, %v579_v51 }
  0xbd   :  { %2492 = vmatpush.bf16.msrb.mxu3 %v3817_v54  ;;  %v3848_v54 = vld [vmem:[%s4728_s1 + $0x6c0] sm:$0xff]  ;;  %v613_v62 = vpack.c.b16 %v581_v52, %v581_v52 }
  0xbe   :  { %2454 = vmatpush.bf16.msrb.mxu0 %v3792_v59  ;;  %v2248_v19 = vpop.f32.mrf.mxu0  ;;  %v3879_v59 = vld [vmem:[%s4728_s1 + $0x7b8] sm:$0xff] }
  0xbf   :  { %2467 = vmatpush.bf16.msrb.mxu1 %v3800_v60  ;;  %v2249_v22 = vadd.f32 %v2248_v19, %v4479_v47  ;;  %v2261_v23 = vpop.f32.mrf.mxu1  ;;  %v3887_v60 = vld [vmem:[%s4728_s1 + $0x7f8] sm:$0xff] }
  0xc0   :  { %2480 = vmatpush.bf16.msrb.mxu2 %v3808_v63  ;;  %v612_v63 = vpack.c.b16 %v580_v55, %v580_v55  ;;  %v3875_v19 = vld [vmem:[%s4728_s1 + $0x798] sm:$0xff] }
  0xc1   :  { %2493 = vmatpush.bf16.msrb.mxu3 %v3816_v0  ;;  %2455 = vmatmul.bf16.vlgmr.msrb.gmra.mxu0 %v607_v7  ;;  %v2262_v26 = vadd.f32 %v2261_v23, %v2249_v22  ;;  %v614_v0 = vpack.c.b16 %v582_v56, %v582_v56  ;;  %v3877_v7 = vld [vmem:[%s4728_s1 + $0x7a8] sm:$0xff] }
  0xc2   :  { %2499 = vmatpush.bf16.msra.mxu0 %v3831_v3  ;;  %2468 = vmatmul.bf16.vlgmr.msrb.gmra.mxu1 %v608_v9  ;;  %v3878_v3 = vld [vmem:[%s4728_s1 + $0x7b0] sm:$0xff] }
  0xc3   :  { %2512 = vmatpush.bf16.msra.mxu1 %v3839_v4  ;;  %2481 = vmatmul.bf16.vlgmr.msrb.gmra.mxu2 %v609_v8  ;;  %v3886_v4 = vld [vmem:[%s4728_s1 + $0x7f0] sm:$0xff]  ;;  %v3885_v8 = vld [vmem:[%s4728_s1 + $0x7e8] sm:$0xff] }
  0xc4   :  { %2525 = vmatpush.bf16.msra.mxu2 %v3847_v5  ;;  %2494 = vmatmul.bf16.vlgmr.msrb.gmra.mxu3 %v610_v10  ;;  %v3861_v5 = vld [vmem:[%s4728_s1 + $0x728] sm:$0xff] }
  0xc5   :  { %2538 = vmatpush.bf16.msra.mxu3 %v3855_v6  ;;  %v3869_v6 = vld [vmem:[%s4728_s1 + $0x768] sm:$0xff] }
  0xc6   :  { %2500 = vmatpush.bf16.msra.mxu0 %v3830_v11  ;;  %v2274_v31 = vpop.f32.mrf.mxu2  ;;  %v2250_v34 = vpop.f32.mrf.mxu0  ;;  %v3860_v11 = vld [vmem:[%s4728_s1 + $0x720] sm:$0xff] }
  0xc7   :  { %2513 = vmatpush.bf16.msra.mxu1 %v3838_v12  ;;  %v2275_v32 = vadd.f32 %v2274_v31, %v2262_v26  ;;  %v2287_v33 = vpop.f32.mrf.mxu3  ;;  %v2263_v38 = vpop.f32.mrf.mxu1  ;;  %v3868_v12 = vld [vmem:[%s4728_s1 + $0x760] sm:$0xff]  ;;  %v3858_v26 = vld [vmem:[%s4728_s1 + $0x710] sm:$0xff]  ;;  %v3857_v31 = vld [vmem:[%s4728_s1 + $0x708] sm:$0xff] }
  0xc8   :  { %2526 = vmatpush.bf16.msra.mxu2 %v3846_v13  ;;  %v3873_v34 = vld [vmem:[%s4728_s1 + $0x788] sm:$0xff] }
  0xc9   :  { %2539 = vmatpush.bf16.msra.mxu3 %v3854_v14  ;;  %v4584_v37 = vadd.f32 %v2287_v33, %v2275_v32  ;;  %v3876_v14 = vld [vmem:[%s4728_s1 + $0x7a0] sm:$0xff]  ;;  %v3865_v32 = vld [vmem:[%s4728_s1 + $0x748] sm:$0xff]  ;;  %v25_v33 = vld [vmem:[%s4729_s0 + $0x70] sm:$0xff] }
  0xca   :  { %2501 = vmatpush.bf16.msra.mxu0 %v3829_v15  ;;  %v3884_v15 = vld [vmem:[%s4728_s1 + $0x7e0] sm:$0xff] }
  0xcb   :  { %2514 = vmatpush.bf16.msra.mxu1 %v3837_v16 }
  0xcc   :  { %2527 = vmatpush.bf16.msra.mxu2 %v3845_v17  ;;  %v3859_v17 = vld [vmem:[%s4728_s1 + $0x718] sm:$0xff] }
  0xcd   :  { %2540 = vmatpush.bf16.msra.mxu3 %v3853_v18  ;;  %v3867_v18 = vld [vmem:[%s4728_s1 + $0x758] sm:$0xff] }
  0xce   :  { %2502 = vmatpush.bf16.msra.mxu0 %v3828_v20  ;;  %v2276_v47 = vpop.f32.mrf.mxu2  ;;  %v3883_v20 = vld [vmem:[%s4728_s1 + $0x7d8] sm:$0xff] }
  0xcf   :  { %2515 = vmatpush.bf16.msra.mxu1 %v3836_v21  ;;  %v2289_v48 = vpop.f32.mrf.mxu3 }
  0xd0   :  { %2528 = vmatpush.bf16.msra.mxu2 %v3844_v24 }
  0xd1   :  { %2541 = vmatpush.bf16.msra.mxu3 %v3852_v25 }
  0xd2   :  { %2503 = vmatpush.bf16.msra.mxu0 %v3827_v27  ;;  %v3866_v27 = vld [vmem:[%s4728_s1 + $0x750] sm:$0xff] }
  0xd3   :  { %2516 = vmatpush.bf16.msra.mxu1 %v3835_v28 }
  0xd4   :  { %2529 = vmatpush.bf16.msra.mxu2 %v3843_v29  ;;  %v3874_v29 = vld [vmem:[%s4728_s1 + $0x790] sm:$0xff] }
  0xd5   :  { %2542 = vmatpush.bf16.msra.mxu3 %v3851_v30  ;;  %v3882_v30 = vld [vmem:[%s4728_s1 + $0x7d0] sm:$0xff] }
  0xd6   :  { %2504 = vmatpush.bf16.msra.mxu0 %v3826_v35  ;;  %v3881_v35 = vld [vmem:[%s4728_s1 + $0x7c8] sm:$0xff] }
  0xd7   :  { %2517 = vmatpush.bf16.msra.mxu1 %v3834_v36  ;;  %v26_v36 = vld [vmem:[%s4729_s0 + $0x78] sm:$0xff] }
  0xd8   :  { %2530 = vmatpush.bf16.msra.mxu2 %v3842_v39  ;;  %v583_v39 = vunpack.c.l.b16 %v25_v33 }
  0xd9   :  { %2543 = vmatpush.bf16.msra.mxu3 %v3850_v40  ;;  %v584_v40 = vunpack.c.h.b16 %v25_v33 }
  0xda   :  { %2505 = vmatpush.bf16.msra.mxu0 %v3825_v41  ;;  %v3856_v41 = vld [vmem:[%s4728_s1 + $0x700] sm:$0xff]  ;;  %v615_v47 = vpack.c.b16 %v583_v39, %v583_v39 }
  0xdb   :  { %2518 = vmatpush.bf16.msra.mxu1 %v3833_v42  ;;  %v3864_v42 = vld [vmem:[%s4728_s1 + $0x740] sm:$0xff]  ;;  %v616_v48 = vpack.c.b16 %v584_v40, %v584_v40 }
  0xdc   :  { %2531 = vmatpush.bf16.msra.mxu2 %v3841_v43  ;;  %v585_v43 = vunpack.c.l.b16 %v26_v36 }
  0xdd   :  { %2544 = vmatpush.bf16.msra.mxu3 %v3849_v44  ;;  %v586_v44 = vunpack.c.h.b16 %v26_v36 }
  0xde   :  { %2506 = vmatpush.bf16.msra.mxu0 %v3824_v49  ;;  %v2300_v9 = vpop.f32.mrf.mxu0  ;;  %v617_v49 = vpack.c.b16 %v585_v43, %v585_v43 }
  0xdf   :  { %2519 = vmatpush.bf16.msra.mxu1 %v3832_v50  ;;  %v2301_v10 = vadd.f32 %v2300_v9, %v4584_v37  ;;  %v2313_v13 = vpop.f32.mrf.mxu1  ;;  %v618_v50 = vpack.c.b16 %v586_v44, %v586_v44 }
  0xe0   :  { %2532 = vmatpush.bf16.msra.mxu2 %v3840_v53 }
  0xe1   :  { %2545 = vmatpush.bf16.msra.mxu3 %v3848_v54  ;;  %2507 = vmatmul.bf16.vlgmr.msra.gmra.mxu0 %v611_v61  ;;  %v2314_v16 = vadd.f32 %v2313_v13, %v2301_v10 }
  0xe2   :  { %2551 = vmatpush.bf16.msrb.mxu0 %v3863_v57  ;;  %2520 = vmatmul.bf16.vlgmr.msra.gmra.mxu1 %v612_v63 }
  0xe3   :  { %2564 = vmatpush.bf16.msrb.mxu1 %v3871_v58  ;;  %2533 = vmatmul.bf16.vlgmr.msra.gmra.mxu2 %v613_v62 }
  0xe4   :  { %2577 = vmatpush.bf16.msrb.mxu2 %v3879_v59  ;;  %2546 = vmatmul.bf16.vlgmr.msra.gmra.mxu3 %v614_v0 }
  0xe5   :  { %2590 = vmatpush.bf16.msrb.mxu3 %v3887_v60 }
  0xe6   :  { %2552 = vmatpush.bf16.msrb.mxu0 %v3862_v1  ;;  %v2326_v21 = vpop.f32.mrf.mxu2  ;;  %v2302_v24 = vpop.f32.mrf.mxu0 }
  0xe7   :  { %2565 = vmatpush.bf16.msrb.mxu1 %v3870_v2  ;;  %v2327_v22 = vadd.f32 %v2326_v21, %v2314_v16  ;;  %v2339_v23 = vpop.f32.mrf.mxu3  ;;  %v2315_v28 = vpop.f32.mrf.mxu1 }
  0xe8   :  { %2578 = vmatpush.bf16.msrb.mxu2 %v3878_v3 }
  0xe9   :  { %2591 = vmatpush.bf16.msrb.mxu3 %v3886_v4  ;;  %v2340_v25 = vadd.f32 %v2339_v23, %v2327_v22 }
  0xea   :  { %2553 = vmatpush.bf16.msrb.mxu0 %v3861_v5 }
  0xeb   :  { %2566 = vmatpush.bf16.msrb.mxu1 %v3869_v6 }
  0xec   :  { %2579 = vmatpush.bf16.msrb.mxu2 %v3877_v7 }
  0xed   :  { %2592 = vmatpush.bf16.msrb.mxu3 %v3885_v8 }
  0xee   :  { %2554 = vmatpush.bf16.msrb.mxu0 %v3860_v11  ;;  %v2328_v37 = vpop.f32.mrf.mxu2 }
  0xef   :  { %2567 = vmatpush.bf16.msrb.mxu1 %v3868_v12  ;;  %v2341_v38 = vpop.f32.mrf.mxu3 }
  0xf0   :  { %2580 = vmatpush.bf16.msrb.mxu2 %v3876_v14 }
  0xf1   :  { %2593 = vmatpush.bf16.msrb.mxu3 %v3884_v15 }
  0xf2   :  { %2555 = vmatpush.bf16.msrb.mxu0 %v3859_v17 }
  0xf3   :  { %2568 = vmatpush.bf16.msrb.mxu1 %v3867_v18 }
  0xf4   :  { %2581 = vmatpush.bf16.msrb.mxu2 %v3875_v19 }
  0xf5   :  { %2594 = vmatpush.bf16.msrb.mxu3 %v3883_v20 }
  0xf6   :  { %2556 = vmatpush.bf16.msrb.mxu0 %v3858_v26 }
  0xf7   :  { %2569 = vmatpush.bf16.msrb.mxu1 %v3866_v27 }
  0xf8   :  { %2582 = vmatpush.bf16.msrb.mxu2 %v3874_v29 }
  0xf9   :  { %2595 = vmatpush.bf16.msrb.mxu3 %v3882_v30 }
  0xfa   :  { %2557 = vmatpush.bf16.msrb.mxu0 %v3857_v31 }
  0xfb   :  { %2570 = vmatpush.bf16.msrb.mxu1 %v3865_v32 }
  0xfc   :  { %2583 = vmatpush.bf16.msrb.mxu2 %v3873_v34 }
  0xfd   :  { %2596 = vmatpush.bf16.msrb.mxu3 %v3881_v35 }
  0xfe   :  { %2558 = vmatpush.bf16.msrb.mxu0 %v3856_v41  ;;  %v2352_v51 = vpop.f32.mrf.mxu0 }
  0xff   :  { %2571 = vmatpush.bf16.msrb.mxu1 %v3864_v42  ;;  %v2353_v52 = vadd.f32 %v2352_v51, %v2340_v25  ;;  %v2365_v53 = vpop.f32.mrf.mxu1 }
 0x100   :  { %2584 = vmatpush.bf16.msrb.mxu2 %v3872_v45 }
 0x101   :  { %2597 = vmatpush.bf16.msrb.mxu3 %v3880_v46  ;;  %2559 = vmatmul.bf16.vlgmr.msrb.gmra.mxu0 %v615_v47  ;;  %v2366_v54 = vadd.f32 %v2365_v53, %v2353_v52 }
 0x102   :  { %2572 = vmatmul.bf16.vlgmr.msrb.gmra.mxu1 %v616_v48 }
 0x103   :  { %2585 = vmatmul.bf16.vlgmr.msrb.gmra.mxu2 %v617_v49 }
 0x104   :  { %2598 = vmatmul.bf16.vlgmr.msrb.gmra.mxu3 %v618_v50 }
 0x106   :  { %v2378_v55 = vpop.f32.mrf.mxu2  ;;  %v2354_v58 = vpop.f32.mrf.mxu0 }
 0x107   :  { %v2379_v56 = vadd.f32 %v2378_v55, %v2366_v54  ;;  %v2391_v57 = vpop.f32.mrf.mxu3  ;;  %v2367_v60 = vpop.f32.mrf.mxu1 }
 0x109   :  { %v2392_v59 = vadd.f32 %v2391_v57, %v2379_v56 }
 0x10e   :  { %v2380_v61 = vpop.f32.mrf.mxu2 }
 0x10f   :  { %v2393_v62 = vpop.f32.mrf.mxu3 }
 0x11e   :  { %v2404_v63 = vpop.f32.mrf.mxu0 }
 0x11f   :  { %v2405_v0 = vadd.f32 %v2404_v63, %v2392_v59  ;;  %v2417_v1 = vpop.f32.mrf.mxu1 }
 0x121   :  { %v2418_v2 = vadd.f32 %v2417_v1, %v2405_v0 }
 0x126   :  { %v2430_v3 = vpop.f32.mrf.mxu2  ;;  %v2406_v6 = vpop.f32.mrf.mxu0 }
 0x127   :  { %v2431_v4 = vadd.f32 %v2430_v3, %v2418_v2  ;;  %v2443_v5 = vpop.f32.mrf.mxu3  ;;  %v2419_v8 = vpop.f32.mrf.mxu1 }
 0x129   :  { %v2444_v7 = vadd.f32 %v2443_v5, %v2431_v4 }
 0x12e   :  { %v2432_v9 = vpop.f32.mrf.mxu2 }
 0x12f   :  { %v2445_v10 = vpop.f32.mrf.mxu3 }
 0x13e   :  { %v2456_v11 = vpop.f32.mrf.mxu0 }
 0x13f   :  { %v2469_v12 = vpop.f32.mrf.mxu1  ;;  %v2457_v22 = vadd.f32 %v2456_v11, %v2444_v7 }
 0x141   :  { %v2470_v26 = vadd.f32 %v2469_v12, %v2457_v22 }
 0x146   :  { %v2482_v13 = vpop.f32.mrf.mxu2  ;;  %v2458_v15 = vpop.f32.mrf.mxu0 }
 0x147   :  { %v2495_v14 = vpop.f32.mrf.mxu3  ;;  %v2471_v16 = vpop.f32.mrf.mxu1  ;;  %v2483_v27 = vadd.f32 %v2482_v13, %v2470_v26 }
 0x149   :  { %v2496_v30 = vadd.f32 %v2495_v14, %v2483_v27 }
 0x14e   :  { %v2484_v17 = vpop.f32.mrf.mxu2 }
 0x14f   :  { %v2497_v18 = vpop.f32.mrf.mxu3 }
 0x15e   :  { %v2508_v19 = vpop.f32.mrf.mxu0 }
 0x15f   :  { %v2521_v20 = vpop.f32.mrf.mxu1  ;;  %v2509_v31 = vadd.f32 %v2508_v19, %v2496_v30 }
 0x161   :  { %v2522_v32 = vadd.f32 %v2521_v20, %v2509_v31 }
 0x166   :  { %v2534_v21 = vpop.f32.mrf.mxu2  ;;  %v2510_v24 = vpop.f32.mrf.mxu0 }
 0x167   :  { %v2547_v23 = vpop.f32.mrf.mxu3  ;;  %v2523_v25 = vpop.f32.mrf.mxu1  ;;  %v2535_v33 = vadd.f32 %v2534_v21, %v2522_v32 }
 0x169   :  { %v2548_v34 = vadd.f32 %v2547_v23, %v2535_v33 }
 0x16e   :  { %v2536_v28 = vpop.f32.mrf.mxu2 }
 0x16f   :  { %v2549_v29 = vpop.f32.mrf.mxu3 }
 0x17e   :  { %v2560_v35 = vpop.f32.mrf.mxu0 }
 0x17f   :  { %v2573_v36 = vpop.f32.mrf.mxu1  ;;  %v2561_v37 = vadd.f32 %v2560_v35, %v2548_v34 }
 0x181   :  { %v2574_v38 = vadd.f32 %v2573_v36, %v2561_v37 }
 0x186   :  { %v2586_v39 = vpop.f32.mrf.mxu2  ;;  %v2562_v42 = vpop.f32.mrf.mxu0 }
 0x187   :  { %v2599_v40 = vpop.f32.mrf.mxu3  ;;  %v2587_v41 = vadd.f32 %v2586_v39, %v2574_v38  ;;  %v2575_v43 = vpop.f32.mrf.mxu1 }
 0x189   :  { %v2600_v44 = vadd.f32 %v2599_v40, %v2587_v41 }
 0x18b   :  { %2603 = vst [vmem:[%s4730_s2] sm:$0xff] %v2600_v44 }
 0x18e   :  { %v2588_v45 = vpop.f32.mrf.mxu2 }
 0x18f   :  { %v2601_v46 = vpop.f32.mrf.mxu3 }

</bundles_post_ra>
